<compile_context>
chip_gen: v6e
topology: v6e:2x2x1
jax: 0.10.0
libtpu: 0.0.40
codegen_flags: <defaults>
</compile_context>

<pallas_src>
import functools

import jax
import jax.numpy as jnp
from jax import lax
from jax.experimental import pallas as pl
from jax.experimental.pallas import tpu as pltpu

BN_EPS = 1e-5
LANES = 128


def _round_up(n, m):
    return ((n + m - 1) // m) * m


def _im2col(src, col_ref, Hp, Wp, C):
    """Scatter the 9 shifted taps of a 3x3 / pad=1 conv into col_ref[:, :, :9*C].

    src is a (Hp, Wp, C) value; tap t = kh*3 + kw lands in lanes [t*C, (t+1)*C).
    Out-of-image halo positions are zero-filled (thin 1-row / 1-column strips only),
    so no padded scratch buffer and no full zero-fill are needed.
    """
    dt = col_ref.dtype
    for t in range(9):
        dh, dw = t // 3 - 1, t % 3 - 1
        c0 = t * C
        r0, r1 = max(0, -dh), Hp - max(0, dh)
        q0, q1 = max(0, -dw), Wp - max(0, dw)
        col_ref[r0:r1, q0:q1, c0:c0 + C] = (
            src[r0 + dh:r1 + dh, q0 + dw:q1 + dw, :].astype(dt))
        if dh == -1:
            col_ref[0:1, :, c0:c0 + C] = jnp.zeros((1, Wp, C), dt)
        elif dh == 1:
            col_ref[Hp - 1:Hp, :, c0:c0 + C] = jnp.zeros((1, Wp, C), dt)
        if dw == -1:
            col_ref[:, 0:1, c0:c0 + C] = jnp.zeros((Hp, 1, C), dt)
        elif dw == 1:
            col_ref[:, Wp - 1:Wp, c0:c0 + C] = jnp.zeros((Hp, 1, C), dt)


def _down_kernel(Hp, Wp, Cpi, Cpo,
                 x_ref, w1_ref, s1_ref, b1_ref, w2_ref, s2_ref, b2_ref,
                 o_ref, col_ref):
    # ---- 2x2 max pool (stride 2) --------------------------------------------
    # x_ref block: (1, Hp, 2, Wp, 2*Cpi); lanes [0:Cpi] / [Cpi:2*Cpi] hold the
    # left / right pixel of each horizontal pair -> two lane-aligned maxes.
    m = jnp.maximum(x_ref[0, :, 0, :, :], x_ref[0, :, 1, :, :])    # (Hp, Wp, 2*Cpi)
    pooled = jnp.maximum(m[:, :, :Cpi], m[:, :, Cpi:])             # (Hp, Wp, Cpi)

    # ---- conv1: im2col -> one MXU matmul (K = 9*Cpi), folded BN1 + ReLU -----
    _im2col(pooled, col_ref, Hp, Wp, Cpi)
    patches = col_ref[:, :, :9 * Cpi].reshape(Hp * Wp, 9 * Cpi)
    acc1 = jnp.dot(patches, w1_ref[...], preferred_element_type=jnp.float32)
    h1 = jnp.maximum(acc1 * s1_ref[...] + b1_ref[...], 0.0)        # (Hp*Wp, Cpo) f32

    # ---- conv2: fed straight from h1 (no padded round-trip buffer) ----------
    _im2col(h1.reshape(Hp, Wp, Cpo), col_ref, Hp, Wp, Cpo)
    patches = col_ref[:, :, :9 * Cpo].reshape(Hp * Wp, 9 * Cpo)
    acc2 = jnp.dot(patches, w2_ref[...], preferred_element_type=jnp.float32)
    h2 = jnp.maximum(acc2 * s2_ref[...] + b2_ref[...], 0.0)

    o_ref[0] = h2.reshape(Hp, Wp, Cpo).astype(o_ref.dtype)


def _fold(w_oihw, conv_b, gamma, beta, mean, var, cin_p, cout_p, dtype):
    """Conv weights OIHW -> (9*cin_p, cout_p) im2col matrix; fold bias + BN."""
    cout, cin = w_oihw.shape[0], w_oihw.shape[1]
    w = jnp.transpose(w_oihw, (2, 3, 1, 0)).reshape(9, cin, cout)
    w = jnp.pad(w, ((0, 0), (0, cin_p - cin), (0, cout_p - cout)))
    w = w.reshape(9 * cin_p, cout_p).astype(dtype)
    scale = (gamma / jnp.sqrt(var + BN_EPS)).astype(jnp.float32)
    shift = ((conv_b - mean) * scale + beta).astype(jnp.float32)
    scale = jnp.pad(scale, (0, cout_p - cout)).reshape(1, cout_p)
    shift = jnp.pad(shift, (0, cout_p - cout)).reshape(1, cout_p)
    return w, scale, shift


def down_forward(x_nchw, params, compute_dtype=jnp.float32):
    """Pallas implementation of Down(in_ch, out_ch).forward; NCHW in, NCHW out.

    compute_dtype=jnp.bfloat16 halves HBM/VMEM traffic and doubles MXU rate
    (accumulation stays f32) at ~1e-2 accuracy; default f32 matches PyTorch exactly.
    """
    B, Cin, H, W = x_nchw.shape
    Cout = params["conv1_w"].shape[0]
    Hp, Wp = H // 2, W // 2
    Cpi = _round_up(Cin, LANES)       # lane-dense padded channel counts
    Cpo = _round_up(Cout, LANES)
    cmax = max(Cpi, Cpo)

    # glue: NCHW -> NHWC, pad channels, merge each horizontal pixel pair into lanes
    x = jnp.transpose(x_nchw, (0, 2, 3, 1)).astype(compute_dtype)
    x = jnp.pad(x, ((0, 0), (0, 0), (0, 0), (0, Cpi - Cin)))
    x = x.reshape(B, Hp, 2, Wp, 2 * Cpi)

    w1, s1, b1 = _fold(params["conv1_w"], params["conv1_b"], params["bn1_gamma"],
                       params["bn1_beta"], params["bn1_mean"], params["bn1_var"],
                       Cpi, Cpo, compute_dtype)
    w2, s2, b2 = _fold(params["conv2_w"], params["conv2_b"], params["bn2_gamma"],
                       params["bn2_beta"], params["bn2_mean"], params["bn2_var"],
                       Cpo, Cpo, compute_dtype)

    # explicit scoped-VMEM budget: double-buffered blocks + weights + im2col scratch
    itemsize = jnp.dtype(compute_dtype).itemsize
    working_set = (
        2 * Hp * 2 * Wp * 2 * Cpi * itemsize          # input block (double-buffered)
        + 2 * Hp * Wp * Cpo * 4                        # output block (double-buffered)
        + 2 * 9 * (Cpi + Cpo) * Cpo * itemsize         # both weight matrices
        + Hp * Wp * 9 * cmax * itemsize                # shared im2col scratch
        + Hp * Wp * (9 * cmax + 3 * Cpo) * 4           # live matmul operands / results
    )
    vmem_limit = int(min(max(2 * working_set, 32 * 2 ** 20), 56 * 2 ** 20))

    kernel = functools.partial(_down_kernel, Hp, Wp, Cpi, Cpo)

    out_nhwc = pl.pallas_call(
        kernel,
        out_shape=jax.ShapeDtypeStruct((B, Hp, Wp, Cpo), jnp.float32),
        grid_spec=pltpu.PrefetchScalarGridSpec(
            num_scalar_prefetch=0,
            grid=(B,),
            in_specs=[
                pl.BlockSpec((1, Hp, 2, Wp, 2 * Cpi), lambda b: (b, 0, 0, 0, 0)),
                pl.BlockSpec((9 * Cpi, Cpo), lambda b: (0, 0)),
                pl.BlockSpec((1, Cpo), lambda b: (0, 0)),
                pl.BlockSpec((1, Cpo), lambda b: (0, 0)),
                pl.BlockSpec((9 * Cpo, Cpo), lambda b: (0, 0)),
                pl.BlockSpec((1, Cpo), lambda b: (0, 0)),
                pl.BlockSpec((1, Cpo), lambda b: (0, 0)),
            ],
            out_specs=pl.BlockSpec((1, Hp, Wp, Cpo), lambda b: (b, 0, 0, 0)),
            scratch_shapes=[
                pltpu.VMEM((Hp, Wp, 9 * cmax), compute_dtype),   # shared im2col buffer
            ],
        ),
        compiler_params=pltpu.CompilerParams(
            dimension_semantics=("parallel",),
            vmem_limit_bytes=vmem_limit,
        ),
    )(x, w1, s1, b1, w2, s2, b2)

    out_nhwc = out_nhwc[:, :, :, :Cout]              # drop channel padding
    return jnp.transpose(out_nhwc, (0, 3, 1, 2))     # back to NCHW


def down_reference(x_nchw, params):
    """Pure-JAX reference matching PyTorch Down (eval-mode BN)."""
    x = jnp.transpose(x_nchw, (0, 2, 3, 1)).astype(jnp.float32)  # NHWC
    x = lax.reduce_window(x, -jnp.inf, lax.max, (1, 2, 2, 1), (1, 2, 2, 1), "VALID")

    def conv_bn_relu(h, w_oihw, cb, gamma, beta, mean, var):
        w = jnp.transpose(w_oihw, (2, 3, 1, 0)).astype(jnp.float32)  # HWIO
        y = lax.conv_general_dilated(h, w, (1, 1), "SAME",
                                     dimension_numbers=("NHWC", "HWIO", "NHWC"))
        y = y + cb
        y = (y - mean) / jnp.sqrt(var + BN_EPS) * gamma + beta
        return jnp.maximum(y, 0.0)

    x = conv_bn_relu(x, params["conv1_w"], params["conv1_b"], params["bn1_gamma"],
                     params["bn1_beta"], params["bn1_mean"], params["bn1_var"])
    x = conv_bn_relu(x, params["conv2_w"], params["conv2_b"], params["bn2_gamma"],
                     params["bn2_beta"], params["bn2_mean"], params["bn2_var"])
    return jnp.transpose(x, (0, 3, 1, 2))  # NCHW


def init_params(key, in_channels, out_channels):
    ks = jax.random.split(key, 12)
    p = {
        "conv1_w": 0.1 * jax.random.normal(ks[0], (out_channels, in_channels, 3, 3), jnp.float32),
        "conv1_b": 0.1 * jax.random.normal(ks[1], (out_channels,), jnp.float32),
        "bn1_gamma": 1.0 + 0.1 * jax.random.normal(ks[2], (out_channels,), jnp.float32),
        "bn1_beta": 0.1 * jax.random.normal(ks[3], (out_channels,), jnp.float32),
        "bn1_mean": 0.1 * jax.random.normal(ks[4], (out_channels,), jnp.float32),
        "bn1_var": jax.random.uniform(ks[5], (out_channels,), jnp.float32, 0.5, 1.5),
        "conv2_w": 0.1 * jax.random.normal(ks[6], (out_channels, out_channels, 3, 3), jnp.float32),
        "conv2_b": 0.1 * jax.random.normal(ks[7], (out_channels,), jnp.float32),
        "bn2_gamma": 1.0 + 0.1 * jax.random.normal(ks[8], (out_channels,), jnp.float32),
        "bn2_beta": 0.1 * jax.random.normal(ks[9], (out_channels,), jnp.float32),
        "bn2_mean": 0.1 * jax.random.normal(ks[10], (out_channels,), jnp.float32),
        "bn2_var": jax.random.uniform(ks[11], (out_channels,), jnp.float32, 0.5, 1.5),
    }
    return p


if __name__ == "__main__":
    key = jax.random.PRNGKey(0)
    kx, kp = jax.random.split(key)

    B, Cin, Cout, H, W = 2, 4, 8, 16, 16
    x = jax.random.normal(kx, (B, Cin, H, W), jnp.float32)
    params = init_params(kp, Cin, Cout)

    out = jax.block_until_ready(down_forward(x, params))
    ref = jax.block_until_ready(down_reference(x, params))

    assert out.shape == (B, Cout, H // 2, W // 2), out.shape
    max_err = float(jnp.max(jnp.abs(out - ref)))
    assert jnp.allclose(out, ref, atol=2e-3, rtol=2e-3), max_err

    print("KERNEL_OK")
</pallas_src>

<mosaic_0001>
module attributes {stable_mosaic.version = 11 : i64} {
  func.func @_down_kernel(%arg0: i32, %arg1: memref<1x8x2x8x256xf32, #tpu.memory_space<vmem>>, %arg2: memref<1152x128xf32, #tpu.memory_space<vmem>>, %arg3: memref<1x128xf32, #tpu.memory_space<vmem>>, %arg4: memref<1x128xf32, #tpu.memory_space<vmem>>, %arg5: memref<1152x128xf32, #tpu.memory_space<vmem>>, %arg6: memref<1x128xf32, #tpu.memory_space<vmem>>, %arg7: memref<1x128xf32, #tpu.memory_space<vmem>>, %arg8: memref<1x8x8x128xf32, #tpu.memory_space<vmem>>, %arg9: memref<8x8x1152xf32, #tpu.memory_space<vmem>>) attributes {dimension_semantics = [#tpu.dimension_semantics<parallel>], iteration_bounds = array<i64: 2>, scalar_prefetch = 0 : i64, scratch_operands = 1 : i64, tpu.core_type = #tpu.core_type<tc>, window_params = [{transform_indices = @transform_0, window_bounds = array<i64: 1, 8, 2, 8, 256>}, {pipeline_mode = #tpu.pipeline_mode<synchronous>, transform_indices = @transform_1, window_bounds = array<i64: 1152, 128>}, {pipeline_mode = #tpu.pipeline_mode<synchronous>, transform_indices = @transform_2, window_bounds = array<i64: 1, 128>}, {pipeline_mode = #tpu.pipeline_mode<synchronous>, transform_indices = @transform_3, window_bounds = array<i64: 1, 128>}, {pipeline_mode = #tpu.pipeline_mode<synchronous>, transform_indices = @transform_4, window_bounds = array<i64: 1152, 128>}, {pipeline_mode = #tpu.pipeline_mode<synchronous>, transform_indices = @transform_5, window_bounds = array<i64: 1, 128>}, {pipeline_mode = #tpu.pipeline_mode<synchronous>, transform_indices = @transform_6, window_bounds = array<i64: 1, 128>}, {transform_indices = @transform_7, window_bounds = array<i64: 1, 8, 8, 128>}]} {
    %c0 = arith.constant 0 : index
    %c0_0 = arith.constant 0 : index
    %c0_1 = arith.constant 0 : index
    %c0_2 = arith.constant 0 : index
    %c0_3 = arith.constant 0 : index
    %0 = vector.load %arg1[%c0, %c0_0, %c0_1, %c0_2, %c0_3] : memref<1x8x2x8x256xf32, #tpu.memory_space<vmem>>, vector<1x8x1x8x256xf32>
    %1 = vector.shape_cast %0 : vector<1x8x1x8x256xf32> to vector<8x8x256xf32>
    %c0_4 = arith.constant 0 : index
    %c0_5 = arith.constant 0 : index
    %c1 = arith.constant 1 : index
    %c0_6 = arith.constant 0 : index
    %c0_7 = arith.constant 0 : index
    %2 = vector.load %arg1[%c0_4, %c0_5, %c1, %c0_6, %c0_7] : memref<1x8x2x8x256xf32, #tpu.memory_space<vmem>>, vector<1x8x1x8x256xf32>
    %3 = vector.shape_cast %2 : vector<1x8x1x8x256xf32> to vector<8x8x256xf32>
    %4 = arith.maximumf %1, %3 : vector<8x8x256xf32>
    %5 = vector.extract_strided_slice %4 {offsets = [0, 0, 0], sizes = [8, 8, 128], strides = [1, 1, 1]} : vector<8x8x256xf32> to vector<8x8x128xf32>
    %6 = vector.extract_strided_slice %4 {offsets = [0, 0, 128], sizes = [8, 8, 128], strides = [1, 1, 1]} : vector<8x8x256xf32> to vector<8x8x128xf32>
    %7 = arith.maximumf %5, %6 : vector<8x8x128xf32>
    %8 = vector.extract_strided_slice %7 {offsets = [0, 0, 0], sizes = [7, 7, 128], strides = [1, 1, 1]} : vector<8x8x128xf32> to vector<7x7x128xf32>
    %c1_8 = arith.constant 1 : index
    %c1_9 = arith.constant 1 : index
    %c0_10 = arith.constant 0 : index
    %9 = vector.load %arg9[%c1_8, %c1_9, %c0_10] : memref<8x8x1152xf32, #tpu.memory_space<vmem>>, vector<7x7x128xf32>
    tpu.vector_store %arg9[%c1_8, %c1_9, %c0_10], %8 {strides = array<i32>} : memref<8x8x1152xf32, #tpu.memory_space<vmem>>, vector<7x7x128xf32>,
    %cst = arith.constant 0.000000e+00 : f32
    %10 = vector.broadcast %cst : f32 to vector<1x8x128xf32>
    %c0_11 = arith.constant 0 : index
    %c0_12 = arith.constant 0 : index
    %c0_13 = arith.constant 0 : index
    %11 = vector.load %arg9[%c0_11, %c0_12, %c0_13] : memref<8x8x1152xf32, #tpu.memory_space<vmem>>, vector<1x8x128xf32>
    tpu.vector_store %arg9[%c0_11, %c0_12, %c0_13], %10 {strides = array<i32>} : memref<8x8x1152xf32, #tpu.memory_space<vmem>>, vector<1x8x128xf32>,
    %cst_14 = arith.constant 0.000000e+00 : f32
    %12 = vector.broadcast %cst_14 : f32 to vector<8x1x128xf32>
    %c0_15 = arith.constant 0 : index
    %c0_16 = arith.constant 0 : index
    %c0_17 = arith.constant 0 : index
    %13 = vector.load %arg9[%c0_15, %c0_16, %c0_17] : memref<8x8x1152xf32, #tpu.memory_space<vmem>>, vector<8x1x128xf32>
    tpu.vector_store %arg9[%c0_15, %c0_16, %c0_17], %12 {strides = array<i32>} : memref<8x8x1152xf32, #tpu.memory_space<vmem>>, vector<8x1x128xf32>,
    %14 = vector.extract_strided_slice %7 {offsets = [0, 0, 0], sizes = [7, 8, 128], strides = [1, 1, 1]} : vector<8x8x128xf32> to vector<7x8x128xf32>
    %c1_18 = arith.constant 1 : index
    %c0_19 = arith.constant 0 : index
    %c128 = arith.constant 128 : index
    %15 = vector.load %arg9[%c1_18, %c0_19, %c128] : memref<8x8x1152xf32, #tpu.memory_space<vmem>>, vector<7x8x128xf32>
    tpu.vector_store %arg9[%c1_18, %c0_19, %c128], %14 {strides = array<i32>} : memref<8x8x1152xf32, #tpu.memory_space<vmem>>, vector<7x8x128xf32>,
    %cst_20 = arith.constant 0.000000e+00 : f32
    %16 = vector.broadcast %cst_20 : f32 to vector<1x8x128xf32>
    %c0_21 = arith.constant 0 : index
    %c0_22 = arith.constant 0 : index
    %c128_23 = arith.constant 128 : index
    %17 = vector.load %arg9[%c0_21, %c0_22, %c128_23] : memref<8x8x1152xf32, #tpu.memory_space<vmem>>, vector<1x8x128xf32>
    tpu.vector_store %arg9[%c0_21, %c0_22, %c128_23], %16 {strides = array<i32>} : memref<8x8x1152xf32, #tpu.memory_space<vmem>>, vector<1x8x128xf32>,
    %18 = vector.extract_strided_slice %7 {offsets = [0, 1, 0], sizes = [7, 7, 128], strides = [1, 1, 1]} : vector<8x8x128xf32> to vector<7x7x128xf32>
    %c1_24 = arith.constant 1 : index
    %c0_25 = arith.constant 0 : index
    %c256 = arith.constant 256 : index
    %19 = vector.load %arg9[%c1_24, %c0_25, %c256] : memref<8x8x1152xf32, #tpu.memory_space<vmem>>, vector<7x7x128xf32>
    tpu.vector_store %arg9[%c1_24, %c0_25, %c256], %18 {strides = array<i32>} : memref<8x8x1152xf32, #tpu.memory_space<vmem>>, vector<7x7x128xf32>,
    %cst_26 = arith.constant 0.000000e+00 : f32
    %20 = vector.broadcast %cst_26 : f32 to vector<1x8x128xf32>
    %c0_27 = arith.constant 0 : index
    %c0_28 = arith.constant 0 : index
    %c256_29 = arith.constant 256 : index
    %21 = vector.load %arg9[%c0_27, %c0_28, %c256_29] : memref<8x8x1152xf32, #tpu.memory_space<vmem>>, vector<1x8x128xf32>
    tpu.vector_store %arg9[%c0_27, %c0_28, %c256_29], %20 {strides = array<i32>} : memref<8x8x1152xf32, #tpu.memory_space<vmem>>, vector<1x8x128xf32>,
    %cst_30 = arith.constant 0.000000e+00 : f32
    %22 = vector.broadcast %cst_30 : f32 to vector<8x1x128xf32>
    %c0_31 = arith.constant 0 : index
    %c7 = arith.constant 7 : index
    %c256_32 = arith.constant 256 : index
    %23 = vector.load %arg9[%c0_31, %c7, %c256_32] : memref<8x8x1152xf32, #tpu.memory_space<vmem>>, vector<8x1x128xf32>
    tpu.vector_store %arg9[%c0_31, %c7, %c256_32], %22 {strides = array<i32>} : memref<8x8x1152xf32, #tpu.memory_space<vmem>>, vector<8x1x128xf32>,
    %24 = vector.extract_strided_slice %7 {offsets = [0, 0, 0], sizes = [8, 7, 128], strides = [1, 1, 1]} : vector<8x8x128xf32> to vector<8x7x128xf32>
    %c0_33 = arith.constant 0 : index
    %c1_34 = arith.constant 1 : index
    %c384 = arith.constant 384 : index
    %25 = vector.load %arg9[%c0_33, %c1_34, %c384] : memref<8x8x1152xf32, #tpu.memory_space<vmem>>, vector<8x7x128xf32>
    tpu.vector_store %arg9[%c0_33, %c1_34, %c384], %24 {strides = array<i32>} : memref<8x8x1152xf32, #tpu.memory_space<vmem>>, vector<8x7x128xf32>,
    %cst_35 = arith.constant 0.000000e+00 : f32
    %26 = vector.broadcast %cst_35 : f32 to vector<8x1x128xf32>
    %c0_36 = arith.constant 0 : index
    %c0_37 = arith.constant 0 : index
    %c384_38 = arith.constant 384 : index
    %27 = vector.load %arg9[%c0_36, %c0_37, %c384_38] : memref<8x8x1152xf32, #tpu.memory_space<vmem>>, vector<8x1x128xf32>
    tpu.vector_store %arg9[%c0_36, %c0_37, %c384_38], %26 {strides = array<i32>} : memref<8x8x1152xf32, #tpu.memory_space<vmem>>, vector<8x1x128xf32>,
    %c0_39 = arith.constant 0 : index
    %c0_40 = arith.constant 0 : index
    %c512 = arith.constant 512 : index
    %28 = vector.load %arg9[%c0_39, %c0_40, %c512] : memref<8x8x1152xf32, #tpu.memory_space<vmem>>, vector<8x8x128xf32>
    tpu.vector_store %arg9[%c0_39, %c0_40, %c512], %7 {strides = array<i32>} : memref<8x8x1152xf32, #tpu.memory_space<vmem>>, vector<8x8x128xf32>,
    %29 = vector.extract_strided_slice %7 {offsets = [0, 1, 0], sizes = [8, 7, 128], strides = [1, 1, 1]} : vector<8x8x128xf32> to vector<8x7x128xf32>
    %c0_41 = arith.constant 0 : index
    %c0_42 = arith.constant 0 : index
    %c640 = arith.constant 640 : index
    %30 = vector.load %arg9[%c0_41, %c0_42, %c640] : memref<8x8x1152xf32, #tpu.memory_space<vmem>>, vector<8x7x128xf32>
    tpu.vector_store %arg9[%c0_41, %c0_42, %c640], %29 {strides = array<i32>} : memref<8x8x1152xf32, #tpu.memory_space<vmem>>, vector<8x7x128xf32>,
    %cst_43 = arith.constant 0.000000e+00 : f32
    %31 = vector.broadcast %cst_43 : f32 to vector<8x1x128xf32>
    %c0_44 = arith.constant 0 : index
    %c7_45 = arith.constant 7 : index
    %c640_46 = arith.constant 640 : index
    %32 = vector.load %arg9[%c0_44, %c7_45, %c640_46] : memref<8x8x1152xf32, #tpu.memory_space<vmem>>, vector<8x1x128xf32>
    tpu.vector_store %arg9[%c0_44, %c7_45, %c640_46], %31 {strides = array<i32>} : memref<8x8x1152xf32, #tpu.memory_space<vmem>>, vector<8x1x128xf32>,
    %33 = vector.extract_strided_slice %7 {offsets = [1, 0, 0], sizes = [7, 7, 128], strides = [1, 1, 1]} : vector<8x8x128xf32> to vector<7x7x128xf32>
    %c0_47 = arith.constant 0 : index
    %c1_48 = arith.constant 1 : index
    %c768 = arith.constant 768 : index
    %34 = vector.load %arg9[%c0_47, %c1_48, %c768] : memref<8x8x1152xf32, #tpu.memory_space<vmem>>, vector<7x7x128xf32>
    tpu.vector_store %arg9[%c0_47, %c1_48, %c768], %33 {strides = array<i32>} : memref<8x8x1152xf32, #tpu.memory_space<vmem>>, vector<7x7x128xf32>,
    %cst_49 = arith.constant 0.000000e+00 : f32
    %35 = vector.broadcast %cst_49 : f32 to vector<1x8x128xf32>
    %c7_50 = arith.constant 7 : index
    %c0_51 = arith.constant 0 : index
    %c768_52 = arith.constant 768 : index
    %36 = vector.load %arg9[%c7_50, %c0_51, %c768_52] : memref<8x8x1152xf32, #tpu.memory_space<vmem>>, vector<1x8x128xf32>
    tpu.vector_store %arg9[%c7_50, %c0_51, %c768_52], %35 {strides = array<i32>} : memref<8x8x1152xf32, #tpu.memory_space<vmem>>, vector<1x8x128xf32>,
    %cst_53 = arith.constant 0.000000e+00 : f32
    %37 = vector.broadcast %cst_53 : f32 to vector<8x1x128xf32>
    %c0_54 = arith.constant 0 : index
    %c0_55 = arith.constant 0 : index
    %c768_56 = arith.constant 768 : index
    %38 = vector.load %arg9[%c0_54, %c0_55, %c768_56] : memref<8x8x1152xf32, #tpu.memory_space<vmem>>, vector<8x1x128xf32>
    tpu.vector_store %arg9[%c0_54, %c0_55, %c768_56], %37 {strides = array<i32>} : memref<8x8x1152xf32, #tpu.memory_space<vmem>>, vector<8x1x128xf32>,
    %39 = vector.extract_strided_slice %7 {offsets = [1, 0, 0], sizes = [7, 8, 128], strides = [1, 1, 1]} : vector<8x8x128xf32> to vector<7x8x128xf32>
    %c0_57 = arith.constant 0 : index
    %c0_58 = arith.constant 0 : index
    %c896 = arith.constant 896 : index
    %40 = vector.load %arg9[%c0_57, %c0_58, %c896] : memref<8x8x1152xf32, #tpu.memory_space<vmem>>, vector<7x8x128xf32>
    tpu.vector_store %arg9[%c0_57, %c0_58, %c896], %39 {strides = array<i32>} : memref<8x8x1152xf32, #tpu.memory_space<vmem>>, vector<7x8x128xf32>,
    %cst_59 = arith.constant 0.000000e+00 : f32
    %41 = vector.broadcast %cst_59 : f32 to vector<1x8x128xf32>
    %c7_60 = arith.constant 7 : index
    %c0_61 = arith.constant 0 : index
    %c896_62 = arith.constant 896 : index
    %42 = vector.load %arg9[%c7_60, %c0_61, %c896_62] : memref<8x8x1152xf32, #tpu.memory_space<vmem>>, vector<1x8x128xf32>
    tpu.vector_store %arg9[%c7_60, %c0_61, %c896_62], %41 {strides = array<i32>} : memref<8x8x1152xf32, #tpu.memory_space<vmem>>, vector<1x8x128xf32>,
    %43 = vector.extract_strided_slice %7 {offsets = [1, 1, 0], sizes = [7, 7, 128], strides = [1, 1, 1]} : vector<8x8x128xf32> to vector<7x7x128xf32>
    %c0_63 = arith.constant 0 : index
    %c0_64 = arith.constant 0 : index
    %c1024 = arith.constant 1024 : index
    %44 = vector.load %arg9[%c0_63, %c0_64, %c1024] : memref<8x8x1152xf32, #tpu.memory_space<vmem>>, vector<7x7x128xf32>
    tpu.vector_store %arg9[%c0_63, %c0_64, %c1024], %43 {strides = array<i32>} : memref<8x8x1152xf32, #tpu.memory_space<vmem>>, vector<7x7x128xf32>,
    %cst_65 = arith.constant 0.000000e+00 : f32
    %45 = vector.broadcast %cst_65 : f32 to vector<1x8x128xf32>
    %c7_66 = arith.constant 7 : index
    %c0_67 = arith.constant 0 : index
    %c1024_68 = arith.constant 1024 : index
    %46 = vector.load %arg9[%c7_66, %c0_67, %c1024_68] : memref<8x8x1152xf32, #tpu.memory_space<vmem>>, vector<1x8x128xf32>
    tpu.vector_store %arg9[%c7_66, %c0_67, %c1024_68], %45 {strides = array<i32>} : memref<8x8x1152xf32, #tpu.memory_space<vmem>>, vector<1x8x128xf32>,
    %cst_69 = arith.constant 0.000000e+00 : f32
    %47 = vector.broadcast %cst_69 : f32 to vector<8x1x128xf32>
    %c0_70 = arith.constant 0 : index
    %c7_71 = arith.constant 7 : index
    %c1024_72 = arith.constant 1024 : index
    %48 = vector.load %arg9[%c0_70, %c7_71, %c1024_72] : memref<8x8x1152xf32, #tpu.memory_space<vmem>>, vector<8x1x128xf32>
    tpu.vector_store %arg9[%c0_70, %c7_71, %c1024_72], %47 {strides = array<i32>} : memref<8x8x1152xf32, #tpu.memory_space<vmem>>, vector<8x1x128xf32>,
    %c0_73 = arith.constant 0 : index
    %c0_74 = arith.constant 0 : index
    %c0_75 = arith.constant 0 : index
    %49 = vector.load %arg9[%c0_73, %c0_74, %c0_75] : memref<8x8x1152xf32, #tpu.memory_space<vmem>>, vector<8x8x1152xf32>
    %50 = vector.shape_cast %49 : vector<8x8x1152xf32> to vector<64x1152xf32>
    %c0_76 = arith.constant 0 : index
    %c0_77 = arith.constant 0 : index
    %51 = vector.load %arg2[%c0_76, %c0_77] : memref<1152x128xf32, #tpu.memory_space<vmem>>, vector<1152x128xf32>
    %cst_78 = arith.constant dense<0.000000e+00> : vector<64x128xf32>
    %52 = tpu.matmul %50, %51, %cst_78 {dimension_numbers = #tpu.dot_dimension_numbers<[1], [0], [0], [1], [0, 0, 1, 1], [], []>} : vector<64x1152xf32>, vector<1152x128xf32>, vector<64x128xf32> -> vector<64x128xf32>
    %c0_79 = arith.constant 0 : index
    %c0_80 = arith.constant 0 : index
    %53 = vector.load %arg3[%c0_79, %c0_80] : memref<1x128xf32, #tpu.memory_space<vmem>>, vector<1x128xf32>
    %54 = vector.broadcast %53 : vector<1x128xf32> to vector<64x128xf32>
    %55 = arith.mulf %52, %54 : vector<64x128xf32>
    %c0_81 = arith.constant 0 : index
    %c0_82 = arith.constant 0 : index
    %56 = vector.load %arg4[%c0_81, %c0_82] : memref<1x128xf32, #tpu.memory_space<vmem>>, vector<1x128xf32>
    %57 = vector.broadcast %56 : vector<1x128xf32> to vector<64x128xf32>
    %58 = arith.addf %55, %57 : vector<64x128xf32>
    %cst_83 = arith.constant 0.000000e+00 : f32
    %59 = vector.broadcast %cst_83 : f32 to vector<64x128xf32>
    %60 = arith.maximumf %58, %59 : vector<64x128xf32>
    %61 = vector.shape_cast %60 : vector<64x128xf32> to vector<8x8x128xf32>
    %62 = vector.extract_strided_slice %61 {offsets = [0, 0, 0], sizes = [7, 7, 128], strides = [1, 1, 1]} : vector<8x8x128xf32> to vector<7x7x128xf32>
    %c1_84 = arith.constant 1 : index
    %c1_85 = arith.constant 1 : index
    %c0_86 = arith.constant 0 : index
    %63 = vector.load %arg9[%c1_84, %c1_85, %c0_86] : memref<8x8x1152xf32, #tpu.memory_space<vmem>>, vector<7x7x128xf32>
    tpu.vector_store %arg9[%c1_84, %c1_85, %c0_86], %62 {strides = array<i32>} : memref<8x8x1152xf32, #tpu.memory_space<vmem>>, vector<7x7x128xf32>,
    %cst_87 = arith.constant 0.000000e+00 : f32
    %64 = vector.broadcast %cst_87 : f32 to vector<1x8x128xf32>
    %c0_88 = arith.constant 0 : index
    %c0_89 = arith.constant 0 : index
    %c0_90 = arith.constant 0 : index
    %65 = vector.load %arg9[%c0_88, %c0_89, %c0_90] : memref<8x8x1152xf32, #tpu.memory_space<vmem>>, vector<1x8x128xf32>
    tpu.vector_store %arg9[%c0_88, %c0_89, %c0_90], %64 {strides = array<i32>} : memref<8x8x1152xf32, #tpu.memory_space<vmem>>, vector<1x8x128xf32>,
    %cst_91 = arith.constant 0.000000e+00 : f32
    %66 = vector.broadcast %cst_91 : f32 to vector<8x1x128xf32>
    %c0_92 = arith.constant 0 : index
    %c0_93 = arith.constant 0 : index
    %c0_94 = arith.constant 0 : index
    %67 = vector.load %arg9[%c0_92, %c0_93, %c0_94] : memref<8x8x1152xf32, #tpu.memory_space<vmem>>, vector<8x1x128xf32>
    tpu.vector_store %arg9[%c0_92, %c0_93, %c0_94], %66 {strides = array<i32>} : memref<8x8x1152xf32, #tpu.memory_space<vmem>>, vector<8x1x128xf32>,
    %68 = vector.extract_strided_slice %61 {offsets = [0, 0, 0], sizes = [7, 8, 128], strides = [1, 1, 1]} : vector<8x8x128xf32> to vector<7x8x128xf32>
    %c1_95 = arith.constant 1 : index
    %c0_96 = arith.constant 0 : index
    %c128_97 = arith.constant 128 : index
    %69 = vector.load %arg9[%c1_95, %c0_96, %c128_97] : memref<8x8x1152xf32, #tpu.memory_space<vmem>>, vector<7x8x128xf32>
    tpu.vector_store %arg9[%c1_95, %c0_96, %c128_97], %68 {strides = array<i32>} : memref<8x8x1152xf32, #tpu.memory_space<vmem>>, vector<7x8x128xf32>,
    %cst_98 = arith.constant 0.000000e+00 : f32
    %70 = vector.broadcast %cst_98 : f32 to vector<1x8x128xf32>
    %c0_99 = arith.constant 0 : index
    %c0_100 = arith.constant 0 : index
    %c128_101 = arith.constant 128 : index
    %71 = vector.load %arg9[%c0_99, %c0_100, %c128_101] : memref<8x8x1152xf32, #tpu.memory_space<vmem>>, vector<1x8x128xf32>
    tpu.vector_store %arg9[%c0_99, %c0_100, %c128_101], %70 {strides = array<i32>} : memref<8x8x1152xf32, #tpu.memory_space<vmem>>, vector<1x8x128xf32>,
    %72 = vector.extract_strided_slice %61 {offsets = [0, 1, 0], sizes = [7, 7, 128], strides = [1, 1, 1]} : vector<8x8x128xf32> to vector<7x7x128xf32>
    %c1_102 = arith.constant 1 : index
    %c0_103 = arith.constant 0 : index
    %c256_104 = arith.constant 256 : index
    %73 = vector.load %arg9[%c1_102, %c0_103, %c256_104] : memref<8x8x1152xf32, #tpu.memory_space<vmem>>, vector<7x7x128xf32>
    tpu.vector_store %arg9[%c1_102, %c0_103, %c256_104], %72 {strides = array<i32>} : memref<8x8x1152xf32, #tpu.memory_space<vmem>>, vector<7x7x128xf32>,
    %cst_105 = arith.constant 0.000000e+00 : f32
    %74 = vector.broadcast %cst_105 : f32 to vector<1x8x128xf32>
    %c0_106 = arith.constant 0 : index
    %c0_107 = arith.constant 0 : index
    %c256_108 = arith.constant 256 : index
    %75 = vector.load %arg9[%c0_106, %c0_107, %c256_108] : memref<8x8x1152xf32, #tpu.memory_space<vmem>>, vector<1x8x128xf32>
    tpu.vector_store %arg9[%c0_106, %c0_107, %c256_108], %74 {strides = array<i32>} : memref<8x8x1152xf32, #tpu.memory_space<vmem>>, vector<1x8x128xf32>,
    %cst_109 = arith.constant 0.000000e+00 : f32
    %76 = vector.broadcast %cst_109 : f32 to vector<8x1x128xf32>
    %c0_110 = arith.constant 0 : index
    %c7_111 = arith.constant 7 : index
    %c256_112 = arith.constant 256 : index
    %77 = vector.load %arg9[%c0_110, %c7_111, %c256_112] : memref<8x8x1152xf32, #tpu.memory_space<vmem>>, vector<8x1x128xf32>
    tpu.vector_store %arg9[%c0_110, %c7_111, %c256_112], %76 {strides = array<i32>} : memref<8x8x1152xf32, #tpu.memory_space<vmem>>, vector<8x1x128xf32>,
    %78 = vector.extract_strided_slice %61 {offsets = [0, 0, 0], sizes = [8, 7, 128], strides = [1, 1, 1]} : vector<8x8x128xf32> to vector<8x7x128xf32>
    %c0_113 = arith.constant 0 : index
    %c1_114 = arith.constant 1 : index
    %c384_115 = arith.constant 384 : index
    %79 = vector.load %arg9[%c0_113, %c1_114, %c384_115] : memref<8x8x1152xf32, #tpu.memory_space<vmem>>, vector<8x7x128xf32>
    tpu.vector_store %arg9[%c0_113, %c1_114, %c384_115], %78 {strides = array<i32>} : memref<8x8x1152xf32, #tpu.memory_space<vmem>>, vector<8x7x128xf32>,
    %cst_116 = arith.constant 0.000000e+00 : f32
    %80 = vector.broadcast %cst_116 : f32 to vector<8x1x128xf32>
    %c0_117 = arith.constant 0 : index
    %c0_118 = arith.constant 0 : index
    %c384_119 = arith.constant 384 : index
    %81 = vector.load %arg9[%c0_117, %c0_118, %c384_119] : memref<8x8x1152xf32, #tpu.memory_space<vmem>>, vector<8x1x128xf32>
    tpu.vector_store %arg9[%c0_117, %c0_118, %c384_119], %80 {strides = array<i32>} : memref<8x8x1152xf32, #tpu.memory_space<vmem>>, vector<8x1x128xf32>,
    %c0_120 = arith.constant 0 : index
    %c0_121 = arith.constant 0 : index
    %c512_122 = arith.constant 512 : index
    %82 = vector.load %arg9[%c0_120, %c0_121, %c512_122] : memref<8x8x1152xf32, #tpu.memory_space<vmem>>, vector<8x8x128xf32>
    tpu.vector_store %arg9[%c0_120, %c0_121, %c512_122], %61 {strides = array<i32>} : memref<8x8x1152xf32, #tpu.memory_space<vmem>>, vector<8x8x128xf32>,
    %83 = vector.extract_strided_slice %61 {offsets = [0, 1, 0], sizes = [8, 7, 128], strides = [1, 1, 1]} : vector<8x8x128xf32> to vector<8x7x128xf32>
    %c0_123 = arith.constant 0 : index
    %c0_124 = arith.constant 0 : index
    %c640_125 = arith.constant 640 : index
    %84 = vector.load %arg9[%c0_123, %c0_124, %c640_125] : memref<8x8x1152xf32, #tpu.memory_space<vmem>>, vector<8x7x128xf32>
    tpu.vector_store %arg9[%c0_123, %c0_124, %c640_125], %83 {strides = array<i32>} : memref<8x8x1152xf32, #tpu.memory_space<vmem>>, vector<8x7x128xf32>,
    %cst_126 = arith.constant 0.000000e+00 : f32
    %85 = vector.broadcast %cst_126 : f32 to vector<8x1x128xf32>
    %c0_127 = arith.constant 0 : index
    %c7_128 = arith.constant 7 : index
    %c640_129 = arith.constant 640 : index
    %86 = vector.load %arg9[%c0_127, %c7_128, %c640_129] : memref<8x8x1152xf32, #tpu.memory_space<vmem>>, vector<8x1x128xf32>
    tpu.vector_store %arg9[%c0_127, %c7_128, %c640_129], %85 {strides = array<i32>} : memref<8x8x1152xf32, #tpu.memory_space<vmem>>, vector<8x1x128xf32>,
    %87 = vector.extract_strided_slice %61 {offsets = [1, 0, 0], sizes = [7, 7, 128], strides = [1, 1, 1]} : vector<8x8x128xf32> to vector<7x7x128xf32>
    %c0_130 = arith.constant 0 : index
    %c1_131 = arith.constant 1 : index
    %c768_132 = arith.constant 768 : index
    %88 = vector.load %arg9[%c0_130, %c1_131, %c768_132] : memref<8x8x1152xf32, #tpu.memory_space<vmem>>, vector<7x7x128xf32>
    tpu.vector_store %arg9[%c0_130, %c1_131, %c768_132], %87 {strides = array<i32>} : memref<8x8x1152xf32, #tpu.memory_space<vmem>>, vector<7x7x128xf32>,
    %cst_133 = arith.constant 0.000000e+00 : f32
    %89 = vector.broadcast %cst_133 : f32 to vector<1x8x128xf32>
    %c7_134 = arith.constant 7 : index
    %c0_135 = arith.constant 0 : index
    %c768_136 = arith.constant 768 : index
    %90 = vector.load %arg9[%c7_134, %c0_135, %c768_136] : memref<8x8x1152xf32, #tpu.memory_space<vmem>>, vector<1x8x128xf32>
    tpu.vector_store %arg9[%c7_134, %c0_135, %c768_136], %89 {strides = array<i32>} : memref<8x8x1152xf32, #tpu.memory_space<vmem>>, vector<1x8x128xf32>,
    %cst_137 = arith.constant 0.000000e+00 : f32
    %91 = vector.broadcast %cst_137 : f32 to vector<8x1x128xf32>
    %c0_138 = arith.constant 0 : index
    %c0_139 = arith.constant 0 : index
    %c768_140 = arith.constant 768 : index
    %92 = vector.load %arg9[%c0_138, %c0_139, %c768_140] : memref<8x8x1152xf32, #tpu.memory_space<vmem>>, vector<8x1x128xf32>
    tpu.vector_store %arg9[%c0_138, %c0_139, %c768_140], %91 {strides = array<i32>} : memref<8x8x1152xf32, #tpu.memory_space<vmem>>, vector<8x1x128xf32>,
    %93 = vector.extract_strided_slice %61 {offsets = [1, 0, 0], sizes = [7, 8, 128], strides = [1, 1, 1]} : vector<8x8x128xf32> to vector<7x8x128xf32>
    %c0_141 = arith.constant 0 : index
    %c0_142 = arith.constant 0 : index
    %c896_143 = arith.constant 896 : index
    %94 = vector.load %arg9[%c0_141, %c0_142, %c896_143] : memref<8x8x1152xf32, #tpu.memory_space<vmem>>, vector<7x8x128xf32>
    tpu.vector_store %arg9[%c0_141, %c0_142, %c896_143], %93 {strides = array<i32>} : memref<8x8x1152xf32, #tpu.memory_space<vmem>>, vector<7x8x128xf32>,
    %cst_144 = arith.constant 0.000000e+00 : f32
    %95 = vector.broadcast %cst_144 : f32 to vector<1x8x128xf32>
    %c7_145 = arith.constant 7 : index
    %c0_146 = arith.constant 0 : index
    %c896_147 = arith.constant 896 : index
    %96 = vector.load %arg9[%c7_145, %c0_146, %c896_147] : memref<8x8x1152xf32, #tpu.memory_space<vmem>>, vector<1x8x128xf32>
    tpu.vector_store %arg9[%c7_145, %c0_146, %c896_147], %95 {strides = array<i32>} : memref<8x8x1152xf32, #tpu.memory_space<vmem>>, vector<1x8x128xf32>,
    %97 = vector.extract_strided_slice %61 {offsets = [1, 1, 0], sizes = [7, 7, 128], strides = [1, 1, 1]} : vector<8x8x128xf32> to vector<7x7x128xf32>
    %c0_148 = arith.constant 0 : index
    %c0_149 = arith.constant 0 : index
    %c1024_150 = arith.constant 1024 : index
    %98 = vector.load %arg9[%c0_148, %c0_149, %c1024_150] : memref<8x8x1152xf32, #tpu.memory_space<vmem>>, vector<7x7x128xf32>
    tpu.vector_store %arg9[%c0_148, %c0_149, %c1024_150], %97 {strides = array<i32>} : memref<8x8x1152xf32, #tpu.memory_space<vmem>>, vector<7x7x128xf32>,
    %cst_151 = arith.constant 0.000000e+00 : f32
    %99 = vector.broadcast %cst_151 : f32 to vector<1x8x128xf32>
    %c7_152 = arith.constant 7 : index
    %c0_153 = arith.constant 0 : index
    %c1024_154 = arith.constant 1024 : index
    %100 = vector.load %arg9[%c7_152, %c0_153, %c1024_154] : memref<8x8x1152xf32, #tpu.memory_space<vmem>>, vector<1x8x128xf32>
    tpu.vector_store %arg9[%c7_152, %c0_153, %c1024_154], %99 {strides = array<i32>} : memref<8x8x1152xf32, #tpu.memory_space<vmem>>, vector<1x8x128xf32>,
    %cst_155 = arith.constant 0.000000e+00 : f32
    %101 = vector.broadcast %cst_155 : f32 to vector<8x1x128xf32>
    %c0_156 = arith.constant 0 : index
    %c7_157 = arith.constant 7 : index
    %c1024_158 = arith.constant 1024 : index
    %102 = vector.load %arg9[%c0_156, %c7_157, %c1024_158] : memref<8x8x1152xf32, #tpu.memory_space<vmem>>, vector<8x1x128xf32>
    tpu.vector_store %arg9[%c0_156, %c7_157, %c1024_158], %101 {strides = array<i32>} : memref<8x8x1152xf32, #tpu.memory_space<vmem>>, vector<8x1x128xf32>,
    %c0_159 = arith.constant 0 : index
    %c0_160 = arith.constant 0 : index
    %c0_161 = arith.constant 0 : index
    %103 = vector.load %arg9[%c0_159, %c0_160, %c0_161] : memref<8x8x1152xf32, #tpu.memory_space<vmem>>, vector<8x8x1152xf32>
    %104 = vector.shape_cast %103 : vector<8x8x1152xf32> to vector<64x1152xf32>
    %c0_162 = arith.constant 0 : index
    %c0_163 = arith.constant 0 : index
    %105 = vector.load %arg5[%c0_162, %c0_163] : memref<1152x128xf32, #tpu.memory_space<vmem>>, vector<1152x128xf32>
    %cst_164 = arith.constant dense<0.000000e+00> : vector<64x128xf32>
    %106 = tpu.matmul %104, %105, %cst_164 {dimension_numbers = #tpu.dot_dimension_numbers<[1], [0], [0], [1], [0, 0, 1, 1], [], []>} : vector<64x1152xf32>, vector<1152x128xf32>, vector<64x128xf32> -> vector<64x128xf32>
    %c0_165 = arith.constant 0 : index
    %c0_166 = arith.constant 0 : index
    %107 = vector.load %arg6[%c0_165, %c0_166] : memref<1x128xf32, #tpu.memory_space<vmem>>, vector<1x128xf32>
    %108 = vector.broadcast %107 : vector<1x128xf32> to vector<64x128xf32>
    %109 = arith.mulf %106, %108 : vector<64x128xf32>
    %c0_167 = arith.constant 0 : index
    %c0_168 = arith.constant 0 : index
    %110 = vector.load %arg7[%c0_167, %c0_168] : memref<1x128xf32, #tpu.memory_space<vmem>>, vector<1x128xf32>
    %111 = vector.broadcast %110 : vector<1x128xf32> to vector<64x128xf32>
    %112 = arith.addf %109, %111 : vector<64x128xf32>
    %cst_169 = arith.constant 0.000000e+00 : f32
    %113 = vector.broadcast %cst_169 : f32 to vector<64x128xf32>
    %114 = arith.maximumf %112, %113 : vector<64x128xf32>
    %115 = vector.shape_cast %114 : vector<64x128xf32> to vector<8x8x128xf32>
    %c0_170 = arith.constant 0 : index
    %c0_171 = arith.constant 0 : index
    %c0_172 = arith.constant 0 : index
    %c0_173 = arith.constant 0 : index
    %116 = vector.load %arg8[%c0_170, %c0_171, %c0_172, %c0_173] : memref<1x8x8x128xf32, #tpu.memory_space<vmem>>, vector<1x8x8x128xf32>
    %117 = vector.shape_cast %116 : vector<1x8x8x128xf32> to vector<8x8x128xf32>
    %118 = vector.shape_cast %115 : vector<8x8x128xf32> to vector<1x8x8x128xf32>
    tpu.vector_store %arg8[%c0_170, %c0_171, %c0_172, %c0_173], %118 {strides = array<i32>} : memref<1x8x8x128xf32, #tpu.memory_space<vmem>>, vector<1x8x8x128xf32>,
    return
  }
  func.func @transform_0(%arg0: i32) -> (i32, i32, i32, i32, i32) {
    %c0_i32 = arith.constant 0 : i32
    %c0_i32_0 = arith.constant 0 : i32
    %c0_i32_1 = arith.constant 0 : i32
    %c0_i32_2 = arith.constant 0 : i32
    %c0_i32_3 = arith.constant 0 : i32
    return %arg0, %c0_i32, %c0_i32_0, %c0_i32_1, %c0_i32_2 : i32, i32, i32, i32, i32
  }
  func.func @transform_1(%arg0: i32) -> (i32, i32) {
    %c0_i32 = arith.constant 0 : i32
    %c0_i32_0 = arith.constant 0 : i32
    %c0_i32_1 = arith.constant 0 : i32
    return %c0_i32, %c0_i32_0 : i32, i32
  }
  func.func @transform_2(%arg0: i32) -> (i32, i32) {
    %c0_i32 = arith.constant 0 : i32
    %c0_i32_0 = arith.constant 0 : i32
    %c0_i32_1 = arith.constant 0 : i32
    return %c0_i32, %c0_i32_0 : i32, i32
  }
  func.func @transform_3(%arg0: i32) -> (i32, i32) {
    %c0_i32 = arith.constant 0 : i32
    %c0_i32_0 = arith.constant 0 : i32
    %c0_i32_1 = arith.constant 0 : i32
    return %c0_i32, %c0_i32_0 : i32, i32
  }
  func.func @transform_4(%arg0: i32) -> (i32, i32) {
    %c0_i32 = arith.constant 0 : i32
    %c0_i32_0 = arith.constant 0 : i32
    %c0_i32_1 = arith.constant 0 : i32
    return %c0_i32, %c0_i32_0 : i32, i32
  }
  func.func @transform_5(%arg0: i32) -> (i32, i32) {
    %c0_i32 = arith.constant 0 : i32
    %c0_i32_0 = arith.constant 0 : i32
    %c0_i32_1 = arith.constant 0 : i32
    return %c0_i32, %c0_i32_0 : i32, i32
  }
  func.func @transform_6(%arg0: i32) -> (i32, i32) {
    %c0_i32 = arith.constant 0 : i32
    %c0_i32_0 = arith.constant 0 : i32
    %c0_i32_1 = arith.constant 0 : i32
    return %c0_i32, %c0_i32_0 : i32, i32
  }
  func.func @transform_7(%arg0: i32) -> (i32, i32, i32, i32) {
    %c0_i32 = arith.constant 0 : i32
    %c0_i32_0 = arith.constant 0 : i32
    %c0_i32_1 = arith.constant 0 : i32
    %c0_i32_2 = arith.constant 0 : i32
    return %arg0, %c0_i32, %c0_i32_0, %c0_i32_1 : i32, i32, i32, i32
  }
}

</mosaic_0001>

<bundles_post_ra>
// kernel: tpu_custom_call.1
= control target key start
LH: loop header
LB: loop body
LE: loop exit
PB: predicated region body
PF: predicated region fallthrough
CT: control target
= control target key end

     0   :  { %s3942_s0 = inlined_call_operand.hbm [shape: f32[2,8,2,8,256], index: 0, kind: input, shape index: {}]   ;;  %s3943_s1 = inlined_call_operand.hbm [shape: f32[1152,128], index: 1, kind: input, shape index: {}]   ;;  %s3944_s2 = inlined_call_operand.vmem [shape: f32[1,128], index: 2, kind: input, shape index: {}]   ;;  %s3945_s3 = inlined_call_operand.vmem [shape: f32[1,128], index: 3, kind: input, shape index: {}]   ;;  %s3946_s4 = inlined_call_operand.hbm [shape: f32[1152,128], index: 4, kind: input, shape index: {}]   ;;  %s3947_s5 = inlined_call_operand.vmem [shape: f32[1,128], index: 5, kind: input, shape index: {}]   ;;  %s3948_s6 = inlined_call_operand.vmem [shape: f32[1,128], index: 6, kind: input, shape index: {}]   ;;  %s3949_s7 = inlined_call_operand.hbm [shape: f32[2,8,8,128], index: 7, kind: output, shape index: {}]  }
   0x1   :  { %3955 = sst [smem:[#allocation21_spill]] %s3943_s1 }
   0x2   :  { %12 = vsyncpa [#allocation4], 0 }
   0x3   :  { %14 = vsyncpa [#allocation4 + $0x1], 0 }
   0x4   :  { %15 = vsyncpa [#allocation7], 0 }
   0x5   :  { %16 = vsyncpa [#allocation5], 0 }
   0x6   :  { %18 = vsyncpa [#allocation5 + $0x1], 0  ;;  %s3278_s24 = smov 0   ;;  %s3280_s25 = smov 0  }
   0x7   :  { %s3282_s26 = smov 0   ;;  %s3284_s27 = smov 0  }
   0x8 LB: > { %s3299_s28 = sadd.s32 4294967295, %s3225_s27   ;;  %s2377_s29 = sadd.s32 4294967294, %s3225_s27   ;;  %s3225_s27 = sphi %s3284_s27, %s4002_s27   ;;  %s3221_s26 = sphi %s3282_s26, %s4001_s26   ;;  %s3217_s25 = sphi %s3280_s25, %s4000_s25   ;;  %s3213_s24 = sphi %s3278_s24, %s3999_s24  }
   0x9   : > { %p44_p0 = scmp.ne.s32.totalorder %s3217_s25, %s3213_s24  ;;  %p3950_p1 = scmp.eq.s32.totalorder %s3299_s28, 0 }
   0xa   : > { %p200_p3 = scmp.eq.s32.totalorder %s2377_s29, 1  ;;  %p2378_p5 = scmp.ge.s32.totalorder %s3225_s27, 1 }
   0xb   : > { %p3308_p4 = por %p3950_p1, %p44_p0  ;;  %p207_p7 = scmp.lt.s32.totalorder %s3225_s27, 3 }
   0xc   : > { %p3313_p6 = por %p200_p3, %p44_p0  ;;  %s3227_s10 = smov [#allocation6]  }
   0xd   : > { %s3956_s30 = scalar_select %p3308_p4, 1, 0 }
   0xe   : > { %s3957_s8 = scalar_select %p3313_p6, 1, 0 }
   0xf   : > { %p3318_p8 = pnand %p2378_p5, %p207_p7  ;;  %s219_s11 = sshll.u32 %s3227_s10, 4  ;;  %s220_s11 = int_to_ptr.vmem [resolvable:$true] %s219_s11 }
  0x10   : > { %s3228_s13 = smov [#allocation8]   ;;  %s3088_s15 = scalar_lea.vmem %s220_s11, 18432 }
  0x11   : > { %s3958_s9 = scalar_select %p3318_p8, 1, 0 }
  0x12   : > { %p3013_p9 = pneg %p3318_p8  ;;  %s238_s14 = sshll.u32 %s3228_s13, 4  ;;  %s239_s14 = int_to_ptr.vmem [resolvable:$true] %s238_s14 }
  0x13   : > { %p3089_p13 = scmp.ne.s32.totalorder %s220_s11, %s3088_s15  ;;  %p3096_p5 = scmp.lt.s32.totalorder %s220_s11, %s220_s11 }
  0x14   : > { %p3327_p11 = pnand %p3013_p9, %p3950_p1  ;;  %p3097_p7 = scmp.lt.s32.totalorder %s3088_s15, %s3088_s15 }
  0x16   : > { %p3079_p12 = pneg %p3327_p11  ;;  %p3098_p10 = por %p3097_p7, %p3096_p5 }
  0x18   : > { %p3091_p0 = pnand %p3089_p13, %p3079_p12 }
  0x1a   : > { %p3092_p3 = pneg %p3091_p0 }
  0x1c   : > { %p3099_p9 = pnand %p3098_p10, %p3092_p3 }
  0x1e   : > { %3102 = shalt.err (!%p3099_p9)
}
  0x1f   : > { %s3229_s16 = smov 128   ;;  %s3230_s17 = smov 8  }
  0x20   : > { %s3960_s1 = sld [smem:[#allocation21_spill]]  ;;  %s3114_s20 = scalar_lea.vmem %s239_s14, 18432 }
  0x21   : > { %p3115_p1 = scmp.ne.s32.totalorder %s239_s14, %s3114_s20  ;;  %p3122_p2 = scmp.lt.s32.totalorder %s239_s14, %s239_s14 }
  0x22   : > { %p3123_p6 = scmp.lt.s32.totalorder %s3114_s20, %s3114_s20 }
  0x23   : > { %p3117_p13 = pnand %p3115_p1, %p3079_p12 }
  0x24   : > { %p3124_p5 = por %p3123_p6, %p3122_p2 }
  0x25   : > { %p3118_p0 = pneg %p3117_p13 }
  0x26   : > { %3016 = dma.hbm_to_vmem [thread:$0]  (!%p3327_p11), %s3960_s1, 18432, %s220_s11, [#allocation7], %s3229_s16, %s3229_s16, %s3230_s17  }
  0x27   : > { %p3125_p10 = pnand %p3124_p5, %p3118_p0 }
  0x29   : > { %3128 = shalt.err (!%p3125_p10)
}
  0x2a   : > { %3019 = dma.hbm_to_vmem [thread:$0]  (!%p3327_p11), %s3946_s4, 18432, %s239_s14, [#allocation7], %s3229_s16, %s3229_s16, %s3230_s17  }
  0x2b   : > { %s3350_s23 = sadd.s32 1, %s3225_s27   ;;  %s31_s29 = sadd.s32 1, %s3221_s26 }
  0x2c   : > { %s28_s10 = ssub.s32 %s3225_s27, %s3350_s23  ;;  %p38_p1 = scmp.ne.s32.totalorder %s3221_s26, %s3217_s25 }
  0x2d   : > { %p29_p2 = scmp.eq.s32.totalorder %s28_s10, 0  ;;  %p39_p6 = scmp.eq.s32.totalorder %s3225_s27, 0 }
  0x2e   : > { %p3961_p12 = scmp.eq.s32.totalorder %s3299_s28, 1  ;;  %p3030_p7 = scmp.lt.s32.totalorder %s3225_s27, 2 }
  0x2f   : > { %s3366_s12 = scalar_select %p29_p2, %s3221_s26, %s31_s29  }
  0x30   : > { %p3360_p3 = por %p3961_p12, %p38_p1  ;;  %p40_p9 = por %p39_p6, %p38_p1 }
  0x31   : > { %s258_s13 = sand.u32 1, %s3221_s26   ;;  %s2415_s14 = sshll.u32 %s3225_s27, 12 }
  0x32   : > { %s3962_s11 = scalar_select %p3360_p3, 1, 0 }
  0x33   : > { %s2382_s15 = sshll.u32 %s258_s13, 8  ;;  %s3373_s18 = scalar_lea.hbm %s3942_s0, %s2415_s14 }
  0x34   : > { %s262_s19 = scalar_lea.vmem [#allocation3], %s2382_s15  ;;  %p3377_p11 = pnand %p3030_p7, %p40_p9 }
  0x35   : > { %s269_s20 = sshll.u32 %s262_s19, 4  ;;  %s3381_s22 = scalar_lea.sflag [#allocation4], %s258_s13  ;;  %s3375_s20 = int_to_ptr.vmem [resolvable:$true] %s269_s20 }
  0x36   : > { %s3129_s29 = scalar_lea.hbm %s3373_s18, 4096  ;;  %p3131_p0 = pneg %p3377_p11 }
  0x37   : > { %p3130_p13 = scmp.ne.s32.totalorder %s3373_s18, %s3129_s29  ;;  %s3134_s15 = scalar_lea.hbm %s3942_s0, 8192 }
  0x38   : > { %p3135_p1 = scmp.lt.s32.totalorder %s3373_s18, %s3942_s0  ;;  %p3136_p2 = scmp.lt.s32.totalorder %s3134_s15, %s3129_s29 }
  0x39   : > { %p3132_p5 = pnand %p3131_p0, %p3130_p13 }
  0x3a   : > { %p3137_p6 = por %p3136_p2, %p3135_p1 }
  0x3b   : > { %p3133_p10 = pneg %p3132_p5 }
  0x3d   : > { %p3138_p12 = pnand %p3137_p6, %p3133_p10 }
  0x3f   : > { %3141 = shalt.err (!%p3138_p12)
}
  0x40   : > { %s3142_s13 = scalar_lea.vmem %s3375_s20, 4096  ;;  %s3231_s19 = smov [#allocation3]  }
  0x41   : > { %p3143_p7 = scmp.ne.s32.totalorder %s3375_s20, %s3142_s13  ;;  %s3147_s1 = sshll.u32 %s3231_s19, 4  ;;  %s3148_s1 = int_to_ptr.vmem [resolvable:$false] %s3147_s1 }
  0x42   : > { %s3149_s10 = scalar_lea.vmem %s3148_s1, 8192  ;;  %p3150_p5 = scmp.lt.s32.totalorder %s3375_s20, %s3148_s1 }
  0x43   : > { %p3145_p9 = pnand %p3143_p7, %p3131_p0  ;;  %p3151_p3 = scmp.lt.s32.totalorder %s3149_s10, %s3142_s13 }
  0x45   : > { %p3146_p13 = pneg %p3145_p9  ;;  %p3152_p4 = por %p3151_p3, %p3150_p5 }
  0x47   : > { %p3153_p8 = pnand %p3152_p4, %p3146_p13 }
  0x49   : > { %3156 = shalt.err (!%p3153_p8)
}
  0x4a   : > { %s3232_s29 = smov 256   ;;  %s3233_s14 = smov 16  }
  0x4b   : > { %3023 = dma.hbm_to_vmem [thread:$0]  (!%p3377_p11), %s3373_s18, 4096, %s3375_s20, %s3381_s22, %s3232_s29, %s3232_s29, %s3233_s14  }
  0x4c   : > { %p3964_p0 = scmp.ne.s32.totalorder %s3958_s9, 0 }
  0x4e   : > { %281 = sbr.rel (%p3964_p0) target bundleno = 728 (0x2d8), region = 48 }
  0x53   : > { %s3405_s15 = sand.u32 1, %s3217_s25   ;;  %p3965_p4 = scmp.ne.s32.totalorder %s3956_s30, 0 }
  0x54   : > { %s2386_s1 = sshll.u32 %s3405_s15, 8  ;;  %s284_s16 = scalar_lea.sflag [#allocation4], %s3405_s15 }
  0x55   : > { %s3409_s17 = scalar_lea.vmem [#allocation3], %s2386_s1 }
  0x56   : > { %3200 = dma.done.wait (%p3965_p4), %s284_s16, 4096  }
  0x57   : > { %3202 = vsyncadd (%p3965_p4), %s284_s16, 4294963200  ;;  %p3966_p8 = scmp.eq.s32.totalorder %s3299_s28, 0 }
  0x59   : > { %3204 = dma.done.wait (%p3966_p8), [#allocation7], 36864   ;;  %p3967_p3 = pmov %p3966_p8 }
  0x5a   : > { %v3234_v0 = vmov 0.0   ;;  %v648_v1 = vld [vmem:[#allocation6 + $0xf8] sm:$0xff]  ;;  %v647_v5 = vld [vmem:[#allocation6 + $0xf0] sm:$0xff]  ;;  %v646_v9 = vld [vmem:[#allocation6 + $0xe8] sm:$0xff]  ;;  %s2389_s10 = sshll.u32 %s3405_s15, 6  ;;  %s2416_s14 = sshll.u32 %s3299_s28, 10 }
  0x5b   : > { %3206 = vsyncadd (%p3967_p3), [#allocation7], 4294930432  ;;  %825 = vmatprep.mubr.f32.mxu0 %v3234_v0  ;;  %1368 = vst [vmem:[#allocation2 + $0x8] sm:$0xff] %v3234_v0  ;;  %v680_v2 = vld [vmem:[#allocation6 + $0x1f8] sm:$0xff]  ;;  %2417 = vmatprep.subr.mxu0 %v648_v1  ;;  %v679_v6 = vld [vmem:[#allocation6 + $0x1f0] sm:$0xff]  ;;  %s3871_s29 = scalar_lea.vmem [#allocation9], %s2389_s10  ;;  %s3895_s30 = scalar_lea.hbm %s3949_s7, %s2416_s14 }
  0x5c   : > { %412 = vst [vmem:[#allocation2] sm:$0xff] %v3234_v0  ;;  %414 = vst [vmem:[#allocation2 + $0x48] sm:$0x1] %v3234_v0  ;;  %v632_v3 = vld [vmem:[#allocation6 + $0x78] sm:$0xff]  ;;  %2473 = vmatprep.subr.mxu1 %v680_v2  ;;  %v631_v7 = vld [vmem:[#allocation6 + $0x70] sm:$0xff]  ;;  %s2285_s1 = sshll.u32 %s3871_s29, 4  ;;  %s3897_s1 = int_to_ptr.vmem [resolvable:$true] %s2285_s1 }
  0x5d   : > { %415 = vst [vmem:[#allocation2 + $0x90] sm:$0x1] %v3234_v0  ;;  %416 = vst [vmem:[#allocation2 + $0xd8] sm:$0x1] %v3234_v0  ;;  %v664_v4 = vld [vmem:[#allocation6 + $0x178] sm:$0xff]  ;;  %2418 = vmatpush3.msra.mxu0 %v632_v3  ;;  %v663_v8 = vld [vmem:[#allocation6 + $0x170] sm:$0xff] }
  0x5e   : > { %417 = vst [vmem:[#allocation2 + $0x120] sm:$0x1] %v3234_v0  ;;  %418 = vst [vmem:[#allocation2 + $0x168] sm:$0x1] %v3234_v0  ;;  %2474 = vmatpush3.msra.mxu1 %v664_v4  ;;  %2419 = vmatprep.subr.mxu0 %v647_v5  ;;  %v678_v10 = vld [vmem:[#allocation6 + $0x1e8] sm:$0xff]  ;;  %v645_v13 = vld [vmem:[#allocation6 + $0xe0] sm:$0xff] }
  0x5f   : > { %419 = vst [vmem:[#allocation2 + $0x1b0] sm:$0x1] %v3234_v0  ;;  %420 = vst [vmem:[#allocation2 + $0x1f8] sm:$0x1] %v3234_v0  ;;  %2475 = vmatprep.subr.mxu1 %v679_v6  ;;  %v630_v11 = vld [vmem:[#allocation6 + $0x68] sm:$0xff]  ;;  %2420 = vmatpush3.msra.mxu0 %v631_v7  ;;  %v677_v14 = vld [vmem:[#allocation6 + $0x1e0] sm:$0xff] }
  0x60   : > { %450 = vst [vmem:[#allocation2 + $0x10] sm:$0xff] %v3234_v0  ;;  %452 = vst [vmem:[#allocation2 + $0x5f] sm:$0x1] %v3234_v0  ;;  %v662_v12 = vld [vmem:[#allocation6 + $0x168] sm:$0xff]  ;;  %2476 = vmatpush3.msra.mxu1 %v663_v8  ;;  %2421 = vmatprep.subr.mxu0 %v646_v9  ;;  %v629_v15 = vld [vmem:[#allocation6 + $0x60] sm:$0xff]  ;;  %s2272_s9 = scalar_lea.sflag [#allocation5], %s3405_s15 }
  0x61   : > { %453 = vst [vmem:[#allocation2 + $0xa7] sm:$0x1] %v3234_v0  ;;  %454 = vst [vmem:[#allocation2 + $0xef] sm:$0x1] %v3234_v0  ;;  %2477 = vmatprep.subr.mxu1 %v678_v10  ;;  %v661_v16 = vld [vmem:[#allocation6 + $0x160] sm:$0xff]  ;;  %2422 = vmatpush3.msra.mxu0 %v630_v11  ;;  %v644_v17 = vld [vmem:[#allocation6 + $0xd8] sm:$0xff] }
  0x62   : > { %455 = vst [vmem:[#allocation2 + $0x137] sm:$0x1] %v3234_v0  ;;  %456 = vst [vmem:[#allocation2 + $0x17f] sm:$0x1] %v3234_v0  ;;  %2478 = vmatpush3.msra.mxu1 %v662_v12  ;;  %v676_v18 = vld [vmem:[#allocation6 + $0x1d8] sm:$0xff]  ;;  %2423 = vmatprep.subr.mxu0 %v645_v13  ;;  %v643_v21 = vld [vmem:[#allocation6 + $0xd0] sm:$0xff] }
  0x63   : > { %457 = vst [vmem:[#allocation2 + $0x1c7] sm:$0x1] %v3234_v0  ;;  %458 = vst [vmem:[#allocation2 + $0x20f] sm:$0x1] %v3234_v0  ;;  %2479 = vmatprep.subr.mxu1 %v677_v14  ;;  %v628_v19 = vld [vmem:[#allocation6 + $0x58] sm:$0xff]  ;;  %2424 = vmatpush3.msra.mxu0 %v629_v15  ;;  %v675_v22 = vld [vmem:[#allocation6 + $0x1d0] sm:$0xff] }
  0x64   : > { %470 = vst [vmem:[#allocation2 + $0x18] sm:$0x1] %v3234_v0  ;;  %471 = vst [vmem:[#allocation2 + $0x60] sm:$0x1] %v3234_v0  ;;  %v660_v20 = vld [vmem:[#allocation6 + $0x158] sm:$0xff]  ;;  %2480 = vmatpush3.msra.mxu1 %v661_v16  ;;  %2425 = vmatprep.subr.mxu0 %v644_v17  ;;  %v627_v23 = vld [vmem:[#allocation6 + $0x50] sm:$0xff] }
  0x65   : > { %472 = vst [vmem:[#allocation2 + $0xa8] sm:$0x1] %v3234_v0  ;;  %473 = vst [vmem:[#allocation2 + $0xf0] sm:$0x1] %v3234_v0  ;;  %2481 = vmatprep.subr.mxu1 %v676_v18  ;;  %v659_v24 = vld [vmem:[#allocation6 + $0x150] sm:$0xff]  ;;  %2426 = vmatpush3.msra.mxu0 %v628_v19  ;;  %v642_v25 = vld [vmem:[#allocation6 + $0xc8] sm:$0xff] }
  0x66   : > { %474 = vst [vmem:[#allocation2 + $0x138] sm:$0x1] %v3234_v0  ;;  %475 = vst [vmem:[#allocation2 + $0x180] sm:$0x1] %v3234_v0  ;;  %2482 = vmatpush3.msra.mxu1 %v660_v20  ;;  %v674_v26 = vld [vmem:[#allocation6 + $0x1c8] sm:$0xff]  ;;  %2427 = vmatprep.subr.mxu0 %v643_v21  ;;  %v641_v29 = vld [vmem:[#allocation6 + $0xc0] sm:$0xff] }
  0x67   : > { %476 = vst [vmem:[#allocation2 + $0x1c8] sm:$0x1] %v3234_v0  ;;  %477 = vst [vmem:[#allocation2 + $0x210] sm:$0x1] %v3234_v0  ;;  %2483 = vmatprep.subr.mxu1 %v675_v22  ;;  %v626_v27 = vld [vmem:[#allocation6 + $0x48] sm:$0xff]  ;;  %2428 = vmatpush3.msra.mxu0 %v627_v23  ;;  %v673_v30 = vld [vmem:[#allocation6 + $0x1c0] sm:$0xff] }
  0x68   : > { %496 = vst [vmem:[#allocation2 + $0x2f] sm:$0x1] %v3234_v0  ;;  %497 = vst [vmem:[#allocation2 + $0x77] sm:$0x1] %v3234_v0  ;;  %v658_v28 = vld [vmem:[#allocation6 + $0x148] sm:$0xff]  ;;  %2484 = vmatpush3.msra.mxu1 %v659_v24  ;;  %2429 = vmatprep.subr.mxu0 %v642_v25  ;;  %v625_v31 = vld [vmem:[#allocation6 + $0x40] sm:$0xff] }
  0x69   : > { %498 = vst [vmem:[#allocation2 + $0xbf] sm:$0x1] %v3234_v0  ;;  %499 = vst [vmem:[#allocation2 + $0x107] sm:$0x1] %v3234_v0  ;;  %2485 = vmatprep.subr.mxu1 %v674_v26  ;;  %v657_v32 = vld [vmem:[#allocation6 + $0x140] sm:$0xff]  ;;  %2430 = vmatpush3.msra.mxu0 %v626_v27  ;;  %v640_v33 = vld [vmem:[#allocation6 + $0xb8] sm:$0xff] }
  0x6a   : > { %500 = vst [vmem:[#allocation2 + $0x14f] sm:$0x1] %v3234_v0  ;;  %501 = vst [vmem:[#allocation2 + $0x197] sm:$0x1] %v3234_v0  ;;  %2486 = vmatpush3.msra.mxu1 %v658_v28  ;;  %v672_v34 = vld [vmem:[#allocation6 + $0x1b8] sm:$0xff]  ;;  %2431 = vmatprep.subr.mxu0 %v641_v29  ;;  %v639_v37 = vld [vmem:[#allocation6 + $0xb0] sm:$0xff] }
  0x6b   : > { %502 = vst [vmem:[#allocation2 + $0x1df] sm:$0x1] %v3234_v0  ;;  %503 = vst [vmem:[#allocation2 + $0x227] sm:$0x1] %v3234_v0  ;;  %2487 = vmatprep.subr.mxu1 %v673_v30  ;;  %v624_v35 = vld [vmem:[#allocation6 + $0x38] sm:$0xff]  ;;  %2432 = vmatpush3.msra.mxu0 %v625_v31  ;;  %v671_v38 = vld [vmem:[#allocation6 + $0x1b0] sm:$0xff] }
  0x6c   : > { %512 = vst [vmem:[#allocation2 + $0x228] sm:$0xff] %v3234_v0  ;;  %513 = vst [vmem:[#allocation2 + $0x30] sm:$0x1] %v3234_v0  ;;  %v656_v36 = vld [vmem:[#allocation6 + $0x138] sm:$0xff]  ;;  %2488 = vmatpush3.msra.mxu1 %v657_v32  ;;  %2433 = vmatprep.subr.mxu0 %v640_v33  ;;  %v623_v39 = vld [vmem:[#allocation6 + $0x30] sm:$0xff]  ;;  %s3157_s28 = scalar_lea.vmem %s3897_s1, 1024 }
  0x6d   : > { %514 = vst [vmem:[#allocation2 + $0x78] sm:$0x1] %v3234_v0  ;;  %515 = vst [vmem:[#allocation2 + $0xc0] sm:$0x1] %v3234_v0  ;;  %2489 = vmatprep.subr.mxu1 %v672_v34  ;;  %v655_v40 = vld [vmem:[#allocation6 + $0x130] sm:$0xff]  ;;  %v638_v41 = vld [vmem:[#allocation6 + $0xa8] sm:$0xff]  ;;  %2434 = vmatpush3.msra.mxu0 %v624_v35  ;;  %p3158_p11 = scmp.ne.s32.totalorder %s3897_s1, %s3157_s28 }
  0x6e   : > { %516 = vst [vmem:[#allocation2 + $0x108] sm:$0x1] %v3234_v0  ;;  %517 = vst [vmem:[#allocation2 + $0x150] sm:$0x1] %v3234_v0  ;;  %2490 = vmatpush3.msra.mxu1 %v656_v36  ;;  %v670_v42 = vld [vmem:[#allocation6 + $0x1a8] sm:$0xff]  ;;  %2435 = vmatprep.subr.mxu0 %v639_v37  ;;  %v637_v45 = vld [vmem:[#allocation6 + $0xa0] sm:$0xff] }
  0x6f   : > { %518 = vst [vmem:[#allocation2 + $0x198] sm:$0x1] %v3234_v0  ;;  %519 = vst [vmem:[#allocation2 + $0x1e0] sm:$0x1] %v3234_v0  ;;  %v622_v43 = vld [vmem:[#allocation6 + $0x28] sm:$0xff]  ;;  %2491 = vmatprep.subr.mxu1 %v671_v38  ;;  %v669_v46 = vld [vmem:[#allocation6 + $0x1a0] sm:$0xff]  ;;  %2436 = vmatpush3.msra.mxu0 %v623_v39 }
  0x70   : > { %536 = vst [vmem:[#allocation2 + $0x238] sm:$0xff] %v3234_v0  ;;  %537 = vst [vmem:[#allocation2 + $0x47] sm:$0x1] %v3234_v0  ;;  %v654_v44 = vld [vmem:[#allocation6 + $0x128] sm:$0xff]  ;;  %v621_v47 = vld [vmem:[#allocation6 + $0x20] sm:$0xff]  ;;  %2492 = vmatpush3.msra.mxu1 %v655_v40  ;;  %2437 = vmatprep.subr.mxu0 %v638_v41  ;;  %p3996_p10 = scmp.ne.s32.totalorder %s3962_s11, 0 }
  0x71   : > { %538 = vst [vmem:[#allocation2 + $0x8f] sm:$0x1] %v3234_v0  ;;  %539 = vst [vmem:[#allocation2 + $0xd7] sm:$0x1] %v3234_v0  ;;  %v653_v48 = vld [vmem:[#allocation6 + $0x120] sm:$0xff]  ;;  %v636_v49 = vld [vmem:[#allocation6 + $0x98] sm:$0xff]  ;;  %2493 = vmatprep.subr.mxu1 %v670_v42  ;;  %2438 = vmatpush3.msra.mxu0 %v622_v43 }
  0x72   : > { %540 = vst [vmem:[#allocation2 + $0x11f] sm:$0x1] %v3234_v0  ;;  %541 = vst [vmem:[#allocation2 + $0x167] sm:$0x1] %v3234_v0  ;;  %v668_v50 = vld [vmem:[#allocation6 + $0x198] sm:$0xff]  ;;  %v326_v53 = vld [vmem:[%s3409_s17] sm:$0xff]  ;;  %2494 = vmatpush3.msra.mxu1 %v654_v44  ;;  %2439 = vmatprep.subr.mxu0 %v637_v45  ;;  %p3159_p1 = pnand %p3158_p11, %p3996_p10 }
  0x73   : > { %542 = vst [vmem:[#allocation2 + $0x1af] sm:$0x1] %v3234_v0  ;;  %543 = vst [vmem:[#allocation2 + $0x1f7] sm:$0x1] %v3234_v0  ;;  %v620_v51 = vld [vmem:[#allocation6 + $0x18] sm:$0xff]  ;;  %v327_v54 = vld [vmem:[%s3409_s17 + $0x8] sm:$0xff]  ;;  %2495 = vmatprep.subr.mxu1 %v669_v46  ;;  %2440 = vmatpush3.msra.mxu0 %v621_v47 }
  0x74   : > { %413 = vst [vmem:[#allocation2] sm:$0x1] %v3234_v0  ;;  %451 = vst [vmem:[#allocation2 + $0x17] sm:$0x1] %v3234_v0  ;;  %v652_v52 = vld [vmem:[#allocation6 + $0x118] sm:$0xff]  ;;  %v2390_v55 = vld [vmem:[%s3409_s17 + $0x10] sm:$0xff]  ;;  %2496 = vmatpush3.msra.mxu1 %v653_v48  ;;  %2441 = vmatprep.subr.mxu0 %v636_v49  ;;  %p3160_p2 = pneg %p3159_p1 }
  0x75   : > { %520 = vst [vmem:[#allocation2 + $0x228] sm:$0x1] %v3234_v0  ;;  %544 = vst [vmem:[#allocation2 + $0x23f] sm:$0x1] %v3234_v0  ;;  %v2391_v56 = vld [vmem:[%s3409_s17 + $0x18] sm:$0xff]  ;;  %v635_v58 = vld [vmem:[#allocation6 + $0x90] sm:$0xff]  ;;  %v359_v60 = vmax.f32 %v326_v53, %v2390_v55  ;;  %2497 = vmatprep.subr.mxu1 %v668_v50  ;;  %2442 = vmatpush3.msra.mxu0 %v620_v51 }
  0x76   : > { %v667_v59 = vld [vmem:[#allocation6 + $0x190] sm:$0xff]  ;;  %v360_v61 = vmax.f32 %v327_v54, %v2391_v56  ;;  %v328_v2 = vld [vmem:[%s3409_s17 + $0x20] sm:$0xff]  ;;  %v329_v4 = vld [vmem:[%s3409_s17 + $0x28] sm:$0xff]  ;;  %2498 = vmatpush3.msra.mxu1 %v652_v52  ;;  %2443 = vmatprep.subr.mxu0 %v635_v58  ;;  %s3235_s18 = smov [#allocation9]  }
  0x77   : > { %v619_v63 = vld [vmem:[#allocation6 + $0x10] sm:$0xff]  ;;  %v2393_v6 = vld [vmem:[%s3409_s17 + $0x38] sm:$0xff]  ;;  %v634_v7 = vld [vmem:[#allocation6 + $0x88] sm:$0xff]  ;;  %2499 = vmatprep.subr.mxu1 %v667_v59  ;;  %s3161_s20 = sshll.u32 %s3235_s18, 4  ;;  %s3162_s20 = int_to_ptr.vmem [resolvable:$false] %s3161_s20 }
  0x78   : > { %v651_v1 = vld [vmem:[#allocation6 + $0x110] sm:$0xff]  ;;  %v3485_v3 = vmax.f32 %v359_v60, %v360_v61  ;;  %v666_v8 = vld [vmem:[#allocation6 + $0x188] sm:$0xff]  ;;  %v362_v11 = vmax.f32 %v329_v4, %v2393_v6  ;;  %v633_v13 = vld [vmem:[#allocation6 + $0x80] sm:$0xff]  ;;  %2444 = vmatpush3.msra.mxu0 %v619_v63  ;;  %s3163_s21 = scalar_lea.vmem %s3162_s20, 2048  ;;  %p3164_p6 = scmp.lt.s32.totalorder %s3897_s1, %s3162_s20 }
  0x79   : > { %v2392_v5 = vld [vmem:[%s3409_s17 + $0x30] sm:$0xff]  ;;  %v618_v9 = vld [vmem:[#allocation6 + $0x8] sm:$0xff]  ;;  %v665_v14 = vld [vmem:[#allocation6 + $0x180] sm:$0xff]  ;;  %2500 = vmatpush3.msra.mxu1 %v651_v1  ;;  %2445 = vmatprep.subr.mxu0 %v634_v7  ;;  %p3165_p12 = scmp.lt.s32.totalorder %s3163_s21, %s3157_s28 }
  0x7a   : > { %v361_v10 = vmax.f32 %v328_v2, %v2392_v5  ;;  %v650_v12 = vld [vmem:[#allocation6 + $0x108] sm:$0xff]  ;;  %v390_v15 = vrot.slane %v3485_v3, 7  ;;  %v429_v16 = vrot.slane %v3485_v3, 1  ;;  %v617_v17 = vld [vmem:[#allocation6] sm:$0xff]  ;;  %2501 = vmatprep.subr.mxu1 %v666_v8  ;;  %v2394_v22 = vld [vmem:[%s3409_s17 + $0x50] sm:$0xff]  ;;  %2446 = vmatpush3.msra.mxu0 %v618_v9 }
  0x7b   : > { %v3477_v57 = vld [vmem:[#allocation2] sm:$0xff]  ;;  %v3480_v62 = vld [vmem:[#allocation2 + $0x10] sm:$0xff]  ;;  %v331_v21 = vld [vmem:[%s3409_s17 + $0x48] sm:$0xff]  ;;  %2502 = vmatpush3.msra.mxu1 %v650_v12  ;;  %2447 = vmatprep.subr.mxu0 %v633_v13  ;;  %p3166_p7 = por %p3165_p12, %p3164_p6 }
  0x7c   : > { %1352 = vst [vmem:[#allocation2] sm:$0xff] %v3234_v0  ;;  %1390 = vst [vmem:[#allocation2 + $0x10] sm:$0xff] %v3234_v0  ;;  %v649_v18 = vld [vmem:[#allocation6 + $0x100] sm:$0xff]  ;;  %v3493_v19 = vmax.f32 %v361_v10, %v362_v11  ;;  %v2395_v23 = vld [vmem:[%s3409_s17 + $0x58] sm:$0xff]  ;;  %2503 = vmatprep.subr.mxu1 %v665_v14  ;;  %2448 = vmatpush3.msra.mxu0 %v617_v17 }
  0x7d   : > { %1353 = vst [vmem:[#allocation2] sm:$0x1] %v3234_v0  ;;  %1391 = vst [vmem:[#allocation2 + $0x17] sm:$0x1] %v3234_v0  ;;  %v330_v20 = vld [vmem:[%s3409_s17 + $0x40] sm:$0xff]  ;;  %v712_v24 = vld [vmem:[#allocation6 + $0x2f8] sm:$0xff]  ;;  %v364_v27 = vmax.f32 %v331_v21, %v2395_v23  ;;  %2504 = vmatpush3.msra.mxu1 %v649_v18  ;;  %826 = vmatmul.mubr.f32.vlgmr.msra.gmra.mxu0 %v3477_v57  ;;  %p3167_p9 = pnand %p3166_p7, %p3160_p2 }
  0x7e   : > { %462 = vst [vmem:[#allocation2 + $0x18] sm:$0xfe] %v390_v15  ;;  %405 = vst [vmem:[#allocation2 + $0x48] sm:$0xfe] %v390_v15  ;;  %v391_v25 = vrot.slane %v3493_v19, 7  ;;  %v363_v26 = vmax.f32 %v330_v20, %v2394_v22  ;;  %v430_v28 = vrot.slane %v3493_v19, 1  ;;  %2529 = vmatprep.subr.mxu0 %v712_v24  ;;  %830 = vmatprep.mubr.f32.mxu0 %v3485_v3 }
  0x7f   : > { %443 = vst [vmem:[#allocation2 + $0x58] sm:$0x7f] %v429_v16  ;;  %488 = vst [vmem:[#allocation2 + $0x28] sm:$0x7f] %v429_v16  ;;  %v696_v29 = vld [vmem:[#allocation6 + $0x278] sm:$0xff]  ;;  %v711_v31 = vld [vmem:[#allocation6 + $0x2f0] sm:$0xff] }
  0x80   : > { %v744_v30 = vld [vmem:[#allocation6 + $0x3f8] sm:$0xff]  ;;  %463 = vst [vmem:[#allocation2 + $0x60] sm:$0xfe] %v391_v25  ;;  %406 = vst [vmem:[#allocation2 + $0x90] sm:$0xfe] %v391_v25  ;;  %v695_v32 = vld [vmem:[#allocation6 + $0x270] sm:$0xff]  ;;  %v3501_v33 = vmax.f32 %v363_v26, %v364_v27  ;;  %2530 = vmatpush3.msra.mxu0 %v696_v29 }
  0x81   : > { %504 = vst [vmem:[#allocation2 + $0x30] sm:$0xfe] %v391_v25  ;;  %444 = vst [vmem:[#allocation2 + $0xa0] sm:$0x7f] %v430_v28  ;;  %v332_v34 = vld [vmem:[%s3409_s17 + $0x60] sm:$0xff]  ;;  %v333_v35 = vld [vmem:[%s3409_s17 + $0x68] sm:$0xff]  ;;  %2585 = vmatprep.subr.mxu1 %v744_v30  ;;  %2531 = vmatprep.subr.mxu0 %v711_v31 }
  0x82   : > { %489 = vst [vmem:[#allocation2 + $0x70] sm:$0x7f] %v430_v28  ;;  %529 = vst [vmem:[#allocation2 + $0x40] sm:$0x7f] %v430_v28  ;;  %v2396_v36 = vld [vmem:[%s3409_s17 + $0x70] sm:$0xff]  ;;  %v2397_v37 = vld [vmem:[%s3409_s17 + $0x78] sm:$0xff]  ;;  %2532 = vmatpush3.msra.mxu0 %v695_v32 }
  0x83   : > { %v728_v38 = vld [vmem:[#allocation6 + $0x378] sm:$0xff]  ;;  %v392_v39 = vrot.slane %v3501_v33, 7  ;;  %v365_v40 = vmax.f32 %v332_v34, %v2396_v36  ;;  %v366_v41 = vmax.f32 %v333_v35, %v2397_v37  ;;  %v431_v42 = vrot.slane %v3501_v33, 1  ;;  %v710_v43 = vld [vmem:[#allocation6 + $0x2e8] sm:$0xff]  ;;  %v743_v44 = vld [vmem:[#allocation6 + $0x3f0] sm:$0xff] }
  0x84   : > { %v694_v45 = vld [vmem:[#allocation6 + $0x268] sm:$0xff]  ;;  %v727_v49 = vld [vmem:[#allocation6 + $0x370] sm:$0xff]  ;;  %v709_v51 = vld [vmem:[#allocation6 + $0x2e0] sm:$0xff]  ;;  %2533 = vmatprep.subr.mxu0 %v710_v43 }
  0x85   : > { %v548_v46 = vld [vmem:[#allocation2 + $0x18] sm:$0xff]  ;;  %v554_v47 = vld [vmem:[#allocation2 + $0x48] sm:$0xff]  ;;  %464 = vst [vmem:[#allocation2 + $0xa8] sm:$0xfe] %v392_v39  ;;  %407 = vst [vmem:[#allocation2 + $0xd8] sm:$0xfe] %v392_v39  ;;  %v3511_v50 = vmax.f32 %v365_v40, %v366_v41  ;;  %2534 = vmatpush3.msra.mxu0 %v694_v45 }
  0x86   : > { %v556_v48 = vld [vmem:[#allocation2 + $0x58] sm:$0xff]  ;;  %505 = vst [vmem:[#allocation2 + $0x78] sm:$0xfe] %v392_v39  ;;  %445 = vst [vmem:[#allocation2 + $0xe8] sm:$0x7f] %v431_v42  ;;  %930 = vmatprep.mubr.f32.mxu1 %v548_v46  ;;  %831 = vmatmul.mubr.f32.gmra.mxu0 %v554_v47  ;;  %v742_v52 = vld [vmem:[#allocation6 + $0x3e8] sm:$0xff] }
  0x87   : > { %490 = vst [vmem:[#allocation2 + $0xb8] sm:$0x7f] %v431_v42  ;;  %530 = vst [vmem:[#allocation2 + $0x88] sm:$0x7f] %v431_v42  ;;  %v334_v53 = vld [vmem:[%s3409_s17 + $0x80] sm:$0xff]  ;;  %931 = vmatmul.mubr.f32.vlgmr.msra.gmra.mxu1 %v3480_v62  ;;  %v393_v54 = vrot.slane %v3511_v50, 7  ;;  %2535 = vmatprep.subr.mxu0 %v709_v51 }
  0x88   : > { %1410 = vst [vmem:[#allocation2 + $0x18] sm:$0x1] %v3234_v0  ;;  %1354 = vst [vmem:[#allocation2 + $0x48] sm:$0x1] %v3234_v0  ;;  %v335_v55 = vld [vmem:[%s3409_s17 + $0x88] sm:$0xff]  ;;  %v2398_v56 = vld [vmem:[%s3409_s17 + $0x90] sm:$0xff]  ;;  %2586 = vmatpush3.msra.mxu1 %v728_v38  ;;  %835 = vmatprep.mubr.f32.mxu0 %v3493_v19 }
  0x89   : > { %1392 = vst [vmem:[#allocation2 + $0x5f] sm:$0x1] %v3234_v0  ;;  %v2399_v57 = vld [vmem:[%s3409_s17 + $0x98] sm:$0xff]  ;;  %v432_v58 = vrot.slane %v3511_v50, 1  ;;  %v557_v59 = vld [vmem:[#allocation2 + $0x60] sm:$0xff]  ;;  %v563_v60 = vld [vmem:[#allocation2 + $0x90] sm:$0xff]  ;;  %v367_v63 = vmax.f32 %v334_v53, %v2398_v56  ;;  %2587 = vmatprep.subr.mxu1 %v743_v44 }
  0x8a   : > { %v565_v61 = vld [vmem:[#allocation2 + $0xa0] sm:$0xff]  ;;  %v368_v1 = vmax.f32 %v335_v55, %v2399_v57  ;;  %935 = vmatprep.mubr.f32.mxu1 %v557_v59  ;;  %1411 = vst [vmem:[#allocation2 + $0x60] sm:$0x1] %v3234_v0  ;;  %1355 = vst [vmem:[#allocation2 + $0x90] sm:$0x1] %v3234_v0  ;;  %2588 = vmatpush3.msra.mxu1 %v727_v49  ;;  %v726_v2 = vld [vmem:[#allocation6 + $0x368] sm:$0xff] }
  0x8b   : > { %v693_v62 = vld [vmem:[#allocation6 + $0x260] sm:$0xff]  ;;  %1393 = vst [vmem:[#allocation2 + $0xa7] sm:$0x1] %v3234_v0  ;;  %465 = vst [vmem:[#allocation2 + $0xf0] sm:$0xfe] %v393_v54  ;;  %v708_v4 = vld [vmem:[#allocation6 + $0x2d8] sm:$0xff]  ;;  %936 = vmatmul.mubr.f32.gmra.mxu1 %v556_v48  ;;  %2589 = vmatprep.subr.mxu1 %v742_v52 }
  0x8c   : > { %408 = vst [vmem:[#allocation2 + $0x120] sm:$0xfe] %v393_v54  ;;  %506 = vst [vmem:[#allocation2 + $0xc0] sm:$0xfe] %v393_v54  ;;  %v741_v5 = vld [vmem:[#allocation6 + $0x3e0] sm:$0xff]  ;;  %v3526_v6 = vmax.f32 %v367_v63, %v368_v1  ;;  %v692_v7 = vld [vmem:[#allocation6 + $0x258] sm:$0xff]  ;;  %2536 = vmatpush3.msra.mxu0 %v693_v62  ;;  %2590 = vmatpush3.msra.mxu1 %v726_v2 }
  0x8d   : > { %446 = vst [vmem:[#allocation2 + $0x130] sm:$0x7f] %v432_v58  ;;  %491 = vst [vmem:[#allocation2 + $0x100] sm:$0x7f] %v432_v58  ;;  %v725_v8 = vld [vmem:[#allocation6 + $0x360] sm:$0xff]  ;;  %v566_v10 = vld [vmem:[#allocation2 + $0xa8] sm:$0xff]  ;;  %836 = vmatmul.mubr.f32.gmra.mxu0 %v563_v60  ;;  %2537 = vmatprep.subr.mxu0 %v708_v4 }
  0x8e   : > { %531 = vst [vmem:[#allocation2 + $0xd0] sm:$0x7f] %v432_v58  ;;  %v336_v9 = vld [vmem:[%s3409_s17 + $0xa0] sm:$0xff]  ;;  %v572_v11 = vld [vmem:[#allocation2 + $0xd8] sm:$0xff]  ;;  %v574_v12 = vld [vmem:[#allocation2 + $0xe8] sm:$0xff]  ;;  %v394_v13 = vrot.slane %v3526_v6, 7  ;;  %940 = vmatprep.mubr.f32.mxu1 %v566_v10  ;;  %2591 = vmatprep.subr.mxu1 %v741_v5 }
  0x8f   : > { %v433_v14 = vrot.slane %v3526_v6, 1  ;;  %1412 = vst [vmem:[#allocation2 + $0xa8] sm:$0x1] %v3234_v0  ;;  %1356 = vst [vmem:[#allocation2 + $0xd8] sm:$0x1] %v3234_v0  ;;  %v337_v15 = vld [vmem:[%s3409_s17 + $0xa8] sm:$0xff]  ;;  %941 = vmatmul.mubr.f32.gmra.mxu1 %v565_v61  ;;  %2538 = vmatpush3.msra.mxu0 %v692_v7 }
  0x90   : > { %1394 = vst [vmem:[#allocation2 + $0xef] sm:$0x1] %v3234_v0  ;;  %v2400_v16 = vld [vmem:[%s3409_s17 + $0xb0] sm:$0xff]  ;;  %v2401_v17 = vld [vmem:[%s3409_s17 + $0xb8] sm:$0xff]  ;;  %466 = vst [vmem:[#allocation2 + $0x138] sm:$0xfe] %v394_v13  ;;  %2592 = vmatpush3.msra.mxu1 %v725_v8  ;;  %840 = vmatprep.mubr.f32.mxu0 %v3501_v33 }
  0x91   : > { %v707_v18 = vld [vmem:[#allocation6 + $0x2d0] sm:$0xff]  ;;  %v740_v20 = vld [vmem:[#allocation6 + $0x3d8] sm:$0xff]  ;;  %409 = vst [vmem:[#allocation2 + $0x168] sm:$0xfe] %v394_v13  ;;  %507 = vst [vmem:[#allocation2 + $0x108] sm:$0xfe] %v394_v13  ;;  %v369_v21 = vmax.f32 %v336_v9, %v2400_v16  ;;  %v370_v22 = vmax.f32 %v337_v15, %v2401_v17  ;;  %841 = vmatmul.mubr.f32.gmra.mxu0 %v572_v11 }
  0x92   : > { %447 = vst [vmem:[#allocation2 + $0x178] sm:$0x7f] %v433_v14  ;;  %492 = vst [vmem:[#allocation2 + $0x148] sm:$0x7f] %v433_v14  ;;  %v691_v23 = vld [vmem:[#allocation6 + $0x250] sm:$0xff]  ;;  %v724_v24 = vld [vmem:[#allocation6 + $0x358] sm:$0xff]  ;;  %2539 = vmatprep.subr.mxu0 %v707_v18  ;;  %2593 = vmatprep.subr.mxu1 %v740_v20 }
  0x93   : > { %532 = vst [vmem:[#allocation2 + $0x118] sm:$0x7f] %v433_v14  ;;  %v575_v25 = vld [vmem:[#allocation2 + $0xf0] sm:$0xff]  ;;  %v3538_v26 = vld [vmem:[#allocation2 + $0x120] sm:$0xff]  ;;  %v3542_v28 = vmax.f32 %v369_v21, %v370_v22  ;;  %v706_v29 = vld [vmem:[#allocation6 + $0x2c8] sm:$0xff]  ;;  %2540 = vmatpush3.msra.mxu0 %v691_v23  ;;  %2594 = vmatpush3.msra.mxu1 %v724_v24 }
  0x94   : > { %v3540_v27 = vld [vmem:[#allocation2 + $0x130] sm:$0xff]  ;;  %1413 = vst [vmem:[#allocation2 + $0xf0] sm:$0x1] %v3234_v0  ;;  %1357 = vst [vmem:[#allocation2 + $0x120] sm:$0x1] %v3234_v0  ;;  %v338_v31 = vld [vmem:[%s3409_s17 + $0xc0] sm:$0xff]  ;;  %945 = vmatprep.mubr.f32.mxu1 %v575_v25  ;;  %2541 = vmatprep.subr.mxu0 %v706_v29 }
  0x95   : > { %v739_v30 = vld [vmem:[#allocation6 + $0x3d0] sm:$0xff]  ;;  %1395 = vst [vmem:[#allocation2 + $0x137] sm:$0x1] %v3234_v0  ;;  %v395_v32 = vrot.slane %v3542_v28, 7  ;;  %v339_v34 = vld [vmem:[%s3409_s17 + $0xc8] sm:$0xff]  ;;  %v2403_v36 = vld [vmem:[%s3409_s17 + $0xd8] sm:$0xff]  ;;  %946 = vmatmul.mubr.f32.gmra.mxu1 %v574_v12  ;;  %845 = vmatprep.mubr.f32.mxu0 %v3511_v50 }
  0x96   : > { %v2402_v35 = vld [vmem:[%s3409_s17 + $0xd0] sm:$0xff]  ;;  %v434_v37 = vrot.slane %v3542_v28, 1  ;;  %v690_v38 = vld [vmem:[#allocation6 + $0x248] sm:$0xff]  ;;  %v372_v41 = vmax.f32 %v339_v34, %v2403_v36  ;;  %v705_v42 = vld [vmem:[#allocation6 + $0x2c0] sm:$0xff]  ;;  %2595 = vmatprep.subr.mxu1 %v739_v30  ;;  %846 = vmatmul.mubr.f32.gmra.mxu0 %v3538_v26 }
  0x97   : > { %v723_v39 = vld [vmem:[#allocation6 + $0x350] sm:$0xff]  ;;  %v371_v40 = vmax.f32 %v338_v31, %v2402_v35  ;;  %v738_v43 = vld [vmem:[#allocation6 + $0x3c8] sm:$0xff]  ;;  %467 = vst [vmem:[#allocation2 + $0x180] sm:$0xfe] %v395_v32  ;;  %410 = vst [vmem:[#allocation2 + $0x1b0] sm:$0xfe] %v395_v32  ;;  %2542 = vmatpush3.msra.mxu0 %v690_v38  ;;  %850 = vmatprep.mubr.f32.mxu0 %v3526_v6 }
  0x98   : > { %508 = vst [vmem:[#allocation2 + $0x150] sm:$0xfe] %v395_v32  ;;  %448 = vst [vmem:[#allocation2 + $0x1c0] sm:$0x7f] %v434_v37  ;;  %v584_v44 = vld [vmem:[#allocation2 + $0x138] sm:$0xff]  ;;  %v3554_v45 = vld [vmem:[#allocation2 + $0x168] sm:$0xff]  ;;  %2596 = vmatpush3.msra.mxu1 %v723_v39  ;;  %2543 = vmatprep.subr.mxu0 %v705_v42 }
  0x99   : > { %493 = vst [vmem:[#allocation2 + $0x190] sm:$0x7f] %v434_v37  ;;  %533 = vst [vmem:[#allocation2 + $0x160] sm:$0x7f] %v434_v37  ;;  %v3556_v46 = vld [vmem:[#allocation2 + $0x178] sm:$0xff]  ;;  %v3558_v47 = vmax.f32 %v371_v40, %v372_v41  ;;  %v689_v48 = vld [vmem:[#allocation6 + $0x240] sm:$0xff]  ;;  %2597 = vmatprep.subr.mxu1 %v738_v43  ;;  %950 = vmatprep.mubr.f32.mxu1 %v584_v44 }
  0x9a   : > { %1414 = vst [vmem:[#allocation2 + $0x138] sm:$0x1] %v3234_v0  ;;  %v722_v49 = vld [vmem:[#allocation6 + $0x348] sm:$0xff]  ;;  %1358 = vst [vmem:[#allocation2 + $0x168] sm:$0x1] %v3234_v0  ;;  %v340_v51 = vld [vmem:[%s3409_s17 + $0xe0] sm:$0xff]  ;;  %2544 = vmatpush3.msra.mxu0 %v689_v48  ;;  %951 = vmatmul.mubr.f32.gmra.mxu1 %v3540_v27 }
  0x9b   : > { %1396 = vst [vmem:[#allocation2 + $0x17f] sm:$0x1] %v3234_v0  ;;  %v396_v52 = vrot.slane %v3558_v47, 7  ;;  %v341_v53 = vld [vmem:[%s3409_s17 + $0xe8] sm:$0xff]  ;;  %v2404_v54 = vld [vmem:[%s3409_s17 + $0xf0] sm:$0xff]  ;;  %v2405_v55 = vld [vmem:[%s3409_s17 + $0xf8] sm:$0xff]  ;;  %2598 = vmatpush3.msra.mxu1 %v722_v49  ;;  %851 = vmatmul.mubr.f32.gmra.mxu0 %v3554_v45 }
  0x9c   : > { %v435_v56 = vrot.slane %v3558_v47, 1  ;;  %v704_v57 = vld [vmem:[#allocation6 + $0x2b8] sm:$0xff]  ;;  %v737_v58 = vld [vmem:[#allocation6 + $0x3c0] sm:$0xff]  ;;  %v373_v59 = vmax.f32 %v340_v51, %v2404_v54  ;;  %v374_v60 = vmax.f32 %v341_v53, %v2405_v55  ;;  %v703_v1 = vld [vmem:[#allocation6 + $0x2b0] sm:$0xff]  ;;  %855 = vmatprep.mubr.f32.mxu0 %v3542_v28 }
  0x9d   : > { %v688_v61 = vld [vmem:[#allocation6 + $0x238] sm:$0xff]  ;;  %v721_v63 = vld [vmem:[#allocation6 + $0x340] sm:$0xff]  ;;  %468 = vst [vmem:[#allocation2 + $0x1c8] sm:$0xfe] %v396_v52  ;;  %411 = vst [vmem:[#allocation2 + $0x1f8] sm:$0xfe] %v396_v52  ;;  %2545 = vmatprep.subr.mxu0 %v704_v57  ;;  %2599 = vmatprep.subr.mxu1 %v737_v58 }
  0x9e   : > { %509 = vst [vmem:[#allocation2 + $0x198] sm:$0xfe] %v396_v52  ;;  %449 = vst [vmem:[#allocation2 + $0x208] sm:$0x7f] %v435_v56  ;;  %v736_v62 = vld [vmem:[#allocation6 + $0x3b8] sm:$0xff]  ;;  %v687_v2 = vld [vmem:[#allocation6 + $0x230] sm:$0xff]  ;;  %v3572_v4 = vmax.f32 %v373_v59, %v374_v60  ;;  %2546 = vmatpush3.msra.mxu0 %v688_v61  ;;  %2600 = vmatpush3.msra.mxu1 %v721_v63 }
  0x9f   : > { %494 = vst [vmem:[#allocation2 + $0x1d8] sm:$0x7f] %v435_v56  ;;  %534 = vst [vmem:[#allocation2 + $0x1a8] sm:$0x7f] %v435_v56  ;;  %v593_v5 = vld [vmem:[#allocation2 + $0x180] sm:$0xff]  ;;  %v3574_v7 = vld [vmem:[#allocation2 + $0x1b0] sm:$0xff]  ;;  %2547 = vmatprep.subr.mxu0 %v703_v1  ;;  %2601 = vmatprep.subr.mxu1 %v736_v62 }
  0xa0   : > { %v3576_v8 = vld [vmem:[#allocation2 + $0x1c0] sm:$0xff]  ;;  %1415 = vst [vmem:[#allocation2 + $0x180] sm:$0x1] %v3234_v0  ;;  %v720_v9 = vld [vmem:[#allocation6 + $0x338] sm:$0xff]  ;;  %v702_v10 = vld [vmem:[#allocation6 + $0x2a8] sm:$0xff]  ;;  %v460_v11 = vrot.slane %v3572_v4, 7  ;;  %955 = vmatprep.mubr.f32.mxu1 %v593_v5  ;;  %2548 = vmatpush3.msra.mxu0 %v687_v2 }
  0xa1   : > { %1359 = vst [vmem:[#allocation2 + $0x1b0] sm:$0x1] %v3234_v0  ;;  %1397 = vst [vmem:[#allocation2 + $0x1c7] sm:$0x1] %v3234_v0  ;;  %v3582_v12 = vld [vmem:[#allocation2 + $0x28] sm:$0xff]  ;;  %v486_v13 = vrot.slane %v3572_v4, 1  ;;  %2602 = vmatpush3.msra.mxu1 %v720_v9  ;;  %2549 = vmatprep.subr.mxu0 %v702_v10 }
  0xa2   : > { %v735_v14 = vld [vmem:[#allocation6 + $0x3b0] sm:$0xff]  ;;  %v686_v15 = vld [vmem:[#allocation6 + $0x228] sm:$0xff]  ;;  %1436 = vst [vmem:[#allocation2 + $0x2f] sm:$0x1] %v3234_v0  ;;  %v701_v18 = vld [vmem:[#allocation6 + $0x2a0] sm:$0xff]  ;;  %956 = vmatmul.mubr.f32.gmra.mxu1 %v3556_v46  ;;  %856 = vmatmul.mubr.f32.gmra.mxu0 %v3574_v7 }
  0xa3   : > { %v3586_v16 = vld [vmem:[#allocation2 + $0x30] sm:$0xff]  ;;  %469 = vst [vmem:[#allocation2 + $0x210] sm:$0xfe] %v460_v11  ;;  %510 = vst [vmem:[#allocation2 + $0x1e0] sm:$0xfe] %v460_v11  ;;  %v734_v21 = vld [vmem:[#allocation6 + $0x3a8] sm:$0xff]  ;;  %2603 = vmatprep.subr.mxu1 %v735_v14  ;;  %2550 = vmatpush3.msra.mxu0 %v686_v15 }
  0xa4   : > { %v719_v17 = vld [vmem:[#allocation6 + $0x330] sm:$0xff]  ;;  %1452 = vst [vmem:[#allocation2 + $0x30] sm:$0x1] %v3234_v0  ;;  %495 = vst [vmem:[#allocation2 + $0x220] sm:$0x7f] %v486_v13  ;;  %v3593_v22 = vld [vmem:[#allocation2 + $0x78] sm:$0xff]  ;;  %2551 = vmatprep.subr.mxu0 %v701_v18  ;;  %860 = vmatprep.mubr.f32.mxu0 %v3558_v47 }
  0xa5   : > { %v3590_v20 = vld [vmem:[#allocation2 + $0x70] sm:$0xff]  ;;  %535 = vst [vmem:[#allocation2 + $0x1f0] sm:$0x7f] %v486_v13  ;;  %v3595_v23 = vld [vmem:[#allocation2 + $0xb8] sm:$0xff]  ;;  %v602_v24 = vld [vmem:[#allocation2 + $0x1c8] sm:$0xff]  ;;  %2604 = vmatpush3.msra.mxu1 %v719_v17 }
  0xa6   : > { %1437 = vst [vmem:[#allocation2 + $0x77] sm:$0x1] %v3234_v0  ;;  %v3599_v25 = vld [vmem:[#allocation2 + $0x1f8] sm:$0xff]  ;;  %v3601_v26 = vld [vmem:[#allocation2 + $0x208] sm:$0xff]  ;;  %1453 = vst [vmem:[#allocation2 + $0x78] sm:$0x1] %v3234_v0  ;;  %2605 = vmatprep.subr.mxu1 %v734_v21  ;;  %960 = vmatprep.mubr.f32.mxu1 %v602_v24 }
  0xa7   : > { %1438 = vst [vmem:[#allocation2 + $0xbf] sm:$0x1] %v3234_v0  ;;  %1416 = vst [vmem:[#allocation2 + $0x1c8] sm:$0x1] %v3234_v0  ;;  %v685_v27 = vld [vmem:[#allocation6 + $0x220] sm:$0xff]  ;;  %v718_v29 = vld [vmem:[#allocation6 + $0x328] sm:$0xff]  ;;  %961 = vmatmul.mubr.f32.gmra.mxu1 %v3576_v8  ;;  %861 = vmatmul.mubr.f32.gmra.mxu0 %v3599_v25 }
  0xa8   : > { %1360 = vst [vmem:[#allocation2 + $0x1f8] sm:$0x1] %v3234_v0  ;;  %1398 = vst [vmem:[#allocation2 + $0x20f] sm:$0x1] %v3234_v0  ;;  %v3608_v30 = vld [vmem:[#allocation2 + $0xc0] sm:$0xff]  ;;  %v700_v31 = vld [vmem:[#allocation6 + $0x298] sm:$0xff]  ;;  %2552 = vmatpush3.msra.mxu0 %v685_v27  ;;  %2606 = vmatpush3.msra.mxu1 %v718_v29 }
  0xa9   : > { %1454 = vst [vmem:[#allocation2 + $0xc0] sm:$0x1] %v3234_v0  ;;  %v3611_v32 = vld [vmem:[#allocation2 + $0x100] sm:$0xff]  ;;  %v3613_v34 = vld [vmem:[#allocation2 + $0x108] sm:$0xff]  ;;  %v684_v36 = vld [vmem:[#allocation6 + $0x218] sm:$0xff]  ;;  %2553 = vmatprep.subr.mxu0 %v700_v31  ;;  %1035 = vmatprep.mubr.f32.mxu0 %v3582_v12 }
  0xaa   : > { %v733_v35 = vld [vmem:[#allocation6 + $0x3a0] sm:$0xff]  ;;  %1439 = vst [vmem:[#allocation2 + $0x107] sm:$0x1] %v3234_v0  ;;  %1455 = vst [vmem:[#allocation2 + $0x108] sm:$0x1] %v3234_v0  ;;  %v3617_v37 = vld [vmem:[#allocation2 + $0x148] sm:$0xff]  ;;  %2554 = vmatpush3.msra.mxu0 %v684_v36 }
  0xab   : > { %v717_v38 = vld [vmem:[#allocation6 + $0x320] sm:$0xff]  ;;  %1440 = vst [vmem:[#allocation2 + $0x14f] sm:$0x1] %v3234_v0  ;;  %v3621_v39 = vld [vmem:[#allocation2 + $0x150] sm:$0xff]  ;;  %v3627_v43 = vld [vmem:[#allocation2 + $0x198] sm:$0xff]  ;;  %2607 = vmatprep.subr.mxu1 %v733_v35 }
  0xac   : > { %v3623_v40 = vld [vmem:[#allocation2 + $0x190] sm:$0xff]  ;;  %1456 = vst [vmem:[#allocation2 + $0x150] sm:$0x1] %v3234_v0  ;;  %v732_v44 = vld [vmem:[#allocation6 + $0x398] sm:$0xff]  ;;  %1457 = vst [vmem:[#allocation2 + $0x198] sm:$0x1] %v3234_v0  ;;  %2608 = vmatpush3.msra.mxu1 %v717_v38 }
  0xad   : > { %v699_v41 = vld [vmem:[#allocation6 + $0x290] sm:$0xff]  ;;  %1441 = vst [vmem:[#allocation2 + $0x197] sm:$0x1] %v3234_v0  ;;  %v3633_v46 = vld [vmem:[#allocation2 + $0x1d8] sm:$0xff]  ;;  %v3636_v49 = vld [vmem:[#allocation2 + $0x1e0] sm:$0xff]  ;;  %2609 = vmatprep.subr.mxu1 %v732_v44 }
  0xae   : > { %v611_v42 = vld [vmem:[#allocation2 + $0x210] sm:$0xff]  ;;  %v716_v48 = vld [vmem:[#allocation6 + $0x318] sm:$0xff]  ;;  %1442 = vst [vmem:[#allocation2 + $0x1df] sm:$0x1] %v3234_v0  ;;  %v3638_v51 = vld [vmem:[#allocation2 + $0x220] sm:$0xff]  ;;  %2555 = vmatprep.subr.mxu0 %v699_v41 }
  0xaf   : > { %1417 = vst [vmem:[#allocation2 + $0x210] sm:$0x1] %v3234_v0  ;;  %v683_v45 = vld [vmem:[#allocation6 + $0x210] sm:$0xff]  ;;  %v698_v52 = vld [vmem:[#allocation6 + $0x288] sm:$0xff]  ;;  %1458 = vst [vmem:[#allocation2 + $0x1e0] sm:$0x1] %v3234_v0  ;;  %965 = vmatprep.mubr.f32.mxu1 %v611_v42  ;;  %2610 = vmatpush3.msra.mxu1 %v716_v48 }
  0xb0   : > { %v731_v53 = vld [vmem:[#allocation6 + $0x390] sm:$0xff]  ;;  %1443 = vst [vmem:[#allocation2 + $0x227] sm:$0x1] %v3234_v0  ;;  %v3642_v54 = vld [vmem:[#allocation2 + $0x228] sm:$0xff]  ;;  %v3647_v57 = vld [vmem:[#allocation2 + $0x40] sm:$0xff]  ;;  %2556 = vmatpush3.msra.mxu0 %v683_v45  ;;  %966 = vmatmul.mubr.f32.gmra.mxu1 %v3601_v26 }
  0xb1   : > { %v682_v55 = vld [vmem:[#allocation6 + $0x208] sm:$0xff]  ;;  %v3651_v59 = vld [vmem:[#allocation2 + $0xd0] sm:$0xff]  ;;  %v3658_v0 = vld [vmem:[#allocation2 + $0x118] sm:$0xff]  ;;  %2557 = vmatprep.subr.mxu0 %v698_v52  ;;  %2611 = vmatprep.subr.mxu1 %v731_v53 }
  0xb2   : > { %v3644_v56 = vld [vmem:[#allocation2 + $0x8] sm:$0xff]  ;;  %v3660_v60 = vld [vmem:[#allocation2 + $0x160] sm:$0xff]  ;;  %v715_v63 = vld [vmem:[#allocation6 + $0x310] sm:$0xff]  ;;  %2558 = vmatpush3.msra.mxu0 %v682_v55  ;;  %1140 = vmatprep.mubr.f32.mxu1 %v3493_v19 }
  0xb3   : > { %1451 = vst [vmem:[#allocation2 + $0x228] sm:$0xff] %v3644_v56  ;;  %v3649_v58 = vld [vmem:[#allocation2 + $0x88] sm:$0xff]  ;;  %1476 = vst [vmem:[#allocation2 + $0x47] sm:$0x1] %v3644_v56  ;;  %v3667_v1 = vld [vmem:[#allocation2 + $0x1f0] sm:$0xff]  ;;  %2612 = vmatpush3.msra.mxu1 %v715_v63 }
  0xb4   : > { %1459 = vst [vmem:[#allocation2 + $0x228] sm:$0x1] %v3644_v56  ;;  %1477 = vst [vmem:[#allocation2 + $0x8f] sm:$0x1] %v3644_v56  ;;  %v3662_v61 = vld [vmem:[#allocation2 + $0x1a8] sm:$0xff]  ;;  %v3669_v62 = vld [vmem:[#allocation2 + $0x238] sm:$0xff] }
  0xb5   : > { %1478 = vst [vmem:[#allocation2 + $0xd7] sm:$0x1] %v3644_v56  ;;  %1479 = vst [vmem:[#allocation2 + $0x11f] sm:$0x1] %v3644_v56  ;;  %v697_v2 = vld [vmem:[#allocation6 + $0x280] sm:$0xff]  ;;  %v730_v5 = vld [vmem:[#allocation6 + $0x388] sm:$0xff] }
  0xb6   : > { %1480 = vst [vmem:[#allocation2 + $0x167] sm:$0x1] %v3644_v56  ;;  %1481 = vst [vmem:[#allocation2 + $0x1af] sm:$0x1] %v3644_v56  ;;  %v681_v7 = vld [vmem:[#allocation6 + $0x200] sm:$0xff]  ;;  %v714_v8 = vld [vmem:[#allocation6 + $0x308] sm:$0xff]  ;;  %2559 = vmatprep.subr.mxu0 %v697_v2  ;;  %2613 = vmatprep.subr.mxu1 %v730_v5 }
  0xb7   : > { %1482 = vst [vmem:[#allocation2 + $0x1f7] sm:$0x1] %v3644_v56  ;;  %1475 = vst [vmem:[#allocation2 + $0x238] sm:$0xff] %v3644_v56  ;;  %v729_v9 = vld [vmem:[#allocation6 + $0x380] sm:$0xff]  ;;  %v760_v10 = vld [vmem:[#allocation6 + $0x478] sm:$0xff]  ;;  %2560 = vmatpush3.msra.mxu0 %v681_v7  ;;  %2614 = vmatpush3.msra.mxu1 %v714_v8 }
  0xb8   : > { %1483 = vst [vmem:[#allocation2 + $0x23f] sm:$0x1] %v3644_v56  ;;  %v713_v11 = vld [vmem:[#allocation6 + $0x300] sm:$0xff]  ;;  %1036 = vmatmul.mubr.f32.vlgmr.msra.gmra.mxu0 %v3485_v3  ;;  %2615 = vmatprep.subr.mxu1 %v729_v9  ;;  %v759_v13 = vld [vmem:[#allocation6 + $0x470] sm:$0xff]  ;;  %v758_v14 = vld [vmem:[#allocation6 + $0x468] sm:$0xff] }
  0xb9   : > { %2913 = vmatprep.subr.mxu0 %v760_v10  ;;  %2616 = vmatpush3.msra.mxu1 %v713_v11  ;;  %v757_v12 = vld [vmem:[#allocation6 + $0x460] sm:$0xff]  ;;  %v756_v3 = vld [vmem:[#allocation6 + $0x458] sm:$0xff]  ;;  %v755_v15 = vld [vmem:[#allocation6 + $0x450] sm:$0xff] }
  0xba   : > { %2914 = vmatpush3.msra.mxu0 %v760_v10  ;;  %1141 = vmatmul.mubr.f32.vlgmr.msra.gmra.mxu1 %v3586_v16  ;;  %v754_v16 = vld [vmem:[#allocation6 + $0x448] sm:$0xff]  ;;  %v752_v17 = vld [vmem:[#allocation6 + $0x438] sm:$0xff]  ;;  %v1584_v26 = vld [vmem:[#allocation8 + $0xe0] sm:$0xff] }
  0xbb   : > { %2915 = vmatprep.subr.mxu0 %v759_v13  ;;  %1040 = vmatprep.mubr.f32.mxu0 %v3590_v20  ;;  %v750_v18 = vld [vmem:[#allocation6 + $0x428] sm:$0xff]  ;;  %v748_v20 = vld [vmem:[#allocation6 + $0x418] sm:$0xff]  ;;  %v1568_v27 = vld [vmem:[#allocation8 + $0x60] sm:$0xff] }
  0xbc   : > { %2916 = vmatpush3.msra.mxu0 %v759_v13  ;;  %1145 = vmatprep.mubr.f32.mxu1 %v3501_v33  ;;  %v746_v21 = vld [vmem:[#allocation6 + $0x408] sm:$0xff]  ;;  %v1583_v29 = vld [vmem:[#allocation8 + $0xd8] sm:$0xff]  ;;  %v1582_v31 = vld [vmem:[#allocation8 + $0xd0] sm:$0xff] }
  0xbd   : > { %1041 = vmatmul.mubr.f32.gmra.mxu0 %v3493_v19  ;;  %2917 = vmatprep.subr.mxu0 %v758_v14  ;;  %v753_v19 = vld [vmem:[#allocation6 + $0x440] sm:$0xff]  ;;  %v1585_v24 = vld [vmem:[#allocation8 + $0xe8] sm:$0xff]  ;;  %v1603_v36 = vld [vmem:[#allocation8 + $0x178] sm:$0xff] }
  0xbe   : > { %2918 = vmatpush3.msra.mxu0 %v758_v14  ;;  %1146 = vmatmul.mubr.f32.gmra.mxu1 %v3593_v22  ;;  %v1586_v22 = vld [vmem:[#allocation8 + $0xf0] sm:$0xff]  ;;  %v1569_v25 = vld [vmem:[#allocation8 + $0x68] sm:$0xff]  ;;  %v1564_v41 = vld [vmem:[#allocation8 + $0x40] sm:$0xff] }
  0xbf   : > { %2919 = vmatprep.subr.mxu0 %v757_v12  ;;  %1045 = vmatprep.mubr.f32.mxu0 %v3595_v23  ;;  %v1570_v23 = vld [vmem:[#allocation8 + $0x70] sm:$0xff]  ;;  %v1581_v35 = vld [vmem:[#allocation8 + $0xc8] sm:$0xff]  ;;  %v1563_v45 = vld [vmem:[#allocation8 + $0x38] sm:$0xff] }
  0xc0   : > { %2920 = vmatpush3.msra.mxu0 %v757_v12  ;;  %1150 = vmatprep.mubr.f32.mxu1 %v3511_v50  ;;  %v1618_v38 = vld [vmem:[#allocation8 + $0x1f0] sm:$0xff]  ;;  %v1617_v42 = vld [vmem:[#allocation8 + $0x1e8] sm:$0xff]  ;;  %v1615_v52 = vld [vmem:[#allocation8 + $0x1d8] sm:$0xff] }
  0xc1   : > { %1046 = vmatmul.mubr.f32.gmra.mxu0 %v3501_v33  ;;  %2921 = vmatprep.subr.mxu0 %v756_v3  ;;  %v751_v33 = vld [vmem:[#allocation6 + $0x430] sm:$0xff]  ;;  %v1601_v44 = vld [vmem:[#allocation8 + $0x168] sm:$0xff]  ;;  %v1612_v63 = vld [vmem:[#allocation8 + $0x1c0] sm:$0xff] }
  0xc2   : > { %2922 = vmatpush3.msra.mxu0 %v756_v3  ;;  %1151 = vmatmul.mubr.f32.gmra.mxu1 %v3608_v30  ;;  %v1567_v30 = vld [vmem:[#allocation8 + $0x58] sm:$0xff]  ;;  %v1578_v48 = vld [vmem:[#allocation8 + $0xb0] sm:$0xff]  ;;  %v1577_v53 = vld [vmem:[#allocation8 + $0xa8] sm:$0xff] }
  0xc3   : > { %2923 = vmatprep.subr.mxu0 %v755_v15  ;;  %1050 = vmatprep.mubr.f32.mxu0 %v3611_v32  ;;  %v1566_v32 = vld [vmem:[#allocation8 + $0x50] sm:$0xff]  ;;  %v1561_v55 = vld [vmem:[#allocation8 + $0x28] sm:$0xff]  ;;  %v1611_v7 = vld [vmem:[#allocation8 + $0x1b8] sm:$0xff] }
  0xc4   : > { %2924 = vmatpush3.msra.mxu0 %v755_v15  ;;  %1155 = vmatprep.mubr.f32.mxu1 %v3526_v6  ;;  %v1574_v2 = vld [vmem:[#allocation8 + $0x90] sm:$0xff]  ;;  %v1573_v8 = vld [vmem:[#allocation8 + $0x88] sm:$0xff]  ;;  %v1595_v9 = vld [vmem:[#allocation8 + $0x138] sm:$0xff] }
  0xc5   : > { %1051 = vmatmul.mubr.f32.gmra.mxu0 %v3511_v50  ;;  %2925 = vmatprep.subr.mxu0 %v754_v16  ;;  %v749_v50 = vld [vmem:[#allocation6 + $0x420] sm:$0xff]  ;;  %v1558_v5 = vld [vmem:[#allocation8 + $0x10] sm:$0xff]  ;;  %v1557_v10 = vld [vmem:[#allocation8 + $0x8] sm:$0xff] }
  0xc6   : > { %2926 = vmatpush3.msra.mxu0 %v754_v16  ;;  %1156 = vmatmul.mubr.f32.gmra.mxu1 %v3613_v34  ;;  %v1619_v34 = vld [vmem:[#allocation8 + $0x1f8] sm:$0xff]  ;;  %v1610_v11 = vld [vmem:[#allocation8 + $0x1b0] sm:$0xff]  ;;  %v1572_v13 = vld [vmem:[#allocation8 + $0x80] sm:$0xff] }
  0xc7   : > { %2927 = vmatprep.subr.mxu0 %v753_v19  ;;  %1055 = vmatprep.mubr.f32.mxu0 %v3617_v37  ;;  %v1565_v37 = vld [vmem:[#allocation8 + $0x48] sm:$0xff]  ;;  %v1594_v14 = vld [vmem:[#allocation8 + $0x130] sm:$0xff]  ;;  %v1556_v12 = vld [vmem:[#allocation8] sm:$0xff] }
  0xc8   : > { %2928 = vmatpush3.msra.mxu0 %v753_v19  ;;  %1160 = vmatprep.mubr.f32.mxu1 %v3542_v28  ;;  %v1609_v3 = vld [vmem:[#allocation8 + $0x1a8] sm:$0xff]  ;;  %v1484_v15 = vld [vmem:[#allocation2] sm:$0xff] }
  0xc9   : > { %1056 = vmatmul.mubr.f32.gmra.mxu0 %v3526_v6  ;;  %2929 = vmatprep.subr.mxu0 %v752_v17  ;;  %v747_v6 = vld [vmem:[#allocation6 + $0x410] sm:$0xff]  ;;  %v1593_v16 = vld [vmem:[#allocation8 + $0x128] sm:$0xff]  ;;  %v1608_v19 = vld [vmem:[#allocation8 + $0x1a0] sm:$0xff] }
  0xca   : > { %2930 = vmatpush3.msra.mxu0 %v752_v17  ;;  %1161 = vmatmul.mubr.f32.gmra.mxu1 %v3621_v39  ;;  %v1580_v39 = vld [vmem:[#allocation8 + $0xc0] sm:$0xff] }
  0xcb   : > { %2931 = vmatprep.subr.mxu0 %v751_v33  ;;  %1060 = vmatprep.mubr.f32.mxu0 %v3623_v40  ;;  %v1602_v40 = vld [vmem:[#allocation8 + $0x170] sm:$0xff]  ;;  %v1592_v17 = vld [vmem:[#allocation8 + $0x120] sm:$0xff] }
  0xcc   : > { %2932 = vmatpush3.msra.mxu0 %v751_v33  ;;  %1165 = vmatprep.mubr.f32.mxu1 %v3558_v47  ;;  %v1607_v33 = vld [vmem:[#allocation8 + $0x198] sm:$0xff] }
  0xcd   : > { %1061 = vmatmul.mubr.f32.gmra.mxu0 %v3542_v28  ;;  %2933 = vmatprep.subr.mxu0 %v750_v18  ;;  %v745_v28 = vld [vmem:[#allocation6 + $0x400] sm:$0xff] }
  0xce   : > { %2934 = vmatpush3.msra.mxu0 %v750_v18  ;;  %1166 = vmatmul.mubr.f32.gmra.mxu1 %v3627_v43  ;;  %v1579_v43 = vld [vmem:[#allocation8 + $0xb8] sm:$0xff] }
  0xcf   : > { %2935 = vmatprep.subr.mxu0 %v749_v50  ;;  %1065 = vmatprep.mubr.f32.mxu0 %v3633_v46  ;;  %v1616_v46 = vld [vmem:[#allocation8 + $0x1e0] sm:$0xff]  ;;  %v1591_v18 = vld [vmem:[#allocation8 + $0x118] sm:$0xff] }
  0xd0   : > { %2936 = vmatpush3.msra.mxu0 %v749_v50  ;;  %1170 = vmatprep.mubr.f32.mxu1 %v3572_v4  ;;  %v1606_v50 = vld [vmem:[#allocation8 + $0x190] sm:$0xff] }
  0xd1   : > { %1066 = vmatmul.mubr.f32.gmra.mxu0 %v3558_v47  ;;  %2937 = vmatprep.subr.mxu0 %v748_v20  ;;  %v1587_v47 = vld [vmem:[#allocation8 + $0xf8] sm:$0xff] }
  0xd2   : > { %2938 = vmatpush3.msra.mxu0 %v748_v20  ;;  %1171 = vmatmul.mubr.f32.gmra.mxu1 %v3636_v49  ;;  %v1600_v49 = vld [vmem:[#allocation8 + $0x160] sm:$0xff]  ;;  %v1590_v20 = vld [vmem:[#allocation8 + $0x110] sm:$0xff] }
  0xd3   : > { %2939 = vmatprep.subr.mxu0 %v747_v6  ;;  %1070 = vmatprep.mubr.f32.mxu0 %v3638_v51  ;;  %v1562_v51 = vld [vmem:[#allocation8 + $0x30] sm:$0xff] }
  0xd4   : > { %2940 = vmatpush3.msra.mxu0 %v747_v6  ;;  %1175 = vmatprep.mubr.f32.mxu1 %v3644_v56  ;;  %v1651_v6 = vld [vmem:[#allocation8 + $0x2f8] sm:$0xff] }
  0xd5   : > { %1071 = vmatmul.mubr.f32.gmra.mxu0 %v3572_v4  ;;  %2941 = vmatprep.subr.mxu0 %v746_v21  ;;  %v1571_v4 = vld [vmem:[#allocation8 + $0x78] sm:$0xff] }
  0xd6   : > { %2942 = vmatpush3.msra.mxu0 %v746_v21  ;;  %1176 = vmatmul.mubr.f32.gmra.mxu1 %v3642_v54  ;;  %v1599_v54 = vld [vmem:[#allocation8 + $0x158] sm:$0xff]  ;;  %v1605_v21 = vld [vmem:[#allocation8 + $0x188] sm:$0xff] }
  0xd7   : > { %2943 = vmatprep.subr.mxu0 %v745_v28  ;;  %2945 = vmatprep.mubr.f32.mxu0 %v3647_v57  ;;  %v1598_v57 = vld [vmem:[#allocation8 + $0x150] sm:$0xff] }
  0xd8   : > { %2944 = vmatpush3.msra.mxu0 %v745_v28  ;;  %1764 = vmatprep.mubr.f32.mxu1 %v3644_v56  ;;  %v1614_v56 = vld [vmem:[#allocation8 + $0x1d0] sm:$0xff]  ;;  %v1635_v28 = vld [vmem:[#allocation8 + $0x278] sm:$0xff] }
  0xd9   : > { %2946 = vmatmul.mubr.f32.vlgmr.msra.gmra.mxu0 %v3649_v58  ;;  %2665 = vmatprep.subr.mxu1 %v1587_v47  ;;  %v1576_v58 = vld [vmem:[#allocation8 + $0xa0] sm:$0xff]  ;;  %v1589_v47 = vld [vmem:[#allocation8 + $0x108] sm:$0xff] }
  0xda   : > { %2948 = vmatprep.mubr.f32.mxu0 %v3651_v59  ;;  %2666 = vmatpush3.msra.mxu1 %v1571_v4  ;;  %v1613_v59 = vld [vmem:[#allocation8 + $0x1c8] sm:$0xff]  ;;  %v1650_v4 = vld [vmem:[#allocation8 + $0x2f0] sm:$0xff] }
  0xdb   : > { %2667 = vmatprep.subr.mxu1 %v1586_v22  ;;  %2721 = vmatprep.subr.mxu0 %v1619_v34  ;;  %v1604_v22 = vld [vmem:[#allocation8 + $0x180] sm:$0xff]  ;;  %v1646_v34 = vld [vmem:[#allocation8 + $0x2d0] sm:$0xff] }
  0xdc   : > { %2668 = vmatpush3.msra.mxu1 %v1570_v23  ;;  %2722 = vmatpush3.msra.mxu0 %v1603_v36  ;;  %v1634_v23 = vld [vmem:[#allocation8 + $0x270] sm:$0xff]  ;;  %v1645_v36 = vld [vmem:[#allocation8 + $0x2c8] sm:$0xff] }
  0xdd   : > { %2949 = vmatmul.mubr.f32.gmra.mxu0 %v3658_v0  ;;  %2669 = vmatprep.subr.mxu1 %v1585_v24  ;;  %v1560_v0 = vld [vmem:[#allocation8 + $0x20] sm:$0xff] }
  0xde   : > { %2951 = vmatprep.mubr.f32.mxu0 %v3660_v60  ;;  %2670 = vmatpush3.msra.mxu1 %v1569_v25  ;;  %v1597_v60 = vld [vmem:[#allocation8 + $0x148] sm:$0xff]  ;;  %v1588_v24 = vld [vmem:[#allocation8 + $0x100] sm:$0xff] }
  0xdf   : > { %2671 = vmatprep.subr.mxu1 %v1584_v26  ;;  %2723 = vmatprep.subr.mxu0 %v1618_v38  ;;  %v1649_v25 = vld [vmem:[#allocation8 + $0x2e8] sm:$0xff]  ;;  %v1644_v38 = vld [vmem:[#allocation8 + $0x2c0] sm:$0xff] }
  0xe0   : > { %2672 = vmatpush3.msra.mxu1 %v1568_v27  ;;  %2724 = vmatpush3.msra.mxu0 %v1602_v40  ;;  %v1633_v26 = vld [vmem:[#allocation8 + $0x268] sm:$0xff]  ;;  %v1683_v27 = vld [vmem:[#allocation8 + $0x3f8] sm:$0xff] }
  0xe1   : > { %2952 = vmatmul.mubr.f32.gmra.mxu0 %v3662_v61  ;;  %2673 = vmatprep.subr.mxu1 %v1583_v29  ;;  %v1575_v61 = vld [vmem:[#allocation8 + $0x98] sm:$0xff]  ;;  %v1648_v29 = vld [vmem:[#allocation8 + $0x2e0] sm:$0xff] }
  0xe2   : > { %2954 = vmatprep.mubr.f32.mxu0 %v3667_v1  ;;  %2674 = vmatpush3.msra.mxu1 %v1567_v30  ;;  %v1559_v1 = vld [vmem:[#allocation8 + $0x18] sm:$0xff]  ;;  %v1632_v30 = vld [vmem:[#allocation8 + $0x260] sm:$0xff] }
  0xe3   : > { %2675 = vmatprep.subr.mxu1 %v1582_v31  ;;  %2725 = vmatprep.subr.mxu0 %v1617_v42  ;;  %v1647_v31 = vld [vmem:[#allocation8 + $0x2d8] sm:$0xff]  ;;  %v1642_v42 = vld [vmem:[#allocation8 + $0x2b0] sm:$0xff] }
  0xe4   : > { %2676 = vmatpush3.msra.mxu1 %v1566_v32  ;;  %2726 = vmatpush3.msra.mxu0 %v1601_v44  ;;  %v1631_v32 = vld [vmem:[#allocation8 + $0x258] sm:$0xff]  ;;  %v1641_v44 = vld [vmem:[#allocation8 + $0x2a8] sm:$0xff] }
  0xe5   : > { %2955 = vmatmul.mubr.f32.gmra.mxu0 %v3669_v62  ;;  %2677 = vmatprep.subr.mxu1 %v1581_v35  ;;  %v1596_v62 = vld [vmem:[#allocation8 + $0x140] sm:$0xff]  ;;  %v1630_v35 = vld [vmem:[#allocation8 + $0x250] sm:$0xff]  ;;  %v1643_v40 = vld [vmem:[#allocation8 + $0x2b8] sm:$0xff] }
  0xe6   : > { %2678 = vmatpush3.msra.mxu1 %v1565_v37  ;;  %2727 = vmatprep.subr.mxu0 %v1616_v46  ;;  %v1629_v37 = vld [vmem:[#allocation8 + $0x248] sm:$0xff]  ;;  %v1640_v46 = vld [vmem:[#allocation8 + $0x2a0] sm:$0xff] }
  0xe7   : > { %2679 = vmatprep.subr.mxu1 %v1580_v39  ;;  %2728 = vmatpush3.msra.mxu0 %v1600_v49  ;;  %v1628_v39 = vld [vmem:[#allocation8 + $0x240] sm:$0xff]  ;;  %v1639_v49 = vld [vmem:[#allocation8 + $0x298] sm:$0xff] }
  0xe8   : > { %2680 = vmatpush3.msra.mxu1 %v1564_v41  ;;  %2729 = vmatprep.subr.mxu0 %v1615_v52  ;;  %v1627_v41 = vld [vmem:[#allocation8 + $0x238] sm:$0xff]  ;;  %v1638_v52 = vld [vmem:[#allocation8 + $0x290] sm:$0xff] }
  0xe9   : > { %2681 = vmatprep.subr.mxu1 %v1579_v43  ;;  %2730 = vmatpush3.msra.mxu0 %v1599_v54  ;;  %v1626_v43 = vld [vmem:[#allocation8 + $0x230] sm:$0xff]  ;;  %v1637_v54 = vld [vmem:[#allocation8 + $0x288] sm:$0xff] }
  0xea   : > { %2682 = vmatpush3.msra.mxu1 %v1563_v45  ;;  %2731 = vmatprep.subr.mxu0 %v1614_v56  ;;  %v1625_v45 = vld [vmem:[#allocation8 + $0x228] sm:$0xff] }
  0xeb   : > { %2683 = vmatprep.subr.mxu1 %v1578_v48  ;;  %2732 = vmatpush3.msra.mxu0 %v1598_v57  ;;  %v1624_v48 = vld [vmem:[#allocation8 + $0x220] sm:$0xff] }
  0xec   : > { %2684 = vmatpush3.msra.mxu1 %v1562_v51  ;;  %2733 = vmatprep.subr.mxu0 %v1613_v59  ;;  %v1623_v51 = vld [vmem:[#allocation8 + $0x218] sm:$0xff]  ;;  %v1636_v57 = vld [vmem:[#allocation8 + $0x280] sm:$0xff] }
  0xed   : > { %2685 = vmatprep.subr.mxu1 %v1577_v53  ;;  %2734 = vmatpush3.msra.mxu0 %v1597_v60  ;;  %v1622_v53 = vld [vmem:[#allocation8 + $0x210] sm:$0xff] }
  0xee   : > { %2686 = vmatpush3.msra.mxu1 %v1561_v55  ;;  %2735 = vmatprep.subr.mxu0 %v1612_v63  ;;  %v1621_v55 = vld [vmem:[#allocation8 + $0x208] sm:$0xff] }
  0xef   : > { %2687 = vmatprep.subr.mxu1 %v1576_v58  ;;  %2736 = vmatpush3.msra.mxu0 %v1596_v62  ;;  %v1620_v58 = vld [vmem:[#allocation8 + $0x200] sm:$0xff] }
  0xf0   : > { %2688 = vmatpush3.msra.mxu1 %v1560_v0  ;;  %2737 = vmatprep.subr.mxu0 %v1611_v7  ;;  %v3719_v0 = vld [vmem:[#allocation8 + $0x478] sm:$0xff] }
  0xf1   : > { %2689 = vmatprep.subr.mxu1 %v1575_v61  ;;  %2738 = vmatpush3.msra.mxu0 %v1595_v9  ;;  %3968 = vst [vmem:[#allocation13_spill] sm:$0xff] %v3719_v0 }
  0xf2   : > { %2690 = vmatpush3.msra.mxu1 %v1559_v1  ;;  %2739 = vmatprep.subr.mxu0 %v1610_v11 }
  0xf3   : > { %2691 = vmatprep.subr.mxu1 %v1574_v2  ;;  %2740 = vmatpush3.msra.mxu0 %v1594_v14 }
  0xf4   : > { %2692 = vmatpush3.msra.mxu1 %v1558_v5  ;;  %2741 = vmatprep.subr.mxu0 %v1609_v3 }
  0xf5   : > { %2693 = vmatprep.subr.mxu1 %v1573_v8  ;;  %2742 = vmatpush3.msra.mxu0 %v1593_v16 }
  0xf6   : > { %2694 = vmatpush3.msra.mxu1 %v1557_v10  ;;  %2743 = vmatprep.subr.mxu0 %v1608_v19 }
  0xf7   : > { %2695 = vmatprep.subr.mxu1 %v1572_v13  ;;  %2744 = vmatpush3.msra.mxu0 %v1592_v17 }
  0xf8   : > { %2696 = vmatpush3.msra.mxu1 %v1556_v12  ;;  %2745 = vmatprep.subr.mxu0 %v1607_v33 }
  0xf9   : > { %1765 = vmatmul.mubr.f32.vlgmr.msra.gmra.mxu1 %v1484_v15  ;;  %2746 = vmatpush3.msra.mxu0 %v1591_v18 }
  0xfa   : > { %2747 = vmatprep.subr.mxu0 %v1606_v50  ;;  %2777 = vmatprep.subr.mxu1 %v1651_v6 }
  0xfb   : > { %2748 = vmatpush3.msra.mxu0 %v1590_v20  ;;  %2778 = vmatpush3.msra.mxu1 %v1635_v28 }
  0xfc   : > { %2749 = vmatprep.subr.mxu0 %v1605_v21  ;;  %2779 = vmatprep.subr.mxu1 %v1650_v4 }
  0xfd   : > { %2750 = vmatpush3.msra.mxu0 %v1589_v47  ;;  %2780 = vmatpush3.msra.mxu1 %v1634_v23 }
  0xfe   : > { %2751 = vmatprep.subr.mxu0 %v1604_v22  ;;  %2781 = vmatprep.subr.mxu1 %v1649_v25 }
  0xff   : > { %2752 = vmatpush3.msra.mxu0 %v1588_v24  ;;  %2782 = vmatpush3.msra.mxu1 %v1633_v26 }
 0x100   : > { %2833 = vmatprep.subr.mxu0 %v1683_v27  ;;  %2783 = vmatprep.subr.mxu1 %v1648_v29 }
 0x101   : > { %2784 = vmatpush3.msra.mxu1 %v1632_v30 }
 0x102   : > { %2785 = vmatprep.subr.mxu1 %v1647_v31 }
 0x103   : > { %2786 = vmatpush3.msra.mxu1 %v1631_v32 }
 0x104   : > { %2787 = vmatprep.subr.mxu1 %v1646_v34 }
 0x105   : > { %2788 = vmatpush3.msra.mxu1 %v1630_v35 }
 0x106   : > { %2789 = vmatprep.subr.mxu1 %v1645_v36 }
 0x107   : > { %2790 = vmatpush3.msra.mxu1 %v1629_v37 }
 0x108   : > { %2791 = vmatprep.subr.mxu1 %v1644_v38 }
 0x109   : > { %2792 = vmatpush3.msra.mxu1 %v1628_v39 }
 0x10a   : > { %2793 = vmatprep.subr.mxu1 %v1643_v40 }
 0x10b   : > { %2794 = vmatpush3.msra.mxu1 %v1627_v41 }
 0x10c   : > { %2795 = vmatprep.subr.mxu1 %v1642_v42 }
 0x10d   : > { %2796 = vmatpush3.msra.mxu1 %v1626_v43 }
 0x10e   : > { %2797 = vmatprep.subr.mxu1 %v1641_v44 }
 0x10f   : > { %2798 = vmatpush3.msra.mxu1 %v1625_v45 }
 0x110   : > { %2799 = vmatprep.subr.mxu1 %v1640_v46 }
 0x111   : > { %2800 = vmatpush3.msra.mxu1 %v1624_v48 }
 0x112   : > { %2801 = vmatprep.subr.mxu1 %v1639_v49 }
 0x113   : > { %2802 = vmatpush3.msra.mxu1 %v1623_v51 }
 0x114   : > { %2803 = vmatprep.subr.mxu1 %v1638_v52 }
 0x115   : > { %2804 = vmatpush3.msra.mxu1 %v1622_v53 }
 0x116   : > { %2805 = vmatprep.subr.mxu1 %v1637_v54 }
 0x117   : > { %2806 = vmatpush3.msra.mxu1 %v1621_v55 }
 0x118   : > { %2807 = vmatprep.subr.mxu1 %v1636_v57 }
 0x119   : > { %2808 = vmatpush3.msra.mxu1 %v1620_v58 }
 0x11a   : > { %2957 = vmatprep.subr.mxu1 %v3719_v0 }
 0x13d   : > { %v3717_v56 = vpop.f32.mrf.mxu0 }
 0x13f   : > { %v2450_v59 = vpop.f32.mrf.mxu0 }
 0x140   : > { %v2451_v51 = vadd.f32 %v2450_v59, %v3717_v56 }
 0x146   : > { %v2452_v60 = vpop.f32.mrf.mxu0 }
 0x147   : > { %v2505_v61 = vpop.f32.mrf.mxu1 }
 0x148   : > { %v2453_v1 = vpop.f32.mrf.mxu0 }
 0x149   : > { %v2506_v63 = vpop.f32.mrf.mxu1  ;;  %v2454_v46 = vadd.f32 %v2453_v1, %v2452_v60 }
 0x14a   : > { %v2507_v52 = vadd.f32 %v2506_v63, %v2505_v61 }
 0x14b   : > { %v2508_v62 = vpop.f32.mrf.mxu1 }
 0x14d   : > { %v2509_v2 = vpop.f32.mrf.mxu1  ;;  %v2455_v5 = vpop.f32.mrf.mxu0 }
 0x14e   : > { %v2510_v48 = vadd.f32 %v2509_v2, %v2508_v62 }
 0x14f   : > { %v2511_v7 = vpop.f32.mrf.mxu1  ;;  %v2456_v8 = vpop.f32.mrf.mxu0 }
 0x150   : > { %v938_v58 = vadd.f32 %v2510_v48, %v2454_v46  ;;  %v2457_v1 = vadd.f32 %v2456_v8, %v2455_v5 }
 0x151   : > { %v2512_v9 = vpop.f32.mrf.mxu1  ;;  %v2458_v10 = vpop.f32.mrf.mxu0 }
 0x152   : > { %v2513_v2 = vadd.f32 %v2512_v9, %v2511_v7 }
 0x153   : > { %v2459_v13 = vpop.f32.mrf.mxu0 }
 0x154   : > { %v2460_v0 = vadd.f32 %v2459_v13, %v2458_v10 }
 0x155   : > { %v2514_v11 = vpop.f32.mrf.mxu1 }
 0x156   : > { %v2461_v12 = vpop.f32.mrf.mxu0 }
 0x157   : > { %v2515_v14 = vpop.f32.mrf.mxu1 }
 0x158   : > { %v2462_v15 = vpop.f32.mrf.mxu0 }
 0x159   : > { %v2463_v63 = vadd.f32 %v2462_v15, %v2461_v12 }
 0x15a   : > { %v2517_v3 = vpop.f32.mrf.mxu1 }
 0x15b   : > { %v2464_v19 = vpop.f32.mrf.mxu0 }
 0x15c   : > { %v2518_v16 = vpop.f32.mrf.mxu1 }
 0x15d   : > { %v2465_v33 = vpop.f32.mrf.mxu0 }
 0x162   : > { %v2520_v17 = vpop.f32.mrf.mxu1  ;;  %v3722_v50 = vpop.f32.mrf.mxu0 }
 0x163   : > { %3969 = vst [vmem:[#allocation14_spill] sm:$0xff] %v3722_v50  ;;  %v933_v50 = vadd.f32 %v2507_v52, %v2451_v51  ;;  %v943_v51 = vadd.f32 %v2513_v2, %v2457_v1 }
 0x164   : > { %v2521_v18 = vpop.f32.mrf.mxu1  ;;  %v3726_v6 = vpop.f32.mrf.mxu0 }
 0x165   : > { %3971 = vst [vmem:[#allocation16_spill] sm:$0xff] %v3726_v6  ;;  %v2522_v46 = vadd.f32 %v2521_v18, %v2520_v17 }
 0x167   : > { %v3724_v20 = vpop.f32.mrf.mxu1  ;;  %v2470_v28 = vpop.f32.mrf.mxu0 }
 0x168   : > { %3970 = vst [vmem:[#allocation15_spill] sm:$0xff] %v3724_v20 }
 0x169   : > { %v3728_v21 = vpop.f32.mrf.mxu1  ;;  %v2471_v4 = vpop.f32.mrf.mxu0 }
 0x16a   : > { %3972 = vst [vmem:[#allocation17_spill] sm:$0xff] %v3728_v21  ;;  %v2516_v21 = vadd.f32 %v2515_v14, %v2514_v11 }
 0x16c   : > { %v948_v10 = vadd.f32 %v2516_v21, %v2460_v0  ;;  %v3736_v0 = vld [vmem:[%s3944_s2] ss:$0 sm:$0xff]  ;;  %v3975_v18 = vld [vmem:[#allocation16_spill] sm:$0xff] }
 0x170   : > { %v2526_v47 = vpop.f32.mrf.mxu1 }
 0x171   : > { %v3977_v21 = vld [vmem:[#allocation17_spill] sm:$0xff] }
 0x172   : > { %v2527_v23 = vpop.f32.mrf.mxu1 }
 0x178   : > { %v2561_v22 = vpop.f32.mrf.mxu0 }
 0x17a   : > { %v2562_v24 = vpop.f32.mrf.mxu0  ;;  %v2617_v25 = vpop.f32.mrf.mxu1 }
 0x17b   : > { %v2563_v20 = vadd.f32 %v2562_v24, %v2561_v22  ;;  %v2472_v22 = vadd.f32 %v2471_v4, %v2470_v28  ;;  %v2528_v24 = vadd.f32 %v2527_v23, %v2526_v47  ;;  %v3745_v23 = vld [vmem:[%s3945_s3] ss:$0 sm:$0xff] }
 0x17c   : > { %v2618_v26 = vpop.f32.mrf.mxu1 }
 0x17d   : > { %v2564_v27 = vpop.f32.mrf.mxu0  ;;  %v1038_v13 = vadd.f32 %v2563_v20, %v933_v50  ;;  %v2619_v11 = vadd.f32 %v2618_v26, %v2617_v25  ;;  %v3976_v20 = vld [vmem:[#allocation15_spill] sm:$0xff]  ;;  %v968_v47 = vadd.f32 %v2528_v24, %v2472_v22 }
 0x17e   : > { %v2620_v29 = vpop.f32.mrf.mxu1  ;;  %v2525_v28 = vadd.f32 %v3977_v21, %v3976_v20 }
 0x17f   : > { %v2565_v30 = vpop.f32.mrf.mxu0  ;;  %v1143_v17 = vadd.f32 %v2619_v11, %v1038_v13 }
 0x180   : > { %v2621_v31 = vpop.f32.mrf.mxu1  ;;  %v2566_v54 = vadd.f32 %v2565_v30, %v2564_v27  ;;  %v2519_v27 = vadd.f32 %v2518_v16, %v2517_v3  ;;  %v2466_v30 = vadd.f32 %v2465_v33, %v2464_v19  ;;  %v3974_v33 = vld [vmem:[#allocation14_spill] sm:$0xff] }
 0x181   : > { %v2567_v32 = vpop.f32.mrf.mxu0  ;;  %v2622_v56 = vadd.f32 %v2621_v31, %v2620_v29  ;;  %v2469_v50 = vadd.f32 %v3975_v18, %v3974_v33 }
 0x182   : > { %v2623_v34 = vpop.f32.mrf.mxu1  ;;  %v1043_v62 = vadd.f32 %v2566_v54, %v938_v58  ;;  %v953_v29 = vadd.f32 %v2519_v27, %v2463_v63  ;;  %v958_v31 = vadd.f32 %v2522_v46, %v2466_v30 }
 0x183   : > { %v2568_v35 = vpop.f32.mrf.mxu0  ;;  %v963_v54 = vadd.f32 %v2525_v28, %v2469_v50 }
 0x184   : > { %v2624_v36 = vpop.f32.mrf.mxu1  ;;  %v2569_v14 = vadd.f32 %v2568_v35, %v2567_v32  ;;  %v1148_v9 = vadd.f32 %v2622_v56, %v1043_v62 }
 0x185   : > { %v2570_v37 = vpop.f32.mrf.mxu0  ;;  %v2625_v16 = vadd.f32 %v2624_v36, %v2623_v34 }
 0x186   : > { %v2626_v38 = vpop.f32.mrf.mxu1  ;;  %v1048_v15 = vadd.f32 %v2569_v14, %v943_v51 }
 0x187   : > { %v2571_v39 = vpop.f32.mrf.mxu0 }
 0x188   : > { %v2627_v40 = vpop.f32.mrf.mxu1  ;;  %v2572_v59 = vadd.f32 %v2571_v39, %v2570_v37 }
 0x189   : > { %v2573_v41 = vpop.f32.mrf.mxu0  ;;  %v2628_v8 = vadd.f32 %v2627_v40, %v2626_v38 }
 0x18a   : > { %v2629_v42 = vpop.f32.mrf.mxu1  ;;  %v1053_v5 = vadd.f32 %v2572_v59, %v948_v10 }
 0x18b   : > { %v2574_v43 = vpop.f32.mrf.mxu0 }
 0x18c   : > { %v2630_v44 = vpop.f32.mrf.mxu1  ;;  %v2575_v37 = vadd.f32 %v2574_v43, %v2573_v41  ;;  %v1158_v36 = vadd.f32 %v2628_v8, %v1053_v5 }
 0x18d   : > { %v2576_v45 = vpop.f32.mrf.mxu0  ;;  %v2631_v26 = vadd.f32 %v2630_v44, %v2629_v42 }
 0x18e   : > { %v2632_v49 = vpop.f32.mrf.mxu1  ;;  %v1058_v38 = vadd.f32 %v2575_v37, %v953_v29 }
 0x18f   : > { %v2577_v53 = vpop.f32.mrf.mxu0 }
 0x190   : > { %v2633_v55 = vpop.f32.mrf.mxu1  ;;  %v2578_v12 = vadd.f32 %v2577_v53, %v2576_v45  ;;  %v1153_v53 = vadd.f32 %v2625_v16, %v1048_v15  ;;  %v1163_v63 = vadd.f32 %v2631_v26, %v1058_v38 }
 0x191   : > { %v2579_v57 = vpop.f32.mrf.mxu0  ;;  %v2634_v40 = vadd.f32 %v2633_v55, %v2632_v49 }
 0x192   : > { %v3731_v6 = vpop.f32.mrf.mxu1  ;;  %v1063_v39 = vadd.f32 %v2578_v12, %v958_v31 }
 0x193   : > { %3973 = vst [vmem:[#allocation18_spill] sm:$0xff] %v3731_v6  ;;  %v2580_v60 = vpop.f32.mrf.mxu0 }
 0x194   : > { %v2636_v61 = vpop.f32.mrf.mxu1  ;;  %v2581_v41 = vadd.f32 %v2580_v60, %v2579_v57  ;;  %v1168_v60 = vadd.f32 %v2634_v40, %v1063_v39  ;;  %v1667_v39 = vld [vmem:[#allocation8 + $0x378] sm:$0xff] }
 0x195   : > { %v2582_v48 = vpop.f32.mrf.mxu0 }
 0x196   : > { %v2638_v7 = vpop.f32.mrf.mxu1  ;;  %v1068_v49 = vadd.f32 %v2581_v41, %v963_v54 }
 0x197   : > { %v2583_v6 = vpop.f32.mrf.mxu0 }
 0x198   : > { %v2584_v4 = vadd.f32 %v2583_v6, %v2582_v48  ;;  %v2639_v32 = vpop.f32.mrf.mxu1 }
 0x199   : > { %v2947_v3 = vpop.f32.mrf.mxu0  ;;  %v2640_v1 = vadd.f32 %v2639_v32, %v2638_v7 }
 0x19a   : > { %v1253_v19 = vadd.f32 %v2947_v3, %v1148_v9  ;;  %v1073_v58 = vadd.f32 %v2584_v4, %v968_v47  ;;  %v3978_v55 = vld [vmem:[#allocation18_spill] sm:$0xff] }
 0x19b   : > { %v1247_v25 = vpop.f32.mrf.mxu0  ;;  %v2637_v57 = vadd.f32 %v2636_v61, %v3978_v55  ;;  %v1679_v55 = vld [vmem:[#allocation8 + $0x3d8] sm:$0xff] }
 0x19c   : > { %v1294_v34 = vmul.f32 %v3736_v0, %v1253_v19  ;;  %v1248_v35 = vadd.f32 %v1247_v25, %v1143_v17  ;;  %v1178_v14 = vadd.f32 %v2640_v1, %v1073_v58  ;;  %v1681_v58 = vld [vmem:[#allocation8 + $0x3e8] sm:$0xff] }
 0x19d   : > { %v2950_v43 = vpop.f32.mrf.mxu0  ;;  %v1173_v9 = vadd.f32 %v2637_v57, %v1068_v49  ;;  %v1663_v57 = vld [vmem:[#allocation8 + $0x358] sm:$0xff] }
 0x19e   : > { %v1309_v45 = vadd.f32 %v3745_v23, %v1294_v34  ;;  %v1293_v6 = vmul.f32 %v3736_v0, %v1248_v35  ;;  %v1263_v52 = vadd.f32 %v2950_v43, %v1158_v36  ;;  %v1486_v36 = vld [vmem:[#allocation2 + $0x10] sm:$0xff] }
 0x19f   : > { %v1257_v42 = vpop.f32.mrf.mxu0  ;;  %v1682_v43 = vld [vmem:[#allocation8 + $0x3f0] sm:$0xff] }
 0x1a0   : > { %v3750_v44 = vmax.f32 %v1309_v45, 0.0  ;;  %v1308_v2 = vadd.f32 %v3745_v23, %v1293_v6  ;;  %v1296_v62 = vmul.f32 %v3736_v0, %v1263_v52  ;;  %v1258_v56 = vadd.f32 %v1257_v42, %v1153_v53  ;;  %v1666_v6 = vld [vmem:[#allocation8 + $0x370] sm:$0xff]  ;;  %v1665_v42 = vld [vmem:[#allocation8 + $0x368] sm:$0xff] }
 0x1a1   : > { %v2953_v59 = vpop.f32.mrf.mxu0 }
 0x1a2   : > { %v1332_v27 = vrot.slane %v3750_v44, 7  ;;  %v1370_v30 = vrot.slane %v3750_v44, 1  ;;  %v3757_v46 = vmax.f32 %v1308_v2, 0.0  ;;  %v1311_v48 = vadd.f32 %v3745_v23, %v1296_v62  ;;  %v1680_v62 = vld [vmem:[#allocation8 + $0x3e0] sm:$0xff] }
 0x1a3   : > { %v1295_v10 = vmul.f32 %v3736_v0, %v1258_v56  ;;  %v1273_v13 = vadd.f32 %v2953_v59, %v1168_v60  ;;  %v1267_v11 = vpop.f32.mrf.mxu0  ;;  %v1664_v56 = vld [vmem:[#allocation8 + $0x360] sm:$0xff]  ;;  %v1678_v59 = vld [vmem:[#allocation8 + $0x3d0] sm:$0xff] }
 0x1a4   : > { %1346 = vst [vmem:[#allocation2 + $0x90] sm:$0xfe] %v1332_v27  ;;  %1384 = vst [vmem:[#allocation2 + $0xa0] sm:$0x7f] %v1370_v30  ;;  %v1331_v61 = vrot.slane %v3757_v46, 7  ;;  %v1369_v22 = vrot.slane %v3757_v46, 1  ;;  %v1268_v51 = vadd.f32 %v1267_v11, %v1163_v63  ;;  %1769 = vmatprep.mubr.f32.mxu1 %v3757_v46 }
 0x1a5   : > { %1403 = vst [vmem:[#allocation2 + $0x60] sm:$0xfe] %v1332_v27  ;;  %1429 = vst [vmem:[#allocation2 + $0x70] sm:$0x7f] %v1370_v30  ;;  %v3763_v24 = vmax.f32 %v1311_v48, 0.0  ;;  %v1310_v5 = vadd.f32 %v3745_v23, %v1295_v10  ;;  %v1298_v8 = vmul.f32 %v3736_v0, %v1273_v13  ;;  %v2956_v7 = vpop.f32.mrf.mxu0  ;;  %v1677_v48 = vld [vmem:[#allocation8 + $0x3c8] sm:$0xff] }
 0x1a6   : > { %1444 = vst [vmem:[#allocation2 + $0x30] sm:$0xfe] %v1332_v27  ;;  %1468 = vst [vmem:[#allocation2 + $0x40] sm:$0x7f] %v1370_v30  ;;  %v1297_v37 = vmul.f32 %v3736_v0, %v1268_v51  ;;  %v1283_v12 = vadd.f32 %v2956_v7, %v1178_v14  ;;  %v1662_v27 = vld [vmem:[#allocation8 + $0x350] sm:$0xff]  ;;  %v1661_v10 = vld [vmem:[#allocation8 + $0x348] sm:$0xff] }
 0x1a7   : > { %1345 = vst [vmem:[#allocation2 + $0x48] sm:$0xfe] %v1331_v61  ;;  %1383 = vst [vmem:[#allocation2 + $0x58] sm:$0x7f] %v1369_v22  ;;  %v1334_v29 = vrot.slane %v3763_v24, 7  ;;  %v1372_v31 = vrot.slane %v3763_v24, 1  ;;  %v1313_v15 = vadd.f32 %v3745_v23, %v1298_v8  ;;  %v1277_v16 = vpop.f32.mrf.mxu0 }
 0x1a8   : > { %1402 = vst [vmem:[#allocation2 + $0x18] sm:$0xfe] %v1331_v61  ;;  %1428 = vst [vmem:[#allocation2 + $0x28] sm:$0x7f] %v1369_v22  ;;  %v3771_v3 = vmax.f32 %v1310_v5, 0.0  ;;  %v1312_v19 = vadd.f32 %v3745_v23, %v1297_v37  ;;  %v1300_v17 = vmul.f32 %v3736_v0, %v1283_v12  ;;  %v1278_v33 = vadd.f32 %v1277_v16, %v1173_v9  ;;  %v1676_v11 = vld [vmem:[#allocation8 + $0x3c0] sm:$0xff] }
 0x1a9   : > { %1348 = vst [vmem:[#allocation2 + $0x120] sm:$0xfe] %v1334_v29  ;;  %1386 = vst [vmem:[#allocation2 + $0x130] sm:$0x7f] %v1372_v31  ;;  %v3778_v20 = vmax.f32 %v1313_v15, 0.0  ;;  %v1660_v61 = vld [vmem:[#allocation8 + $0x340] sm:$0xff] }
 0x1aa   : > { %1405 = vst [vmem:[#allocation2 + $0xf0] sm:$0xfe] %v1334_v29  ;;  %1431 = vst [vmem:[#allocation2 + $0x100] sm:$0x7f] %v1372_v31  ;;  %v1333_v18 = vrot.slane %v3771_v3, 7  ;;  %v1371_v50 = vrot.slane %v3771_v3, 1  ;;  %v1315_v28 = vadd.f32 %v3745_v23, %v1300_v17  ;;  %v1299_v47 = vmul.f32 %v3736_v0, %v1278_v33 }
 0x1ab   : > { %1446 = vst [vmem:[#allocation2 + $0xc0] sm:$0xfe] %v1334_v29  ;;  %1470 = vst [vmem:[#allocation2 + $0xd0] sm:$0x7f] %v1372_v31  ;;  %v3780_v21 = vmax.f32 %v1312_v19, 0.0  ;;  %v1336_v4 = vrot.slane %v3778_v20, 7 }
 0x1ac   : > { %1347 = vst [vmem:[#allocation2 + $0xd8] sm:$0xfe] %v1333_v18  ;;  %1385 = vst [vmem:[#allocation2 + $0xe8] sm:$0x7f] %v1371_v50  ;;  %v1374_v25 = vrot.slane %v3778_v20, 1  ;;  %v3788_v34 = vmax.f32 %v1315_v28, 0.0  ;;  %v1314_v35 = vadd.f32 %v3745_v23, %v1299_v47 }
 0x1ad   : > { %1404 = vst [vmem:[#allocation2 + $0xa8] sm:$0xfe] %v1333_v18  ;;  %1430 = vst [vmem:[#allocation2 + $0xb8] sm:$0x7f] %v1371_v50  ;;  %v1335_v26 = vrot.slane %v3780_v21, 7  ;;  %v1373_v32 = vrot.slane %v3780_v21, 1 }
 0x1ae   : > { %1445 = vst [vmem:[#allocation2 + $0x78] sm:$0xfe] %v1333_v18  ;;  %1469 = vst [vmem:[#allocation2 + $0x88] sm:$0x7f] %v1371_v50  ;;  %v1493_v0 = vld [vmem:[#allocation2 + $0x48] sm:$0xff]  ;;  %v1400_v40 = vrot.slane %v3788_v34, 7 }
 0x1af   : > { %1350 = vst [vmem:[#allocation2 + $0x1b0] sm:$0xfe] %v1336_v4  ;;  %1388 = vst [vmem:[#allocation2 + $0x1c0] sm:$0x7f] %v1374_v25  ;;  %v1487_v38 = vld [vmem:[#allocation2 + $0x18] sm:$0xff]  ;;  %v1426_v23 = vrot.slane %v3788_v34, 1  ;;  %1770 = vmatmul.mubr.f32.gmra.mxu1 %v1493_v0 }
 0x1b0   : > { %1407 = vst [vmem:[#allocation2 + $0x180] sm:$0xfe] %v1336_v4  ;;  %1433 = vst [vmem:[#allocation2 + $0x190] sm:$0x7f] %v1374_v25  ;;  %v3793_v41 = vmax.f32 %v1314_v35, 0.0  ;;  %1869 = vmatprep.mubr.f32.mxu0 %v1487_v38  ;;  %1774 = vmatprep.mubr.f32.mxu1 %v3750_v44  ;;  %v1496_v45 = vld [vmem:[#allocation2 + $0x60] sm:$0xff] }
 0x1b1   : > { %1448 = vst [vmem:[#allocation2 + $0x150] sm:$0xfe] %v1336_v4  ;;  %1472 = vst [vmem:[#allocation2 + $0x160] sm:$0x7f] %v1374_v25  ;;  %1870 = vmatmul.mubr.f32.vlgmr.msra.gmra.mxu0 %v1486_v36  ;;  %v1502_v54 = vld [vmem:[#allocation2 + $0x90] sm:$0xff]  ;;  %v1495_v1 = vld [vmem:[#allocation2 + $0x58] sm:$0xff] }
 0x1b2   : > { %1349 = vst [vmem:[#allocation2 + $0x168] sm:$0xfe] %v1335_v26  ;;  %1387 = vst [vmem:[#allocation2 + $0x178] sm:$0x7f] %v1373_v32  ;;  %v1337_v52 = vrot.slane %v3793_v41, 7  ;;  %v1375_v53 = vrot.slane %v3793_v41, 1  ;;  %1874 = vmatprep.mubr.f32.mxu0 %v1496_v45  ;;  %2834 = vmatpush3.msra.mxu0 %v1667_v39 }
 0x1b3   : > { %1406 = vst [vmem:[#allocation2 + $0x138] sm:$0xfe] %v1335_v26  ;;  %1432 = vst [vmem:[#allocation2 + $0x148] sm:$0x7f] %v1373_v32  ;;  %2835 = vmatprep.subr.mxu0 %v1682_v43  ;;  %1775 = vmatmul.mubr.f32.gmra.mxu1 %v1502_v54  ;;  %v1511_v49 = vld [vmem:[#allocation2 + $0xd8] sm:$0xff]  ;;  %v1504_v60 = vld [vmem:[#allocation2 + $0xa0] sm:$0xff] }
 0x1b4   : > { %1447 = vst [vmem:[#allocation2 + $0x108] sm:$0xfe] %v1335_v26  ;;  %1471 = vst [vmem:[#allocation2 + $0x118] sm:$0x7f] %v1373_v32  ;;  %2836 = vmatpush3.msra.mxu0 %v1666_v6  ;;  %1779 = vmatprep.mubr.f32.mxu1 %v3771_v3  ;;  %v1505_v2 = vld [vmem:[#allocation2 + $0xa8] sm:$0xff]  ;;  %v1514_v63 = vld [vmem:[#allocation2 + $0xf0] sm:$0xff] }
 0x1b5   : > { %1409 = vst [vmem:[#allocation2 + $0x210] sm:$0xfe] %v1400_v40  ;;  %1435 = vst [vmem:[#allocation2 + $0x220] sm:$0x7f] %v1426_v23  ;;  %1875 = vmatmul.mubr.f32.gmra.mxu0 %v1495_v1  ;;  %2837 = vmatprep.subr.mxu0 %v1681_v58  ;;  %v1520_v30 = vld [vmem:[#allocation2 + $0x120] sm:$0xff]  ;;  %v1513_v13 = vld [vmem:[#allocation2 + $0xe8] sm:$0xff] }
 0x1b6   : > { %1450 = vst [vmem:[#allocation2 + $0x1e0] sm:$0xfe] %v1400_v40  ;;  %1474 = vst [vmem:[#allocation2 + $0x1f0] sm:$0x7f] %v1426_v23  ;;  %1879 = vmatprep.mubr.f32.mxu0 %v1505_v2  ;;  %2838 = vmatpush3.msra.mxu0 %v1665_v42  ;;  %v1675_v51 = vld [vmem:[#allocation8 + $0x3b8] sm:$0xff]  ;;  %v1522_v8 = vld [vmem:[#allocation2 + $0x130] sm:$0xff] }
 0x1b7   : > { %1351 = vst [vmem:[#allocation2 + $0x1f8] sm:$0xfe] %v1337_v52  ;;  %1389 = vst [vmem:[#allocation2 + $0x208] sm:$0x7f] %v1375_v53  ;;  %2839 = vmatprep.subr.mxu0 %v1680_v62  ;;  %1780 = vmatmul.mubr.f32.gmra.mxu1 %v1511_v49  ;;  %v1659_v5 = vld [vmem:[#allocation8 + $0x338] sm:$0xff]  ;;  %v1674_v7 = vld [vmem:[#allocation8 + $0x3b0] sm:$0xff] }
 0x1b8   : > { %1408 = vst [vmem:[#allocation2 + $0x1c8] sm:$0xfe] %v1337_v52  ;;  %1434 = vst [vmem:[#allocation2 + $0x1d8] sm:$0x7f] %v1375_v53  ;;  %2840 = vmatpush3.msra.mxu0 %v1664_v56  ;;  %1784 = vmatprep.mubr.f32.mxu1 %v3763_v24  ;;  %v1532_v9 = vld [vmem:[#allocation2 + $0x180] sm:$0xff]  ;;  %v1658_v29 = vld [vmem:[#allocation8 + $0x330] sm:$0xff] }
 0x1b9   : > { %1449 = vst [vmem:[#allocation2 + $0x198] sm:$0xfe] %v1337_v52  ;;  %1473 = vst [vmem:[#allocation2 + $0x1a8] sm:$0x7f] %v1375_v53  ;;  %1880 = vmatmul.mubr.f32.gmra.mxu0 %v1504_v60  ;;  %2841 = vmatprep.subr.mxu0 %v1679_v55  ;;  %v1529_v22 = vld [vmem:[#allocation2 + $0x168] sm:$0xff]  ;;  %v1538_v31 = vld [vmem:[#allocation2 + $0x1b0] sm:$0xff] }
 0x1ba   : > { %1884 = vmatprep.mubr.f32.mxu0 %v1514_v63  ;;  %2842 = vmatpush3.msra.mxu0 %v1663_v57  ;;  %v1523_v14 = vld [vmem:[#allocation2 + $0x138] sm:$0xff]  ;;  %v1673_v37 = vld [vmem:[#allocation8 + $0x3a8] sm:$0xff]  ;;  %v1672_v16 = vld [vmem:[#allocation8 + $0x3a0] sm:$0xff] }
 0x1bb   : > { %2843 = vmatprep.subr.mxu0 %v1678_v59  ;;  %1785 = vmatmul.mubr.f32.gmra.mxu1 %v1520_v30  ;;  %v1657_v12 = vld [vmem:[#allocation8 + $0x328] sm:$0xff]  ;;  %v1531_v15 = vld [vmem:[#allocation2 + $0x178] sm:$0xff]  ;;  %v1656_v17 = vld [vmem:[#allocation8 + $0x320] sm:$0xff] }
 0x1bc   : > { %2844 = vmatpush3.msra.mxu0 %v1662_v27  ;;  %1789 = vmatprep.mubr.f32.mxu1 %v3780_v21  ;;  %v1671_v18 = vld [vmem:[#allocation8 + $0x398] sm:$0xff]  ;;  %v1489_v50 = vld [vmem:[#allocation2 + $0x28] sm:$0xff]  ;;  %v1540_v47 = vld [vmem:[#allocation2 + $0x1c0] sm:$0xff] }
 0x1bd   : > { %1885 = vmatmul.mubr.f32.gmra.mxu0 %v1513_v13  ;;  %2845 = vmatprep.subr.mxu0 %v1677_v48  ;;  %v1655_v28 = vld [vmem:[#allocation8 + $0x318] sm:$0xff]  ;;  %v1670_v4 = vld [vmem:[#allocation8 + $0x390] sm:$0xff]  ;;  %v1669_v32 = vld [vmem:[#allocation8 + $0x388] sm:$0xff] }
 0x1be   : > { %1889 = vmatprep.mubr.f32.mxu0 %v1523_v14  ;;  %2846 = vmatpush3.msra.mxu0 %v1661_v10  ;;  %v1547_v33 = vld [vmem:[#allocation2 + $0x1f8] sm:$0xff]  ;;  %v1550_v25 = vld [vmem:[#allocation2 + $0x210] sm:$0xff]  ;;  %v1653_v36 = vld [vmem:[#allocation8 + $0x308] sm:$0xff] }
 0x1bf   : > { %2847 = vmatprep.subr.mxu0 %v1676_v11  ;;  %1790 = vmatmul.mubr.f32.gmra.mxu1 %v1529_v22  ;;  %v1541_v19 = vld [vmem:[#allocation2 + $0x1c8] sm:$0xff]  ;;  %v1654_v26 = vld [vmem:[#allocation8 + $0x310] sm:$0xff]  ;;  %v1668_v39 = vld [vmem:[#allocation8 + $0x380] sm:$0xff] }
 0x1c0   : > { %2848 = vmatpush3.msra.mxu0 %v1660_v61  ;;  %1794 = vmatprep.mubr.f32.mxu1 %v3778_v20  ;;  %v1498_v35 = vld [vmem:[#allocation2 + $0x70] sm:$0xff]  ;;  %v1549_v0 = vld [vmem:[#allocation2 + $0x208] sm:$0xff]  ;;  %v3979_v40 = vld [vmem:[#allocation13_spill] sm:$0xff] }
 0x1c1   : > { %1890 = vmatmul.mubr.f32.gmra.mxu0 %v1522_v8  ;;  %2849 = vmatprep.subr.mxu0 %v1675_v51  ;;  %v1698_v38 = vld [vmem:[#allocation8 + $0x470] sm:$0xff]  ;;  %v1652_v23 = vld [vmem:[#allocation8 + $0x300] sm:$0xff]  ;;  %v1697_v43 = vld [vmem:[#allocation8 + $0x468] sm:$0xff]  ;;  %v3819_v8 = vpop.f32.mrf.mxu1 }
 0x1c2   : > { %1894 = vmatprep.mubr.f32.mxu0 %v1532_v9  ;;  %2850 = vmatpush3.msra.mxu0 %v1659_v5  ;;  %v1696_v45 = vld [vmem:[#allocation8 + $0x460] sm:$0xff]  ;;  %v1490_v6 = vld [vmem:[#allocation2 + $0x30] sm:$0xff]  ;;  %v1695_v52 = vld [vmem:[#allocation8 + $0x458] sm:$0xff] }
 0x1c3   : > { %2851 = vmatprep.subr.mxu0 %v1674_v7  ;;  %1795 = vmatmul.mubr.f32.gmra.mxu1 %v1538_v31  ;;  %v1516_v53 = vld [vmem:[#allocation2 + $0x100] sm:$0xff]  ;;  %v1499_v54 = vld [vmem:[#allocation2 + $0x78] sm:$0xff]  ;;  %v1694_v58 = vld [vmem:[#allocation8 + $0x450] sm:$0xff]  ;;  %v3821_v7 = vpop.f32.mrf.mxu1 }
 0x1c4   : > { %2852 = vmatpush3.msra.mxu0 %v1658_v29  ;;  %1799 = vmatprep.mubr.f32.mxu1 %v3793_v41  ;;  %v1525_v1 = vld [vmem:[#allocation2 + $0x148] sm:$0xff]  ;;  %v1508_v42 = vld [vmem:[#allocation2 + $0xc0] sm:$0xff]  ;;  %v1534_v62 = vld [vmem:[#allocation2 + $0x190] sm:$0xff] }
 0x1c5   : > { %1895 = vmatmul.mubr.f32.gmra.mxu0 %v1531_v15  ;;  %2853 = vmatprep.subr.mxu0 %v1673_v37  ;;  %v1692_v2 = vld [vmem:[#allocation8 + $0x440] sm:$0xff]  ;;  %v1517_v56 = vld [vmem:[#allocation2 + $0x108] sm:$0xff]  ;;  %v1690_v49 = vld [vmem:[#allocation8 + $0x430] sm:$0xff] }
 0x1c6   : > { %1899 = vmatprep.mubr.f32.mxu0 %v1541_v19  ;;  %2854 = vmatpush3.msra.mxu0 %v1657_v12  ;;  %v1543_v55 = vld [vmem:[#allocation2 + $0x1d8] sm:$0xff]  ;;  %v1526_v57 = vld [vmem:[#allocation2 + $0x150] sm:$0xff]  ;;  %v1688_v60 = vld [vmem:[#allocation8 + $0x420] sm:$0xff] }
 0x1c7   : > { %2855 = vmatprep.subr.mxu0 %v1672_v16  ;;  %1800 = vmatmul.mubr.f32.gmra.mxu1 %v1547_v33  ;;  %v1552_v59 = vld [vmem:[#allocation2 + $0x220] sm:$0xff]  ;;  %v1535_v63 = vld [vmem:[#allocation2 + $0x198] sm:$0xff]  ;;  %v1686_v27 = vld [vmem:[#allocation8 + $0x410] sm:$0xff] }
 0x1c8   : > { %2856 = vmatpush3.msra.mxu0 %v1656_v17  ;;  %1974 = vmatprep.mubr.f32.mxu1 %v1489_v50  ;;  %v1684_v30 = vld [vmem:[#allocation8 + $0x400] sm:$0xff]  ;;  %v1553_v10 = vld [vmem:[#allocation2 + $0x228] sm:$0xff]  ;;  %v1510_v14 = vld [vmem:[#allocation2 + $0xd0] sm:$0xff] }
 0x1c9   : > { %1900 = vmatmul.mubr.f32.gmra.mxu0 %v1540_v47  ;;  %2857 = vmatprep.subr.mxu0 %v1671_v18  ;;  %v1544_v48 = vld [vmem:[#allocation2 + $0x1e0] sm:$0xff]  ;;  %v3076_v13 = vld [vmem:[#allocation2 + $0x8] sm:$0xff]  ;;  %v1519_v61 = vld [vmem:[#allocation2 + $0x118] sm:$0xff] }
 0x1ca   : > { %1904 = vmatprep.mubr.f32.mxu0 %v1550_v25  ;;  %2858 = vmatpush3.msra.mxu0 %v1655_v28  ;;  %v1501_v11 = vld [vmem:[#allocation2 + $0x88] sm:$0xff]  ;;  %v1528_v22 = vld [vmem:[#allocation2 + $0x160] sm:$0xff]  ;;  %v1546_v51 = vld [vmem:[#allocation2 + $0x1f0] sm:$0xff] }
 0x1cb   : > { %2859 = vmatprep.subr.mxu0 %v1670_v4  ;;  %1975 = vmatmul.mubr.f32.vlgmr.msra.gmra.mxu1 %v3757_v46  ;;  %v1507_v46 = vld [vmem:[#allocation2 + $0xb8] sm:$0xff] }
 0x1cc   : > { %2860 = vmatpush3.msra.mxu0 %v1654_v26  ;;  %1979 = vmatprep.mubr.f32.mxu1 %v1498_v35  ;;  %v1555_v5 = vld [vmem:[#allocation2 + $0x238] sm:$0xff] }
 0x1cd   : > { %1905 = vmatmul.mubr.f32.gmra.mxu0 %v1549_v0  ;;  %2861 = vmatprep.subr.mxu0 %v1669_v32 }
 0x1ce   : > { %2958 = vmatpush3.msra.mxu1 %v3979_v40  ;;  %2862 = vmatpush3.msra.mxu0 %v1653_v36 }
 0x1cf   : > { %2079 = vmatprep.mubr.f32.mxu0 %v3750_v44  ;;  %2959 = vmatprep.subr.mxu1 %v1698_v38 }
 0x1d0   : > { %2863 = vmatprep.subr.mxu0 %v1668_v39  ;;  %2960 = vmatpush3.msra.mxu1 %v1698_v38 }
 0x1d1   : > { %1980 = vmatmul.mubr.f32.gmra.mxu1 %v3750_v44  ;;  %2864 = vmatpush3.msra.mxu0 %v1652_v23  ;;  %v1693_v44 = vld [vmem:[#allocation8 + $0x448] sm:$0xff] }
 0x1d2   : > { %2961 = vmatprep.subr.mxu1 %v1697_v43  ;;  %1984 = vmatprep.mubr.f32.mxu1 %v1507_v46 }
 0x1d3   : > { %2080 = vmatmul.mubr.f32.vlgmr.msra.gmra.mxu0 %v1490_v6  ;;  %2962 = vmatpush3.msra.mxu1 %v1697_v43 }
 0x1d4   : > { %2084 = vmatprep.mubr.f32.mxu0 %v3771_v3  ;;  %2963 = vmatprep.subr.mxu1 %v1696_v45 }
 0x1d5   : > { %2964 = vmatpush3.msra.mxu1 %v1696_v45 }
 0x1d6   : > { %1985 = vmatmul.mubr.f32.gmra.mxu1 %v3771_v3  ;;  %2965 = vmatprep.subr.mxu1 %v1695_v52  ;;  %v1691_v3 = vld [vmem:[#allocation8 + $0x438] sm:$0xff] }
 0x1d7   : > { %1989 = vmatprep.mubr.f32.mxu1 %v1516_v53  ;;  %2085 = vmatmul.mubr.f32.gmra.mxu0 %v1499_v54 }
 0x1d8   : > { %2966 = vmatpush3.msra.mxu1 %v1695_v52  ;;  %2089 = vmatprep.mubr.f32.mxu0 %v3763_v24 }
 0x1d9   : > { %2967 = vmatprep.subr.mxu1 %v1694_v58 }
 0x1da   : > { %2968 = vmatpush3.msra.mxu1 %v1694_v58 }
 0x1db   : > { %1990 = vmatmul.mubr.f32.gmra.mxu1 %v3763_v24  ;;  %2969 = vmatprep.subr.mxu1 %v1693_v44  ;;  %v1689_v24 = vld [vmem:[#allocation8 + $0x428] sm:$0xff] }
 0x1dc   : > { %1994 = vmatprep.mubr.f32.mxu1 %v1525_v1  ;;  %2090 = vmatmul.mubr.f32.gmra.mxu0 %v1508_v42 }
 0x1dd   : > { %2970 = vmatpush3.msra.mxu1 %v1693_v44  ;;  %2094 = vmatprep.mubr.f32.mxu0 %v3780_v21 }
 0x1de   : > { %2971 = vmatprep.subr.mxu1 %v1692_v2 }
 0x1df   : > { %2972 = vmatpush3.msra.mxu1 %v1692_v2 }
 0x1e0   : > { %1995 = vmatmul.mubr.f32.gmra.mxu1 %v3780_v21  ;;  %2973 = vmatprep.subr.mxu1 %v1691_v3  ;;  %v1687_v21 = vld [vmem:[#allocation8 + $0x418] sm:$0xff] }
 0x1e1   : > { %1999 = vmatprep.mubr.f32.mxu1 %v1534_v62  ;;  %2095 = vmatmul.mubr.f32.gmra.mxu0 %v1517_v56 }
 0x1e2   : > { %2974 = vmatpush3.msra.mxu1 %v1691_v3  ;;  %2099 = vmatprep.mubr.f32.mxu0 %v3778_v20 }
 0x1e3   : > { %2975 = vmatprep.subr.mxu1 %v1690_v49 }
 0x1e4   : > { %2976 = vmatpush3.msra.mxu1 %v1690_v49 }
 0x1e5   : > { %2000 = vmatmul.mubr.f32.gmra.mxu1 %v3778_v20  ;;  %2977 = vmatprep.subr.mxu1 %v1689_v24  ;;  %v1685_v20 = vld [vmem:[#allocation8 + $0x408] sm:$0xff] }
 0x1e6   : > { %2004 = vmatprep.mubr.f32.mxu1 %v1543_v55  ;;  %2100 = vmatmul.mubr.f32.gmra.mxu0 %v1526_v57 }
 0x1e7   : > { %2978 = vmatpush3.msra.mxu1 %v1689_v24  ;;  %2104 = vmatprep.mubr.f32.mxu0 %v3793_v41 }
 0x1e8   : > { %2979 = vmatprep.subr.mxu1 %v1688_v60 }
 0x1e9   : > { %2980 = vmatpush3.msra.mxu1 %v1688_v60 }
 0x1ea   : > { %2005 = vmatmul.mubr.f32.gmra.mxu1 %v3793_v41  ;;  %2981 = vmatprep.subr.mxu1 %v1687_v21  ;;  %v1492_v41 = vld [vmem:[#allocation2 + $0x40] sm:$0xff] }
 0x1eb   : > { %2009 = vmatprep.mubr.f32.mxu1 %v1552_v59  ;;  %2105 = vmatmul.mubr.f32.gmra.mxu0 %v1535_v63 }
 0x1ec   : > { %2982 = vmatpush3.msra.mxu1 %v1687_v21  ;;  %2109 = vmatprep.mubr.f32.mxu0 %v3788_v34 }
 0x1ed   : > { %2983 = vmatprep.subr.mxu1 %v1686_v27 }
 0x1ee   : > { %2984 = vmatpush3.msra.mxu1 %v1686_v27 }
 0x1ef   : > { %2010 = vmatmul.mubr.f32.gmra.mxu1 %v3788_v34  ;;  %2985 = vmatprep.subr.mxu1 %v1685_v20  ;;  %v1537_v34 = vld [vmem:[#allocation2 + $0x1a8] sm:$0xff] }
 0x1f0   : > { %2110 = vmatmul.mubr.f32.gmra.mxu0 %v1544_v48  ;;  %2986 = vmatpush3.msra.mxu1 %v1685_v20 }
 0x1f1   : > { %2989 = vmatprep.mubr.f32.mxu1 %v1492_v41  ;;  %2987 = vmatprep.subr.mxu1 %v1684_v30 }
 0x1f2   : > { %2988 = vmatpush3.msra.mxu1 %v1684_v30  ;;  %2114 = vmatprep.mubr.f32.mxu0 %v3076_v13 }
 0x1f3   : > { %2990 = vmatmul.mubr.f32.vlgmr.msra.gmra.mxu1 %v1501_v11 }
 0x1f4   : > { %2115 = vmatmul.mubr.f32.gmra.mxu0 %v1553_v10  ;;  %2992 = vmatprep.mubr.f32.mxu1 %v1510_v14 }
 0x1f7   : > { %2993 = vmatmul.mubr.f32.gmra.mxu1 %v1519_v61 }
 0x1f8   : > { %2995 = vmatprep.mubr.f32.mxu1 %v1528_v22 }
 0x1fb   : > { %2996 = vmatmul.mubr.f32.gmra.mxu1 %v1537_v34 }
 0x1fc   : > { %2998 = vmatprep.mubr.f32.mxu1 %v1546_v51 }
 0x1ff   : > { %2999 = vmatmul.mubr.f32.gmra.mxu1 %v1555_v5 }
 0x26f   : > { %v2700_v9 = vpop.f32.mrf.mxu1 }
 0x271   : > { %v2753_v29 = vpop.f32.mrf.mxu0  ;;  %v2701_v31 = vpop.f32.mrf.mxu1 }
 0x272   : > { %v2702_v11 = vadd.f32 %v2701_v31, %v2700_v9 }
 0x273   : > { %v2754_v37 = vpop.f32.mrf.mxu0  ;;  %v3823_v12 = vpop.f32.mrf.mxu1 }
 0x274   : > { %v2755_v14 = vadd.f32 %v2754_v37, %v2753_v29 }
 0x275   : > { %v2756_v15 = vpop.f32.mrf.mxu0  ;;  %v2704_v16 = vpop.f32.mrf.mxu1 }
 0x277   : > { %v2757_v19 = vpop.f32.mrf.mxu0  ;;  %v2706_v17 = vpop.f32.mrf.mxu1 }
 0x278   : > { %v2758_v41 = vadd.f32 %v2757_v19, %v2756_v15 }
 0x279   : > { %v2759_v33 = vpop.f32.mrf.mxu0  ;;  %v2707_v18 = vpop.f32.mrf.mxu1 }
 0x27a   : > { %v2708_v15 = vadd.f32 %v2707_v18, %v2706_v17 }
 0x27b   : > { %v2760_v50 = vpop.f32.mrf.mxu0  ;;  %v2709_v28 = vpop.f32.mrf.mxu1 }
 0x27c   : > { %v2761_v34 = vadd.f32 %v2760_v50, %v2759_v33 }
 0x27d   : > { %v2762_v47 = vpop.f32.mrf.mxu0  ;;  %v2710_v4 = vpop.f32.mrf.mxu1 }
 0x27e   : > { %v2711_v19 = vadd.f32 %v2710_v4, %v2709_v28 }
 0x27f   : > { %v2763_v25 = vpop.f32.mrf.mxu0  ;;  %v3825_v26 = vpop.f32.mrf.mxu1 }
 0x280   : > { %v2764_v51 = vadd.f32 %v2763_v25, %v2762_v47 }
 0x281   : > { %v2765_v32 = vpop.f32.mrf.mxu0  ;;  %v2713_v35 = vpop.f32.mrf.mxu1 }
 0x282   : > { %v1887_v47 = vadd.f32 %v2764_v51, %v2708_v15  ;;  %v2714_v25 = vadd.f32 %v2713_v35, %v3825_v26 }
 0x283   : > { %v2766_v36 = vpop.f32.mrf.mxu0  ;;  %v3827_v0 = vpop.f32.mrf.mxu1 }
 0x284   : > { %3980 = vst [vmem:[#allocation14_spill] sm:$0xff] %v3827_v0  ;;  %v2767_v5 = vadd.f32 %v2766_v36, %v2765_v32 }
 0x285   : > { %v2768_v38 = vpop.f32.mrf.mxu0  ;;  %v3829_v39 = vpop.f32.mrf.mxu1 }
 0x286   : > { %3981 = vst [vmem:[#allocation16_spill] sm:$0xff] %v3829_v39  ;;  %v2705_v39 = vadd.f32 %v2704_v16, %v3823_v12  ;;  %v1892_v32 = vadd.f32 %v2767_v5, %v2711_v19 }
 0x287   : > { %v2769_v40 = vpop.f32.mrf.mxu0  ;;  %v3831_v23 = vpop.f32.mrf.mxu1 }
 0x288   : > { %3982 = vst [vmem:[#allocation15_spill] sm:$0xff] %v3831_v23  ;;  %v1882_v50 = vadd.f32 %v2761_v34, %v2705_v39  ;;  %v3852_v39 = vld [vmem:[%s3947_s5] ss:$0 sm:$0xff] }
 0x289   : > { %v3833_v43 = vpop.f32.mrf.mxu0  ;;  %v3835_v46 = vpop.f32.mrf.mxu1 }
 0x28a   : > { %3983 = vst [vmem:[#allocation17_spill] sm:$0xff] %v3833_v43  ;;  %3984 = vst [vmem:[#allocation18_spill] sm:$0xff] %v3835_v46  ;;  %v2699_v43 = vadd.f32 %v3821_v7, %v3819_v8  ;;  %v1877_v46 = vadd.f32 %v2758_v41, %v2702_v11 }
 0x28b   : > { %v3837_v45 = vpop.f32.mrf.mxu0  ;;  %v2809_v6 = vpop.f32.mrf.mxu1  ;;  %v3988_v16 = vld [vmem:[#allocation14_spill] sm:$0xff] }
 0x28c   : > { %3985 = vst [vmem:[#allocation13_spill] sm:$0xff] %v3837_v45  ;;  %v1872_v9 = vadd.f32 %v2755_v14, %v2699_v43 }
 0x28d   : > { %v2774_v52 = vpop.f32.mrf.mxu0  ;;  %v2810_v53 = vpop.f32.mrf.mxu1  ;;  %v3989_v17 = vld [vmem:[#allocation16_spill] sm:$0xff] }
 0x28e   : > { %v2811_v23 = vadd.f32 %v2810_v53, %v2809_v6  ;;  %v2717_v18 = vadd.f32 %v3989_v17, %v3988_v16 }
 0x28f   : > { %v2775_v54 = vpop.f32.mrf.mxu0 }
 0x290   : > { %v1977_v7 = vadd.f32 %v2811_v23, %v1872_v9  ;;  %v2776_v4 = vadd.f32 %v2775_v54, %v2774_v52 }
 0x291   : > { %v2812_v58 = vpop.f32.mrf.mxu1 }
 0x293   : > { %v2865_v44 = vpop.f32.mrf.mxu0  ;;  %v2813_v1 = vpop.f32.mrf.mxu1 }
 0x294   : > { %v2814_v61 = vadd.f32 %v2813_v1, %v2812_v58  ;;  %v3990_v58 = vld [vmem:[#allocation15_spill] sm:$0xff] }
 0x295   : > { %v2866_v42 = vpop.f32.mrf.mxu0 }
 0x296   : > { %v2815_v2 = vpop.f32.mrf.mxu1  ;;  %v1982_v29 = vadd.f32 %v2814_v61, %v1877_v46  ;;  %v2867_v31 = vadd.f32 %v2866_v42, %v2865_v44  ;;  %v3991_v44 = vld [vmem:[#allocation18_spill] sm:$0xff]  ;;  %v3992_v42 = vld [vmem:[#allocation17_spill] sm:$0xff] }
 0x297   : > { %v2868_v3 = vpop.f32.mrf.mxu0  ;;  %v2720_v1 = vadd.f32 %v3991_v44, %v3990_v58 }
 0x298   : > { %v2816_v62 = vpop.f32.mrf.mxu1  ;;  %v2082_v46 = vadd.f32 %v2867_v31, %v1977_v7 }
 0x299   : > { %v2869_v56 = vpop.f32.mrf.mxu0  ;;  %v2817_v36 = vadd.f32 %v2816_v62, %v2815_v2  ;;  %v3993_v2 = vld [vmem:[#allocation13_spill] sm:$0xff] }
 0x29a   : > { %v3861_v62 = vld [vmem:[%s3948_s6] ss:$0 sm:$0xff] }
 0x29b   : > { %v2818_v49 = vpop.f32.mrf.mxu1 }
 0x29c   : > { %v2871_v24 = vpop.f32.mrf.mxu0 }
 0x29d   : > { %v2819_v55 = vpop.f32.mrf.mxu1 }
 0x29e   : > { %v2872_v57 = vpop.f32.mrf.mxu0  ;;  %v2820_v37 = vadd.f32 %v2819_v55, %v2818_v49  ;;  %v1987_v49 = vadd.f32 %v2817_v36, %v1882_v50 }
 0x29f   : > { %v2873_v35 = vadd.f32 %v2872_v57, %v2871_v24 }
 0x2a0   : > { %v2821_v60 = vpop.f32.mrf.mxu1  ;;  %v1992_v26 = vadd.f32 %v2820_v37, %v1887_v47 }
 0x2a1   : > { %v2874_v21 = vpop.f32.mrf.mxu0 }
 0x2a2   : > { %v2822_v59 = vpop.f32.mrf.mxu1 }
 0x2a3   : > { %v2875_v63 = vpop.f32.mrf.mxu0  ;;  %v2823_v52 = vadd.f32 %v2822_v59, %v2821_v60 }
 0x2a4   : > { %v2876_v6 = vadd.f32 %v2875_v63, %v2874_v21  ;;  %v1907_v63 = vadd.f32 %v2776_v4, %v2720_v1 }
 0x2a5   : > { %v2824_v27 = vpop.f32.mrf.mxu1  ;;  %v1997_v11 = vadd.f32 %v2823_v52, %v1892_v32 }
 0x2a6   : > { %v3839_v20 = vpop.f32.mrf.mxu0  ;;  %v2097_v21 = vadd.f32 %v2876_v6, %v1992_v26 }
 0x2a7   : > { %3986 = vst [vmem:[#allocation19_spill] sm:$0xff] %v3839_v20  ;;  %v2825_v30 = vpop.f32.mrf.mxu1  ;;  %v2870_v20 = vadd.f32 %v2869_v56, %v2868_v3  ;;  %v2773_v3 = vadd.f32 %v3993_v2, %v3992_v42 }
 0x2a8   : > { %v2878_v48 = vpop.f32.mrf.mxu0 }
 0x2a9   : > { %v2087_v12 = vadd.f32 %v2870_v20, %v1982_v29 }
 0x2aa   : > { %v3841_v10 = vpop.f32.mrf.mxu1 }
 0x2ab   : > { %3987 = vst [vmem:[#allocation20_spill] sm:$0xff] %v3841_v10  ;;  %v2880_v13 = vpop.f32.mrf.mxu0  ;;  %v2770_v10 = vadd.f32 %v2769_v40, %v2768_v38  ;;  %v2826_v38 = vadd.f32 %v2825_v30, %v2824_v27 }
 0x2ac   : > { %v2828_v22 = vpop.f32.mrf.mxu1 }
 0x2ad   : > { %v2881_v45 = vpop.f32.mrf.mxu0  ;;  %v1897_v28 = vadd.f32 %v2770_v10, %v2714_v25 }
 0x2ae   : > { %v2882_v54 = vadd.f32 %v2881_v45, %v2880_v13  ;;  %v3994_v20 = vld [vmem:[#allocation19_spill] sm:$0xff]  ;;  %v2092_v13 = vadd.f32 %v2873_v35, %v1987_v49 }
 0x2af   : > { %v2830_v0 = vpop.f32.mrf.mxu1  ;;  %v2002_v27 = vadd.f32 %v2826_v38, %v1897_v28  ;;  %v2879_v30 = vadd.f32 %v2878_v48, %v3994_v20 }
 0x2b0   : > { %v2883_v33 = vpop.f32.mrf.mxu0 }
 0x2b1   : > { %v2831_v8 = vpop.f32.mrf.mxu1  ;;  %v2107_v5 = vadd.f32 %v2882_v54, %v2002_v27  ;;  %v2102_v50 = vadd.f32 %v2879_v30, %v1997_v11 }
 0x2b2   : > { %v2884_v53 = vpop.f32.mrf.mxu0  ;;  %v2832_v41 = vadd.f32 %v2831_v8, %v2830_v0  ;;  %v3995_v14 = vld [vmem:[#allocation20_spill] sm:$0xff]  ;;  %v1902_v0 = vadd.f32 %v2773_v3, %v2717_v18 }
 0x2b3   : > { %v2991_v40 = vpop.f32.mrf.mxu1  ;;  %v2829_v61 = vadd.f32 %v2828_v22, %v3995_v14  ;;  %v2885_v31 = vadd.f32 %v2884_v53, %v2883_v33 }
 0x2b4   : > { %v2192_v23 = vadd.f32 %v2991_v40, %v2087_v12  ;;  %v2886_v43 = vpop.f32.mrf.mxu0  ;;  %v2012_v29 = vadd.f32 %v2832_v41, %v1907_v63 }
 0x2b5   : > { %v2186_v56 = vpop.f32.mrf.mxu1  ;;  %v2007_v8 = vadd.f32 %v2829_v61, %v1902_v0 }
 0x2b6   : > { %v2233_v24 = vmul.f32 %v3852_v39, %v2192_v23  ;;  %v2187_v55 = vadd.f32 %v2186_v56, %v2082_v46  ;;  %v2887_v57 = vpop.f32.mrf.mxu0 }
 0x2b7   : > { %v2994_v60 = vpop.f32.mrf.mxu1  ;;  %v2888_v34 = vadd.f32 %v2887_v57, %v2886_v43  ;;  %v2112_v17 = vadd.f32 %v2885_v31, %v2007_v8 }
 0x2b8   : > { %v2248_v45 = vadd.f32 %v3861_v62, %v2233_v24  ;;  %v2232_v59 = vmul.f32 %v3852_v39, %v2187_v55  ;;  %v2202_v10 = vadd.f32 %v2994_v60, %v2097_v21 }
 0x2b9   : > { %v2196_v51 = vpop.f32.mrf.mxu1  ;;  %v2117_v36 = vadd.f32 %v2888_v34, %v2012_v29 }
 0x2ba   : > { %v2256_v15 = vmax.f32 %v2248_v45, 0.0  ;;  %v2247_v19 = vadd.f32 %v3861_v62, %v2232_v59  ;;  %v2235_v9 = vmul.f32 %v3852_v39, %v2202_v10  ;;  %v2197_v48 = vadd.f32 %v2196_v51, %v2092_v13 }
 0x2bb   : > { %v2997_v37 = vpop.f32.mrf.mxu1 }
 0x2bc   : > { %2264 = vst [vmem:[%s3871_s29 + $0x8] sm:$0xff] %v2256_v15  ;;  %v2255_v22 = vmax.f32 %v2247_v19, 0.0  ;;  %v2250_v47 = vadd.f32 %v3861_v62, %v2235_v9  ;;  %v2234_v25 = vmul.f32 %v3852_v39, %v2197_v48  ;;  %v2212_v32 = vadd.f32 %v2997_v37, %v2107_v5 }
 0x2bd   : > { %v2206_v7 = vpop.f32.mrf.mxu1 }
 0x2be   : > { %2263 = vst [vmem:[%s3871_s29] sm:$0xff] %v2255_v22  ;;  %v2258_v33 = vmax.f32 %v2250_v47, 0.0  ;;  %v2249_v6 = vadd.f32 %v3861_v62, %v2234_v25  ;;  %v2237_v53 = vmul.f32 %v3852_v39, %v2212_v32  ;;  %v2207_v12 = vadd.f32 %v2206_v7, %v2102_v50 }
 0x2bf   : > { %v3000_v16 = vpop.f32.mrf.mxu1 }
 0x2c0   : > { %2266 = vst [vmem:[%s3871_s29 + $0x18] sm:$0xff] %v2258_v33  ;;  %v2257_v18 = vmax.f32 %v2249_v6, 0.0  ;;  %v2252_v28 = vadd.f32 %v3861_v62, %v2237_v53  ;;  %v2236_v4 = vmul.f32 %v3852_v39, %v2207_v12  ;;  %v2222_v38 = vadd.f32 %v3000_v16, %v2117_v36 }
 0x2c1   : > { %v2216_v40 = vpop.f32.mrf.mxu1 }
 0x2c2   : > { %2265 = vst [vmem:[%s3871_s29 + $0x10] sm:$0xff] %v2257_v18  ;;  %v2260_v26 = vmax.f32 %v2252_v28, 0.0  ;;  %v2251_v35 = vadd.f32 %v3861_v62, %v2236_v4  ;;  %v2239_v23 = vmul.f32 %v3852_v39, %v2222_v38  ;;  %v2217_v43 = vadd.f32 %v2216_v40, %v2112_v17 }
 0x2c4   : > { %2268 = vst [vmem:[%s3871_s29 + $0x28] sm:$0xff] %v2260_v26  ;;  %v2259_v46 = vmax.f32 %v2251_v35, 0.0  ;;  %v2254_v58 = vadd.f32 %v3861_v62, %v2239_v23  ;;  %v2238_v44 = vmul.f32 %v3852_v39, %v2217_v43 }
 0x2c6   : > { %2267 = vst [vmem:[%s3871_s29 + $0x20] sm:$0xff] %v2259_v46  ;;  %v2262_v1 = vmax.f32 %v2254_v58, 0.0  ;;  %v2253_v42 = vadd.f32 %v3861_v62, %v2238_v44 }
 0x2c8   : > { %2270 = vst [vmem:[%s3871_s29 + $0x38] sm:$0xff] %v2262_v1  ;;  %v2261_v2 = vmax.f32 %v2253_v42, 0.0 }
 0x2ca   : > { %2269 = vst [vmem:[%s3871_s29 + $0x30] sm:$0xff] %v2261_v2 }
 0x2cb   : > { %3170 = shalt.err (!%p3167_p9)
}
 0x2cc   : > { %s3171_s22 = scalar_lea.hbm %s3895_s30, 1024  ;;  %s3175_s10 = scalar_lea.hbm %s3949_s7, 2048 }
 0x2cd   : > { %p3172_p13 = scmp.ne.s32.totalorder %s3895_s30, %s3171_s22  ;;  %p3176_p4 = scmp.lt.s32.totalorder %s3895_s30, %s3949_s7 }
 0x2ce   : > { %p3177_p8 = scmp.lt.s32.totalorder %s3175_s10, %s3171_s22 }
 0x2cf   : > { %p3173_p5 = pnand %p3172_p13, %p3996_p10 }
 0x2d0   : > { %p3178_p3 = por %p3177_p8, %p3176_p4 }
 0x2d1   : > { %p3174_p0 = pneg %p3173_p5 }
 0x2d3   : > { %p3179_p11 = pnand %p3178_p3, %p3174_p0 }
 0x2d5   : > { %3182 = shalt.err (!%p3179_p11)
}
 0x2d6   : > { %s3236_s16 = smov 128   ;;  %s3237_s17 = smov 8  }
 0x2d7   : > { %3011 = dma.vmem_to_hbm [thread:$0]  (%p3996_p10), %s3897_s1, 1024, %s3895_s30, %s2272_s9, %s3236_s16, %s3236_s16, %s3237_s17  }
 0x2d8 PF: > { %s2300_s28 = sand.u32 1, %s3213_s24   ;;  %p3997_p1 = scmp.ne.s32.totalorder %s3957_s8, 0 }
 0x2d9   : > { %p3998_p2 = scmp.ge.s32.totalorder %s3225_s27, 2  ;;  %s2301_s18 = scalar_lea.sflag [#allocation5], %s2300_s28 }
 0x2db   : > { %p3025_p6 = pnand %p3998_p2, %p3997_p1 }
 0x2dd   : > { %p3026_p12 = pneg %p3025_p6 }
 0x2df   : > { %3208 = dma.done.wait (%p3026_p12), %s2301_s18, 1024  }
 0x2e0   : > { %3210 = vsyncadd (%p3026_p12), %s2301_s18, 4294966272  ;;  %p21_p7 = scmp.ge.s32.totalorder %s3350_s23, 4   ;;  %s3999_s24 = smov %s3217_s25 }
 0x2e1   : > { %s4000_s25 = smov %s3221_s26  ;;  %s4001_s26 = smov %s3366_s12 }
 0x2e2   : > { %s4002_s27 = smov %s3350_s23  ;;  %23 = sbr.rel (!%p21_p7) target bundleno = 8 (0x8), region = 104 }
 0x2e7   :  { %2306 = vsyncpa [#allocation4], 1 }
 0x2e8   :  { %2308 = vsyncpa [#allocation4 + $0x1], 1 }
 0x2e9   :  { %2309 = vsyncpa [#allocation7], 1 }
 0x2ea   :  { %2310 = vsyncpa [#allocation5], 1 }
 0x2eb   :  { %2312 = vsyncpa [#allocation5 + $0x1], 1 }

</bundles_post_ra>
